<compile_context>
chip_gen: v6e
topology: v6e:2x2x1
jax: 0.10.0
libtpu: 0.0.40
codegen_flags: <defaults>
</compile_context>

<pallas_src>
import functools

import jax
import jax.numpy as jnp
import numpy as np
from jax.experimental import pallas as pl
from jax.experimental.pallas import tpu as pltpu

# Architecture constants (symmetric VAE on 1x16x16 contact maps).
H = W = 16
P = H * W                   # 256 fine-grid positions (lane dim = y*W + x)
C = 8                       # conv channel width
PH = (H // 2) * (W // 2)    # 64 coarse-grid positions after the stride-2 conv
HID = 32                    # affine width
LAT = 8                     # latent dimension
F32 = jnp.float32

# 3x3 SAME-conv tap order (ki, kj) row-major; lane shift of the flat y*W+x index.
_SHIFTS = tuple((ki - 1) * W + (kj - 1) for ki in range(3) for kj in range(3))


# ---------------------------------------------------------------------------
# Fused forward kernel.
# Activation layout: rows = sample*C + channel, lanes = y*W + x (256 lanes).
# 3x3 SAME convs = 9 XLU lane-rolls + boundary masks + per-sample channel-mix
# matmuls; stride-2 pick / zero-insert upsample are host-packed 0/1 matrices.
# ---------------------------------------------------------------------------
def _vae_kernel(x_ref, eps_ref,
                masks_ref, expand_ref, collapse_ref, down_ref, up_ref,
                w1_ref, b1_ref, w2_ref, b2_ref,
                wea_ref, chselh_ref, sumchh_ref, bea_ref,
                whd_ref, bhd_ref,
                wd1_ref, bd1_ref, wd2_ref, bd2_ref,
                chselp_ref, sumchp_ref,
                wt1_ref, bt1_ref, wt2_ref, bt2_ref,
                recon_ref, zml_ref, *, n):
    nc = n * C
    dot = functools.partial(jnp.dot, preferred_element_type=F32)
    relu = lambda v: jnp.maximum(v, 0.0)
    sigmoid = lambda v: 0.5 * (jnp.tanh(0.5 * v) + 1.0)   # overflow-free sigmoid

    masks = masks_ref[...]                                 # (9, P) tap validity
    tap_mask = [masks[t:t + 1, :] for t in range(9)]

    def shifted_taps(a):
        # Masked lane-rolled copies of a (rows, P) activation for the 9 taps:
        # tap t reads input pixel p + _SHIFTS[t]; boundary (and any wrap) reads
        # are zeroed by the mask.  XLU roll + VPU mask -- no gather matmuls.
        outs = []
        for t, s in enumerate(_SHIFTS):
            rolled = a if s == 0 else pltpu.roll(a, shift=(-s) % P, axis=1)
            outs.append(rolled * tap_mask[t])
        return outs

    # -------------------------------- encoder -------------------------------
    x16 = dot(expand_ref[...], x_ref[...])                 # (nc, P): row r = sample r//C
    w1 = w1_ref[...]                                       # (nc, 9) per-row tap scales
    h1 = jnp.zeros((nc, P), F32)
    for t, st in enumerate(shifted_taps(x16)):             # Conv 1->8, s1, SAME
        h1 = h1 + w1[:, t:t + 1] * st
    h1 = relu(h1 + b1_ref[...])

    c2 = jnp.zeros((nc, P), F32)
    for t, st in enumerate(shifted_taps(h1)):              # Conv 8->8 (full-res taps)
        c2 = c2 + dot(w2_ref[t], st)
    h2 = relu(dot(c2, down_ref[...]) + b2_ref[...])        # stride-2 pick -> (nc, PH)

    # flatten (channel-major NCHW) + Linear(512->32) without leaving the
    # (nc, PH) layout: channel-stacked weight, per-row channel-chunk mask,
    # chunk-sum and per-sample row-sum done as matmuls (host-packed matrices).
    g = dot(h2, wea_ref[...])                              # (nc, C*HID)
    f = dot(g * chselh_ref[...], sumchh_ref[...])          # (nc, HID)
    h_enc = relu(dot(collapse_ref[...], f) + bea_ref[...]) # (n, HID)

    hm = dot(h_enc, whd_ref[...]) + bhd_ref[...]           # merged [mu | logvar]
    mu = hm[:, :LAT]
    logvar = hm[:, LAT:]
    z = mu + eps_ref[...] * jnp.exp(0.5 * logvar)          # reparameterize
    zml_ref[...] = jnp.concatenate([z, hm], axis=1)        # (n, 3*LAT) = [z|mu|logvar]

    # -------------------------------- decoder -------------------------------
    d1 = relu(dot(z, wd1_ref[...]) + bd1_ref[...])         # Linear 8->32, ReLU
    d2 = relu(dot(d1, wd2_ref[...]) + bd2_ref[...])        # Linear 32->512, ReLU

    t_exp = dot(expand_ref[...], d2)                       # (nc, C*PH)
    d0 = dot(t_exp * chselp_ref[...], sumchp_ref[...])     # un-flatten -> (nc, PH)
    u = dot(d0, up_ref[...])                               # zero-insert upsample (nc, P)

    h3 = jnp.zeros((nc, P), F32)
    for t, st in enumerate(shifted_taps(u)):               # ConvT 8->8, s2 (as conv), ReLU
        h3 = h3 + dot(wt1_ref[t], st)
    h3 = relu(h3 + bt1_ref[...])

    r = jnp.zeros((n, P), F32)
    for t, st in enumerate(shifted_taps(h3)):              # ConvT 8->1, s1 (as conv)
        r = r + dot(wt2_ref[t], st)
    recon_ref[...] = sigmoid(r + bt2_ref[...])             # (n, P) lane-dense


# ---------------------------------------------------------------------------
# Host-side (one time) structural 0/1 matrices and weight repacking.
# ---------------------------------------------------------------------------
def _structural(n):
    """Static layout matrices, built once on the host (no in-kernel iota)."""
    nc = n * C
    oy, ox = np.divmod(np.arange(P), W)
    masks = np.zeros((9, P), np.float32)                    # tap validity masks
    for t, (ki, kj) in enumerate((ki, kj) for ki in range(3) for kj in range(3)):
        dy, dx = ki - 1, kj - 1
        masks[t] = ((oy + dy >= 0) & (oy + dy < H) &
                    (ox + dx >= 0) & (ox + dx < W)).astype(np.float32)
    expand = (np.arange(nc)[:, None] // C == np.arange(n)[None, :]).astype(np.float32)
    collapse = np.ascontiguousarray(expand.T)
    q = np.arange(PH)
    fine = (q // (W // 2)) * (2 * W) + (q % (W // 2)) * 2    # coarse q -> fine 2yo*W+2xo
    down = np.zeros((P, PH), np.float32)
    down[fine, q] = 1.0
    up = np.ascontiguousarray(down.T)
    chan = np.arange(nc) % C
    chselh = (np.arange(C * HID)[None, :] // HID == chan[:, None]).astype(np.float32)
    sumchh = (np.arange(C * HID)[:, None] % HID == np.arange(HID)[None, :]).astype(np.float32)
    chselp = (np.arange(C * PH)[None, :] // PH == chan[:, None]).astype(np.float32)
    sumchp = (np.arange(C * PH)[:, None] % PH == np.arange(PH)[None, :]).astype(np.float32)
    return masks, expand, collapse, down, up, chselh, sumchh, chselp, sumchp


def pack_params(params, n):
    """One-time host repack for batch size n.
    NOTE: the packed tuple is only valid for this n (block-diagonal conv mixes
    and the expand/collapse/select matrices bake the batch size in)."""
    def conv_taps(w):                # (Cout, Cin, 3, 3) -> (9, Cout, Cin)
        co, ci = w.shape[0], w.shape[1]
        return w.reshape(co, ci, 9).transpose(2, 0, 1)

    def blockdiag(t9):               # (9, Cout, Cin) -> (9, n*Cout, n*Cin) per-sample
        co, ci = t9.shape[1], t9.shape[2]
        eye = jnp.eye(n, dtype=F32)
        return jnp.einsum('ab,tij->taibj', eye, t9).reshape(9, n * co, n * ci)

    def convT_equiv(w):              # ConvT (Cin, Cout, 3, 3) -> conv (Cout, Cin, 3, 3)
        return jnp.flip(w, axis=(2, 3)).transpose(1, 0, 2, 3)

    def col(b):                      # (Cout,) -> (n*Cout, 1)
        return jnp.tile(b, (n,))[:, None]

    def row(b):
        return b[None, :]

    p = {k: v.astype(F32) for k, v in params.items()}
    masks, expand, collapse, down, up, chselh, sumchh, chselp, sumchp = (
        jnp.asarray(m) for m in _structural(n))

    w1 = jnp.tile(conv_taps(p['ec1_w'])[:, :, 0].T, (n, 1))   # (nc, 9) per-row tap scales
    wea = p['ea_w'].reshape(C, PH, HID).transpose(1, 0, 2).reshape(PH, C * HID)
    whd = jnp.concatenate([p['mu_w'], p['lv_w']], axis=1)     # merged mu|logvar head
    bhd = jnp.concatenate([p['mu_b'], p['lv_b']])[None, :]

    return (
        masks, expand, collapse, down, up,
        w1, col(p['ec1_b']),
        blockdiag(conv_taps(p['ec2_w'])), col(p['ec2_b']),
        wea, chselh, sumchh, row(p['ea_b']),
        whd, bhd,
        p['da1_w'], row(p['da1_b']),
        p['da2_w'], row(p['da2_b']),
        chselp, sumchp,
        blockdiag(conv_taps(convT_equiv(p['dt1_w']))), col(p['dt1_b']),
        blockdiag(conv_taps(convT_equiv(p['dt2_w']))), col(p['dt2_b']),
    )


def _full_spec(shape):
    return pl.BlockSpec(shape, lambda *_: (0,) * len(shape))


# ---------------------------------------------------------------------------
# VAEModel.forward: x -> (recon, z, mu, logvar)  -- one gridless pallas_call.
# ---------------------------------------------------------------------------
def vae_forward(packed, x, eps):
    n = x.shape[0]
    x_b = x.reshape(n, P).astype(F32)            # (N,1,16,16) -> lane-dense (N, 256)
    args = (x_b, eps.astype(F32)) + tuple(packed)
    out_shape = (
        jax.ShapeDtypeStruct((n, P), F32),       # recon (row = sample, lane = y*W+x)
        jax.ShapeDtypeStruct((n, 3 * LAT), F32), # [z | mu | logvar] slab
    )
    recon_b, zml = pl.pallas_call(
        functools.partial(_vae_kernel, n=n),
        out_shape=out_shape,
        in_specs=[_full_spec(a.shape) for a in args],
        out_specs=tuple(_full_spec(s.shape) for s in out_shape),
        compiler_params=pltpu.CompilerParams(vmem_limit_bytes=8 * 1024 * 1024),
        cost_estimate=pl.CostEstimate(flops=6_000_000, transcendentals=600,
                                      bytes_accessed=1_500_000),
    )(*args)
    z = zml[:, :LAT]
    mu = zml[:, LAT:2 * LAT]
    logvar = zml[:, 2 * LAT:]
    return recon_b.reshape(n, 1, H, W), z, mu, logvar


# ---------------------------------------------------------------------------
# Parameters (deterministic, PyTorch-default-like uniform fan-in init).
# ---------------------------------------------------------------------------
def init_params(key):
    ks = jax.random.split(key, 18)

    def u(k, shape, fan_in):
        bound = 1.0 / jnp.sqrt(float(fan_in))
        return jax.random.uniform(k, shape, F32, -bound, bound)

    p = {}
    # encoder convs
    p["ec1_w"] = u(ks[0], (8, 1, 3, 3), 1 * 9)
    p["ec1_b"] = u(ks[1], (8,), 1 * 9)
    p["ec2_w"] = u(ks[2], (8, 8, 3, 3), 8 * 9)
    p["ec2_b"] = u(ks[3], (8,), 8 * 9)
    # encoder affine + heads
    p["ea_w"] = u(ks[4], (512, 32), 512)
    p["ea_b"] = u(ks[5], (32,), 512)
    p["mu_w"] = u(ks[6], (32, 8), 32)
    p["mu_b"] = u(ks[7], (8,), 32)
    p["lv_w"] = u(ks[8], (32, 8), 32)
    p["lv_b"] = u(ks[9], (8,), 32)
    # decoder affines
    p["da1_w"] = u(ks[10], (8, 32), 8)
    p["da1_b"] = u(ks[11], (32,), 8)
    p["da2_w"] = u(ks[12], (32, 512), 32)
    p["da2_b"] = u(ks[13], (512,), 32)
    # decoder transposed convs (PyTorch ConvTranspose2d weight: (Cin, Cout, k, k))
    p["dt1_w"] = u(ks[14], (8, 8, 3, 3), 8 * 9)
    p["dt1_b"] = u(ks[15], (8,), 8 * 9)
    p["dt2_w"] = u(ks[16], (8, 1, 3, 3), 8 * 9)
    p["dt2_b"] = u(ks[17], (1,), 8 * 9)
    return p


if __name__ == "__main__":
    key = jax.random.PRNGKey(0)
    k_param, k_x, k_eps = jax.random.split(key, 3)

    params = init_params(k_param)
    x = jax.random.uniform(k_x, (2, 1, 16, 16), F32)      # NCHW contact map
    eps = jax.random.normal(k_eps, (2, LAT), F32)         # reparameterization noise

    packed = pack_params(params, x.shape[0])              # one-time host repack
    fwd = jax.jit(vae_forward)
    recon, z, mu, logvar = fwd(packed, x, eps)
    jax.block_until_ready((recon, z, mu, logvar))

    assert recon.shape == (2, 1, H, W)
    assert z.shape == (2, LAT) and mu.shape == (2, LAT) and logvar.shape == (2, LAT)
    assert bool(jnp.all(jnp.isfinite(recon)))
    assert bool(jnp.all(recon >= 0.0) and jnp.all(recon <= 1.0))
    print("KERNEL_OK")
</pallas_src>

<mosaic_0001>
module attributes {stable_mosaic.version = 11 : i64} {
  func.func @_vae_kernel(%arg0: memref<2x256xf32, #tpu.memory_space<vmem>>, %arg1: memref<2x8xf32, #tpu.memory_space<vmem>>, %arg2: memref<9x256xf32, #tpu.memory_space<vmem>>, %arg3: memref<16x2xf32, #tpu.memory_space<vmem>>, %arg4: memref<2x16xf32, #tpu.memory_space<vmem>>, %arg5: memref<256x64xf32, #tpu.memory_space<vmem>>, %arg6: memref<64x256xf32, #tpu.memory_space<vmem>>, %arg7: memref<16x9xf32, #tpu.memory_space<vmem>>, %arg8: memref<16x1xf32, #tpu.memory_space<vmem>>, %arg9: memref<9x16x16xf32, #tpu.memory_space<vmem>>, %arg10: memref<16x1xf32, #tpu.memory_space<vmem>>, %arg11: memref<64x256xf32, #tpu.memory_space<vmem>>, %arg12: memref<16x256xf32, #tpu.memory_space<vmem>>, %arg13: memref<256x32xf32, #tpu.memory_space<vmem>>, %arg14: memref<1x32xf32, #tpu.memory_space<vmem>>, %arg15: memref<32x16xf32, #tpu.memory_space<vmem>>, %arg16: memref<1x16xf32, #tpu.memory_space<vmem>>, %arg17: memref<8x32xf32, #tpu.memory_space<vmem>>, %arg18: memref<1x32xf32, #tpu.memory_space<vmem>>, %arg19: memref<32x512xf32, #tpu.memory_space<vmem>>, %arg20: memref<1x512xf32, #tpu.memory_space<vmem>>, %arg21: memref<16x512xf32, #tpu.memory_space<vmem>>, %arg22: memref<512x64xf32, #tpu.memory_space<vmem>>, %arg23: memref<9x16x16xf32, #tpu.memory_space<vmem>>, %arg24: memref<16x1xf32, #tpu.memory_space<vmem>>, %arg25: memref<9x2x16xf32, #tpu.memory_space<vmem>>, %arg26: memref<2x1xf32, #tpu.memory_space<vmem>>, %arg27: memref<2x256xf32, #tpu.memory_space<vmem>>, %arg28: memref<2x24xf32, #tpu.memory_space<vmem>>) attributes {dimension_semantics = [], scalar_prefetch = 0 : i64, scratch_operands = 0 : i64, tpu.core_type = #tpu.core_type<tc>} {
    %c0 = arith.constant 0 : index
    %c0_0 = arith.constant 0 : index
    %0 = vector.load %arg2[%c0, %c0_0] : memref<9x256xf32, #tpu.memory_space<vmem>>, vector<9x256xf32>
    %1 = vector.extract_strided_slice %0 {offsets = [0, 0], sizes = [1, 256], strides = [1, 1]} : vector<9x256xf32> to vector<1x256xf32>
    %2 = vector.extract_strided_slice %0 {offsets = [1, 0], sizes = [1, 256], strides = [1, 1]} : vector<9x256xf32> to vector<1x256xf32>
    %3 = vector.extract_strided_slice %0 {offsets = [2, 0], sizes = [1, 256], strides = [1, 1]} : vector<9x256xf32> to vector<1x256xf32>
    %4 = vector.extract_strided_slice %0 {offsets = [3, 0], sizes = [1, 256], strides = [1, 1]} : vector<9x256xf32> to vector<1x256xf32>
    %5 = vector.extract_strided_slice %0 {offsets = [4, 0], sizes = [1, 256], strides = [1, 1]} : vector<9x256xf32> to vector<1x256xf32>
    %6 = vector.extract_strided_slice %0 {offsets = [5, 0], sizes = [1, 256], strides = [1, 1]} : vector<9x256xf32> to vector<1x256xf32>
    %7 = vector.extract_strided_slice %0 {offsets = [6, 0], sizes = [1, 256], strides = [1, 1]} : vector<9x256xf32> to vector<1x256xf32>
    %8 = vector.extract_strided_slice %0 {offsets = [7, 0], sizes = [1, 256], strides = [1, 1]} : vector<9x256xf32> to vector<1x256xf32>
    %9 = vector.extract_strided_slice %0 {offsets = [8, 0], sizes = [1, 256], strides = [1, 1]} : vector<9x256xf32> to vector<1x256xf32>
    %c0_1 = arith.constant 0 : index
    %c0_2 = arith.constant 0 : index
    %10 = vector.load %arg3[%c0_1, %c0_2] : memref<16x2xf32, #tpu.memory_space<vmem>>, vector<16x2xf32>
    %c0_3 = arith.constant 0 : index
    %c0_4 = arith.constant 0 : index
    %11 = vector.load %arg0[%c0_3, %c0_4] : memref<2x256xf32, #tpu.memory_space<vmem>>, vector<2x256xf32>
    %cst = arith.constant dense<0.000000e+00> : vector<16x256xf32>
    %12 = tpu.matmul %10, %11, %cst {dimension_numbers = #tpu.dot_dimension_numbers<[1], [0], [0], [1], [0, 0, 1, 1], [], []>} : vector<16x2xf32>, vector<2x256xf32>, vector<16x256xf32> -> vector<16x256xf32>
    %c0_5 = arith.constant 0 : index
    %c0_6 = arith.constant 0 : index
    %13 = vector.load %arg7[%c0_5, %c0_6] : memref<16x9xf32, #tpu.memory_space<vmem>>, vector<16x9xf32>
    %cst_7 = arith.constant 0.000000e+00 : f32
    %14 = vector.broadcast %cst_7 : f32 to vector<16x256xf32>
    %c17_i32 = arith.constant 17 : i32
    %15 = tpu.dynamic_rotate %12 by %c17_i32 dim 1 : vector<16x256xf32>, i32 -> vector<16x256xf32>
    %16 = vector.broadcast %1 : vector<1x256xf32> to vector<16x256xf32>
    %17 = arith.mulf %15, %16 : vector<16x256xf32>
    %c16_i32 = arith.constant 16 : i32
    %18 = tpu.dynamic_rotate %12 by %c16_i32 dim 1 : vector<16x256xf32>, i32 -> vector<16x256xf32>
    %19 = vector.broadcast %2 : vector<1x256xf32> to vector<16x256xf32>
    %20 = arith.mulf %18, %19 : vector<16x256xf32>
    %c15_i32 = arith.constant 15 : i32
    %21 = tpu.dynamic_rotate %12 by %c15_i32 dim 1 : vector<16x256xf32>, i32 -> vector<16x256xf32>
    %22 = vector.broadcast %3 : vector<1x256xf32> to vector<16x256xf32>
    %23 = arith.mulf %21, %22 : vector<16x256xf32>
    %c1_i32 = arith.constant 1 : i32
    %24 = tpu.dynamic_rotate %12 by %c1_i32 dim 1 : vector<16x256xf32>, i32 -> vector<16x256xf32>
    %25 = vector.broadcast %4 : vector<1x256xf32> to vector<16x256xf32>
    %26 = arith.mulf %24, %25 : vector<16x256xf32>
    %27 = vector.broadcast %5 : vector<1x256xf32> to vector<16x256xf32>
    %28 = arith.mulf %12, %27 : vector<16x256xf32>
    %c255_i32 = arith.constant 255 : i32
    %29 = tpu.dynamic_rotate %12 by %c255_i32 dim 1 : vector<16x256xf32>, i32 -> vector<16x256xf32>
    %30 = vector.broadcast %6 : vector<1x256xf32> to vector<16x256xf32>
    %31 = arith.mulf %29, %30 : vector<16x256xf32>
    %c241_i32 = arith.constant 241 : i32
    %32 = tpu.dynamic_rotate %12 by %c241_i32 dim 1 : vector<16x256xf32>, i32 -> vector<16x256xf32>
    %33 = vector.broadcast %7 : vector<1x256xf32> to vector<16x256xf32>
    %34 = arith.mulf %32, %33 : vector<16x256xf32>
    %c240_i32 = arith.constant 240 : i32
    %35 = tpu.dynamic_rotate %12 by %c240_i32 dim 1 : vector<16x256xf32>, i32 -> vector<16x256xf32>
    %36 = vector.broadcast %8 : vector<1x256xf32> to vector<16x256xf32>
    %37 = arith.mulf %35, %36 : vector<16x256xf32>
    %c239_i32 = arith.constant 239 : i32
    %38 = tpu.dynamic_rotate %12 by %c239_i32 dim 1 : vector<16x256xf32>, i32 -> vector<16x256xf32>
    %39 = vector.broadcast %9 : vector<1x256xf32> to vector<16x256xf32>
    %40 = arith.mulf %38, %39 : vector<16x256xf32>
    %41 = vector.extract_strided_slice %13 {offsets = [0, 0], sizes = [16, 1], strides = [1, 1]} : vector<16x9xf32> to vector<16x1xf32>
    %42 = vector.broadcast %41 : vector<16x1xf32> to vector<16x256xf32>
    %43 = arith.mulf %42, %17 : vector<16x256xf32>
    %44 = arith.addf %14, %43 : vector<16x256xf32>
    %45 = vector.extract_strided_slice %13 {offsets = [0, 1], sizes = [16, 1], strides = [1, 1]} : vector<16x9xf32> to vector<16x1xf32>
    %46 = vector.broadcast %45 : vector<16x1xf32> to vector<16x256xf32>
    %47 = arith.mulf %46, %20 : vector<16x256xf32>
    %48 = arith.addf %44, %47 : vector<16x256xf32>
    %49 = vector.extract_strided_slice %13 {offsets = [0, 2], sizes = [16, 1], strides = [1, 1]} : vector<16x9xf32> to vector<16x1xf32>
    %50 = vector.broadcast %49 : vector<16x1xf32> to vector<16x256xf32>
    %51 = arith.mulf %50, %23 : vector<16x256xf32>
    %52 = arith.addf %48, %51 : vector<16x256xf32>
    %53 = vector.extract_strided_slice %13 {offsets = [0, 3], sizes = [16, 1], strides = [1, 1]} : vector<16x9xf32> to vector<16x1xf32>
    %54 = vector.broadcast %53 : vector<16x1xf32> to vector<16x256xf32>
    %55 = arith.mulf %54, %26 : vector<16x256xf32>
    %56 = arith.addf %52, %55 : vector<16x256xf32>
    %57 = vector.extract_strided_slice %13 {offsets = [0, 4], sizes = [16, 1], strides = [1, 1]} : vector<16x9xf32> to vector<16x1xf32>
    %58 = vector.broadcast %57 : vector<16x1xf32> to vector<16x256xf32>
    %59 = arith.mulf %58, %28 : vector<16x256xf32>
    %60 = arith.addf %56, %59 : vector<16x256xf32>
    %61 = vector.extract_strided_slice %13 {offsets = [0, 5], sizes = [16, 1], strides = [1, 1]} : vector<16x9xf32> to vector<16x1xf32>
    %62 = vector.broadcast %61 : vector<16x1xf32> to vector<16x256xf32>
    %63 = arith.mulf %62, %31 : vector<16x256xf32>
    %64 = arith.addf %60, %63 : vector<16x256xf32>
    %65 = vector.extract_strided_slice %13 {offsets = [0, 6], sizes = [16, 1], strides = [1, 1]} : vector<16x9xf32> to vector<16x1xf32>
    %66 = vector.broadcast %65 : vector<16x1xf32> to vector<16x256xf32>
    %67 = arith.mulf %66, %34 : vector<16x256xf32>
    %68 = arith.addf %64, %67 : vector<16x256xf32>
    %69 = vector.extract_strided_slice %13 {offsets = [0, 7], sizes = [16, 1], strides = [1, 1]} : vector<16x9xf32> to vector<16x1xf32>
    %70 = vector.broadcast %69 : vector<16x1xf32> to vector<16x256xf32>
    %71 = arith.mulf %70, %37 : vector<16x256xf32>
    %72 = arith.addf %68, %71 : vector<16x256xf32>
    %73 = vector.extract_strided_slice %13 {offsets = [0, 8], sizes = [16, 1], strides = [1, 1]} : vector<16x9xf32> to vector<16x1xf32>
    %74 = vector.broadcast %73 : vector<16x1xf32> to vector<16x256xf32>
    %75 = arith.mulf %74, %40 : vector<16x256xf32>
    %76 = arith.addf %72, %75 : vector<16x256xf32>
    %c0_8 = arith.constant 0 : index
    %c0_9 = arith.constant 0 : index
    %77 = vector.load %arg8[%c0_8, %c0_9] : memref<16x1xf32, #tpu.memory_space<vmem>>, vector<16x1xf32>
    %78 = vector.broadcast %77 : vector<16x1xf32> to vector<16x256xf32>
    %79 = arith.addf %76, %78 : vector<16x256xf32>
    %cst_10 = arith.constant 0.000000e+00 : f32
    %80 = vector.broadcast %cst_10 : f32 to vector<16x256xf32>
    %81 = arith.maximumf %79, %80 : vector<16x256xf32>
    %cst_11 = arith.constant 0.000000e+00 : f32
    %82 = vector.broadcast %cst_11 : f32 to vector<16x256xf32>
    %c17_i32_12 = arith.constant 17 : i32
    %83 = tpu.dynamic_rotate %81 by %c17_i32_12 dim 1 : vector<16x256xf32>, i32 -> vector<16x256xf32>
    %84 = vector.broadcast %1 : vector<1x256xf32> to vector<16x256xf32>
    %85 = arith.mulf %83, %84 : vector<16x256xf32>
    %c16_i32_13 = arith.constant 16 : i32
    %86 = tpu.dynamic_rotate %81 by %c16_i32_13 dim 1 : vector<16x256xf32>, i32 -> vector<16x256xf32>
    %87 = vector.broadcast %2 : vector<1x256xf32> to vector<16x256xf32>
    %88 = arith.mulf %86, %87 : vector<16x256xf32>
    %c15_i32_14 = arith.constant 15 : i32
    %89 = tpu.dynamic_rotate %81 by %c15_i32_14 dim 1 : vector<16x256xf32>, i32 -> vector<16x256xf32>
    %90 = vector.broadcast %3 : vector<1x256xf32> to vector<16x256xf32>
    %91 = arith.mulf %89, %90 : vector<16x256xf32>
    %c1_i32_15 = arith.constant 1 : i32
    %92 = tpu.dynamic_rotate %81 by %c1_i32_15 dim 1 : vector<16x256xf32>, i32 -> vector<16x256xf32>
    %93 = vector.broadcast %4 : vector<1x256xf32> to vector<16x256xf32>
    %94 = arith.mulf %92, %93 : vector<16x256xf32>
    %95 = vector.broadcast %5 : vector<1x256xf32> to vector<16x256xf32>
    %96 = arith.mulf %81, %95 : vector<16x256xf32>
    %c255_i32_16 = arith.constant 255 : i32
    %97 = tpu.dynamic_rotate %81 by %c255_i32_16 dim 1 : vector<16x256xf32>, i32 -> vector<16x256xf32>
    %98 = vector.broadcast %6 : vector<1x256xf32> to vector<16x256xf32>
    %99 = arith.mulf %97, %98 : vector<16x256xf32>
    %c241_i32_17 = arith.constant 241 : i32
    %100 = tpu.dynamic_rotate %81 by %c241_i32_17 dim 1 : vector<16x256xf32>, i32 -> vector<16x256xf32>
    %101 = vector.broadcast %7 : vector<1x256xf32> to vector<16x256xf32>
    %102 = arith.mulf %100, %101 : vector<16x256xf32>
    %c240_i32_18 = arith.constant 240 : i32
    %103 = tpu.dynamic_rotate %81 by %c240_i32_18 dim 1 : vector<16x256xf32>, i32 -> vector<16x256xf32>
    %104 = vector.broadcast %8 : vector<1x256xf32> to vector<16x256xf32>
    %105 = arith.mulf %103, %104 : vector<16x256xf32>
    %c239_i32_19 = arith.constant 239 : i32
    %106 = tpu.dynamic_rotate %81 by %c239_i32_19 dim 1 : vector<16x256xf32>, i32 -> vector<16x256xf32>
    %107 = vector.broadcast %9 : vector<1x256xf32> to vector<16x256xf32>
    %108 = arith.mulf %106, %107 : vector<16x256xf32>
    %c0_20 = arith.constant 0 : index
    %c0_21 = arith.constant 0 : index
    %c0_22 = arith.constant 0 : index
    %109 = vector.load %arg9[%c0_20, %c0_21, %c0_22] : memref<9x16x16xf32, #tpu.memory_space<vmem>>, vector<1x16x16xf32>
    %110 = vector.shape_cast %109 : vector<1x16x16xf32> to vector<16x16xf32>
    %cst_23 = arith.constant dense<0.000000e+00> : vector<16x256xf32>
    %111 = tpu.matmul %110, %85, %cst_23 {dimension_numbers = #tpu.dot_dimension_numbers<[1], [0], [0], [1], [0, 0, 1, 1], [], []>} : vector<16x16xf32>, vector<16x256xf32>, vector<16x256xf32> -> vector<16x256xf32>
    %112 = arith.addf %82, %111 : vector<16x256xf32>
    %c1 = arith.constant 1 : index
    %c0_24 = arith.constant 0 : index
    %c0_25 = arith.constant 0 : index
    %113 = vector.load %arg9[%c1, %c0_24, %c0_25] : memref<9x16x16xf32, #tpu.memory_space<vmem>>, vector<1x16x16xf32>
    %114 = vector.shape_cast %113 : vector<1x16x16xf32> to vector<16x16xf32>
    %cst_26 = arith.constant dense<0.000000e+00> : vector<16x256xf32>
    %115 = tpu.matmul %114, %88, %cst_26 {dimension_numbers = #tpu.dot_dimension_numbers<[1], [0], [0], [1], [0, 0, 1, 1], [], []>} : vector<16x16xf32>, vector<16x256xf32>, vector<16x256xf32> -> vector<16x256xf32>
    %116 = arith.addf %112, %115 : vector<16x256xf32>
    %c2 = arith.constant 2 : index
    %c0_27 = arith.constant 0 : index
    %c0_28 = arith.constant 0 : index
    %117 = vector.load %arg9[%c2, %c0_27, %c0_28] : memref<9x16x16xf32, #tpu.memory_space<vmem>>, vector<1x16x16xf32>
    %118 = vector.shape_cast %117 : vector<1x16x16xf32> to vector<16x16xf32>
    %cst_29 = arith.constant dense<0.000000e+00> : vector<16x256xf32>
    %119 = tpu.matmul %118, %91, %cst_29 {dimension_numbers = #tpu.dot_dimension_numbers<[1], [0], [0], [1], [0, 0, 1, 1], [], []>} : vector<16x16xf32>, vector<16x256xf32>, vector<16x256xf32> -> vector<16x256xf32>
    %120 = arith.addf %116, %119 : vector<16x256xf32>
    %c3 = arith.constant 3 : index
    %c0_30 = arith.constant 0 : index
    %c0_31 = arith.constant 0 : index
    %121 = vector.load %arg9[%c3, %c0_30, %c0_31] : memref<9x16x16xf32, #tpu.memory_space<vmem>>, vector<1x16x16xf32>
    %122 = vector.shape_cast %121 : vector<1x16x16xf32> to vector<16x16xf32>
    %cst_32 = arith.constant dense<0.000000e+00> : vector<16x256xf32>
    %123 = tpu.matmul %122, %94, %cst_32 {dimension_numbers = #tpu.dot_dimension_numbers<[1], [0], [0], [1], [0, 0, 1, 1], [], []>} : vector<16x16xf32>, vector<16x256xf32>, vector<16x256xf32> -> vector<16x256xf32>
    %124 = arith.addf %120, %123 : vector<16x256xf32>
    %c4 = arith.constant 4 : index
    %c0_33 = arith.constant 0 : index
    %c0_34 = arith.constant 0 : index
    %125 = vector.load %arg9[%c4, %c0_33, %c0_34] : memref<9x16x16xf32, #tpu.memory_space<vmem>>, vector<1x16x16xf32>
    %126 = vector.shape_cast %125 : vector<1x16x16xf32> to vector<16x16xf32>
    %cst_35 = arith.constant dense<0.000000e+00> : vector<16x256xf32>
    %127 = tpu.matmul %126, %96, %cst_35 {dimension_numbers = #tpu.dot_dimension_numbers<[1], [0], [0], [1], [0, 0, 1, 1], [], []>} : vector<16x16xf32>, vector<16x256xf32>, vector<16x256xf32> -> vector<16x256xf32>
    %128 = arith.addf %124, %127 : vector<16x256xf32>
    %c5 = arith.constant 5 : index
    %c0_36 = arith.constant 0 : index
    %c0_37 = arith.constant 0 : index
    %129 = vector.load %arg9[%c5, %c0_36, %c0_37] : memref<9x16x16xf32, #tpu.memory_space<vmem>>, vector<1x16x16xf32>
    %130 = vector.shape_cast %129 : vector<1x16x16xf32> to vector<16x16xf32>
    %cst_38 = arith.constant dense<0.000000e+00> : vector<16x256xf32>
    %131 = tpu.matmul %130, %99, %cst_38 {dimension_numbers = #tpu.dot_dimension_numbers<[1], [0], [0], [1], [0, 0, 1, 1], [], []>} : vector<16x16xf32>, vector<16x256xf32>, vector<16x256xf32> -> vector<16x256xf32>
    %132 = arith.addf %128, %131 : vector<16x256xf32>
    %c6 = arith.constant 6 : index
    %c0_39 = arith.constant 0 : index
    %c0_40 = arith.constant 0 : index
    %133 = vector.load %arg9[%c6, %c0_39, %c0_40] : memref<9x16x16xf32, #tpu.memory_space<vmem>>, vector<1x16x16xf32>
    %134 = vector.shape_cast %133 : vector<1x16x16xf32> to vector<16x16xf32>
    %cst_41 = arith.constant dense<0.000000e+00> : vector<16x256xf32>
    %135 = tpu.matmul %134, %102, %cst_41 {dimension_numbers = #tpu.dot_dimension_numbers<[1], [0], [0], [1], [0, 0, 1, 1], [], []>} : vector<16x16xf32>, vector<16x256xf32>, vector<16x256xf32> -> vector<16x256xf32>
    %136 = arith.addf %132, %135 : vector<16x256xf32>
    %c7 = arith.constant 7 : index
    %c0_42 = arith.constant 0 : index
    %c0_43 = arith.constant 0 : index
    %137 = vector.load %arg9[%c7, %c0_42, %c0_43] : memref<9x16x16xf32, #tpu.memory_space<vmem>>, vector<1x16x16xf32>
    %138 = vector.shape_cast %137 : vector<1x16x16xf32> to vector<16x16xf32>
    %cst_44 = arith.constant dense<0.000000e+00> : vector<16x256xf32>
    %139 = tpu.matmul %138, %105, %cst_44 {dimension_numbers = #tpu.dot_dimension_numbers<[1], [0], [0], [1], [0, 0, 1, 1], [], []>} : vector<16x16xf32>, vector<16x256xf32>, vector<16x256xf32> -> vector<16x256xf32>
    %140 = arith.addf %136, %139 : vector<16x256xf32>
    %c8 = arith.constant 8 : index
    %c0_45 = arith.constant 0 : index
    %c0_46 = arith.constant 0 : index
    %141 = vector.load %arg9[%c8, %c0_45, %c0_46] : memref<9x16x16xf32, #tpu.memory_space<vmem>>, vector<1x16x16xf32>
    %142 = vector.shape_cast %141 : vector<1x16x16xf32> to vector<16x16xf32>
    %cst_47 = arith.constant dense<0.000000e+00> : vector<16x256xf32>
    %143 = tpu.matmul %142, %108, %cst_47 {dimension_numbers = #tpu.dot_dimension_numbers<[1], [0], [0], [1], [0, 0, 1, 1], [], []>} : vector<16x16xf32>, vector<16x256xf32>, vector<16x256xf32> -> vector<16x256xf32>
    %144 = arith.addf %140, %143 : vector<16x256xf32>
    %c0_48 = arith.constant 0 : index
    %c0_49 = arith.constant 0 : index
    %145 = vector.load %arg5[%c0_48, %c0_49] : memref<256x64xf32, #tpu.memory_space<vmem>>, vector<256x64xf32>
    %cst_50 = arith.constant dense<0.000000e+00> : vector<16x64xf32>
    %146 = tpu.matmul %144, %145, %cst_50 {dimension_numbers = #tpu.dot_dimension_numbers<[1], [0], [0], [1], [0, 0, 1, 1], [], []>} : vector<16x256xf32>, vector<256x64xf32>, vector<16x64xf32> -> vector<16x64xf32>
    %c0_51 = arith.constant 0 : index
    %c0_52 = arith.constant 0 : index
    %147 = vector.load %arg10[%c0_51, %c0_52] : memref<16x1xf32, #tpu.memory_space<vmem>>, vector<16x1xf32>
    %148 = vector.broadcast %147 : vector<16x1xf32> to vector<16x64xf32>
    %149 = arith.addf %146, %148 : vector<16x64xf32>
    %cst_53 = arith.constant 0.000000e+00 : f32
    %150 = vector.broadcast %cst_53 : f32 to vector<16x64xf32>
    %151 = arith.maximumf %149, %150 : vector<16x64xf32>
    %c0_54 = arith.constant 0 : index
    %c0_55 = arith.constant 0 : index
    %152 = vector.load %arg11[%c0_54, %c0_55] : memref<64x256xf32, #tpu.memory_space<vmem>>, vector<64x256xf32>
    %cst_56 = arith.constant dense<0.000000e+00> : vector<16x256xf32>
    %153 = tpu.matmul %151, %152, %cst_56 {dimension_numbers = #tpu.dot_dimension_numbers<[1], [0], [0], [1], [0, 0, 1, 1], [], []>} : vector<16x64xf32>, vector<64x256xf32>, vector<16x256xf32> -> vector<16x256xf32>
    %c0_57 = arith.constant 0 : index
    %c0_58 = arith.constant 0 : index
    %154 = vector.load %arg12[%c0_57, %c0_58] : memref<16x256xf32, #tpu.memory_space<vmem>>, vector<16x256xf32>
    %155 = arith.mulf %153, %154 : vector<16x256xf32>
    %c0_59 = arith.constant 0 : index
    %c0_60 = arith.constant 0 : index
    %156 = vector.load %arg13[%c0_59, %c0_60] : memref<256x32xf32, #tpu.memory_space<vmem>>, vector<256x32xf32>
    %cst_61 = arith.constant dense<0.000000e+00> : vector<16x32xf32>
    %157 = tpu.matmul %155, %156, %cst_61 {dimension_numbers = #tpu.dot_dimension_numbers<[1], [0], [0], [1], [0, 0, 1, 1], [], []>} : vector<16x256xf32>, vector<256x32xf32>, vector<16x32xf32> -> vector<16x32xf32>
    %c0_62 = arith.constant 0 : index
    %c0_63 = arith.constant 0 : index
    %158 = vector.load %arg4[%c0_62, %c0_63] : memref<2x16xf32, #tpu.memory_space<vmem>>, vector<2x16xf32>
    %cst_64 = arith.constant dense<0.000000e+00> : vector<2x32xf32>
    %159 = tpu.matmul %158, %157, %cst_64 {dimension_numbers = #tpu.dot_dimension_numbers<[1], [0], [0], [1], [0, 0, 1, 1], [], []>} : vector<2x16xf32>, vector<16x32xf32>, vector<2x32xf32> -> vector<2x32xf32>
    %c0_65 = arith.constant 0 : index
    %c0_66 = arith.constant 0 : index
    %160 = vector.load %arg14[%c0_65, %c0_66] : memref<1x32xf32, #tpu.memory_space<vmem>>, vector<1x32xf32>
    %161 = vector.broadcast %160 : vector<1x32xf32> to vector<2x32xf32>
    %162 = arith.addf %159, %161 : vector<2x32xf32>
    %cst_67 = arith.constant 0.000000e+00 : f32
    %163 = vector.broadcast %cst_67 : f32 to vector<2x32xf32>
    %164 = arith.maximumf %162, %163 : vector<2x32xf32>
    %c0_68 = arith.constant 0 : index
    %c0_69 = arith.constant 0 : index
    %165 = vector.load %arg15[%c0_68, %c0_69] : memref<32x16xf32, #tpu.memory_space<vmem>>, vector<32x16xf32>
    %cst_70 = arith.constant dense<0.000000e+00> : vector<2x16xf32>
    %166 = tpu.matmul %164, %165, %cst_70 {dimension_numbers = #tpu.dot_dimension_numbers<[1], [0], [0], [1], [0, 0, 1, 1], [], []>} : vector<2x32xf32>, vector<32x16xf32>, vector<2x16xf32> -> vector<2x16xf32>
    %c0_71 = arith.constant 0 : index
    %c0_72 = arith.constant 0 : index
    %167 = vector.load %arg16[%c0_71, %c0_72] : memref<1x16xf32, #tpu.memory_space<vmem>>, vector<1x16xf32>
    %168 = vector.broadcast %167 : vector<1x16xf32> to vector<2x16xf32>
    %169 = arith.addf %166, %168 : vector<2x16xf32>
    %170 = vector.extract_strided_slice %169 {offsets = [0, 0], sizes = [2, 8], strides = [1, 1]} : vector<2x16xf32> to vector<2x8xf32>
    %171 = vector.extract_strided_slice %169 {offsets = [0, 8], sizes = [2, 8], strides = [1, 1]} : vector<2x16xf32> to vector<2x8xf32>
    %c0_73 = arith.constant 0 : index
    %c0_74 = arith.constant 0 : index
    %172 = vector.load %arg1[%c0_73, %c0_74] : memref<2x8xf32, #tpu.memory_space<vmem>>, vector<2x8xf32>
    %cst_75 = arith.constant 5.000000e-01 : f32
    %173 = vector.broadcast %cst_75 : f32 to vector<2x8xf32>
    %174 = arith.mulf %173, %171 : vector<2x8xf32>
    %175 = math.exp %174 : vector<2x8xf32>
    %176 = arith.mulf %172, %175 : vector<2x8xf32>
    %177 = arith.addf %170, %176 : vector<2x8xf32>
    %178 = tpu.concatenate %177, %169 in 1 : vector<2x8xf32>, vector<2x16xf32> -> vector<2x24xf32>
    %c0_76 = arith.constant 0 : index
    %c0_77 = arith.constant 0 : index
    %179 = vector.load %arg28[%c0_76, %c0_77] : memref<2x24xf32, #tpu.memory_space<vmem>>, vector<2x24xf32>
    tpu.vector_store %arg28[%c0_76, %c0_77], %178 {strides = array<i32>} : memref<2x24xf32, #tpu.memory_space<vmem>>, vector<2x24xf32>,
    %c0_78 = arith.constant 0 : index
    %c0_79 = arith.constant 0 : index
    %180 = vector.load %arg17[%c0_78, %c0_79] : memref<8x32xf32, #tpu.memory_space<vmem>>, vector<8x32xf32>
    %cst_80 = arith.constant dense<0.000000e+00> : vector<2x32xf32>
    %181 = tpu.matmul %177, %180, %cst_80 {dimension_numbers = #tpu.dot_dimension_numbers<[1], [0], [0], [1], [0, 0, 1, 1], [], []>} : vector<2x8xf32>, vector<8x32xf32>, vector<2x32xf32> -> vector<2x32xf32>
    %c0_81 = arith.constant 0 : index
    %c0_82 = arith.constant 0 : index
    %182 = vector.load %arg18[%c0_81, %c0_82] : memref<1x32xf32, #tpu.memory_space<vmem>>, vector<1x32xf32>
    %183 = vector.broadcast %182 : vector<1x32xf32> to vector<2x32xf32>
    %184 = arith.addf %181, %183 : vector<2x32xf32>
    %cst_83 = arith.constant 0.000000e+00 : f32
    %185 = vector.broadcast %cst_83 : f32 to vector<2x32xf32>
    %186 = arith.maximumf %184, %185 : vector<2x32xf32>
    %c0_84 = arith.constant 0 : index
    %c0_85 = arith.constant 0 : index
    %187 = vector.load %arg19[%c0_84, %c0_85] : memref<32x512xf32, #tpu.memory_space<vmem>>, vector<32x512xf32>
    %cst_86 = arith.constant dense<0.000000e+00> : vector<2x512xf32>
    %188 = tpu.matmul %186, %187, %cst_86 {dimension_numbers = #tpu.dot_dimension_numbers<[1], [0], [0], [1], [0, 0, 1, 1], [], []>} : vector<2x32xf32>, vector<32x512xf32>, vector<2x512xf32> -> vector<2x512xf32>
    %c0_87 = arith.constant 0 : index
    %c0_88 = arith.constant 0 : index
    %189 = vector.load %arg20[%c0_87, %c0_88] : memref<1x512xf32, #tpu.memory_space<vmem>>, vector<1x512xf32>
    %190 = vector.broadcast %189 : vector<1x512xf32> to vector<2x512xf32>
    %191 = arith.addf %188, %190 : vector<2x512xf32>
    %cst_89 = arith.constant 0.000000e+00 : f32
    %192 = vector.broadcast %cst_89 : f32 to vector<2x512xf32>
    %193 = arith.maximumf %191, %192 : vector<2x512xf32>
    %c0_90 = arith.constant 0 : index
    %c0_91 = arith.constant 0 : index
    %194 = vector.load %arg3[%c0_90, %c0_91] : memref<16x2xf32, #tpu.memory_space<vmem>>, vector<16x2xf32>
    %cst_92 = arith.constant dense<0.000000e+00> : vector<16x512xf32>
    %195 = tpu.matmul %194, %193, %cst_92 {dimension_numbers = #tpu.dot_dimension_numbers<[1], [0], [0], [1], [0, 0, 1, 1], [], []>} : vector<16x2xf32>, vector<2x512xf32>, vector<16x512xf32> -> vector<16x512xf32>
    %c0_93 = arith.constant 0 : index
    %c0_94 = arith.constant 0 : index
    %196 = vector.load %arg21[%c0_93, %c0_94] : memref<16x512xf32, #tpu.memory_space<vmem>>, vector<16x512xf32>
    %197 = arith.mulf %195, %196 : vector<16x512xf32>
    %c0_95 = arith.constant 0 : index
    %c0_96 = arith.constant 0 : index
    %198 = vector.load %arg22[%c0_95, %c0_96] : memref<512x64xf32, #tpu.memory_space<vmem>>, vector<512x64xf32>
    %cst_97 = arith.constant dense<0.000000e+00> : vector<16x64xf32>
    %199 = tpu.matmul %197, %198, %cst_97 {dimension_numbers = #tpu.dot_dimension_numbers<[1], [0], [0], [1], [0, 0, 1, 1], [], []>} : vector<16x512xf32>, vector<512x64xf32>, vector<16x64xf32> -> vector<16x64xf32>
    %c0_98 = arith.constant 0 : index
    %c0_99 = arith.constant 0 : index
    %200 = vector.load %arg6[%c0_98, %c0_99] : memref<64x256xf32, #tpu.memory_space<vmem>>, vector<64x256xf32>
    %cst_100 = arith.constant dense<0.000000e+00> : vector<16x256xf32>
    %201 = tpu.matmul %199, %200, %cst_100 {dimension_numbers = #tpu.dot_dimension_numbers<[1], [0], [0], [1], [0, 0, 1, 1], [], []>} : vector<16x64xf32>, vector<64x256xf32>, vector<16x256xf32> -> vector<16x256xf32>
    %cst_101 = arith.constant 0.000000e+00 : f32
    %202 = vector.broadcast %cst_101 : f32 to vector<16x256xf32>
    %c17_i32_102 = arith.constant 17 : i32
    %203 = tpu.dynamic_rotate %201 by %c17_i32_102 dim 1 : vector<16x256xf32>, i32 -> vector<16x256xf32>
    %204 = vector.broadcast %1 : vector<1x256xf32> to vector<16x256xf32>
    %205 = arith.mulf %203, %204 : vector<16x256xf32>
    %c16_i32_103 = arith.constant 16 : i32
    %206 = tpu.dynamic_rotate %201 by %c16_i32_103 dim 1 : vector<16x256xf32>, i32 -> vector<16x256xf32>
    %207 = vector.broadcast %2 : vector<1x256xf32> to vector<16x256xf32>
    %208 = arith.mulf %206, %207 : vector<16x256xf32>
    %c15_i32_104 = arith.constant 15 : i32
    %209 = tpu.dynamic_rotate %201 by %c15_i32_104 dim 1 : vector<16x256xf32>, i32 -> vector<16x256xf32>
    %210 = vector.broadcast %3 : vector<1x256xf32> to vector<16x256xf32>
    %211 = arith.mulf %209, %210 : vector<16x256xf32>
    %c1_i32_105 = arith.constant 1 : i32
    %212 = tpu.dynamic_rotate %201 by %c1_i32_105 dim 1 : vector<16x256xf32>, i32 -> vector<16x256xf32>
    %213 = vector.broadcast %4 : vector<1x256xf32> to vector<16x256xf32>
    %214 = arith.mulf %212, %213 : vector<16x256xf32>
    %215 = vector.broadcast %5 : vector<1x256xf32> to vector<16x256xf32>
    %216 = arith.mulf %201, %215 : vector<16x256xf32>
    %c255_i32_106 = arith.constant 255 : i32
    %217 = tpu.dynamic_rotate %201 by %c255_i32_106 dim 1 : vector<16x256xf32>, i32 -> vector<16x256xf32>
    %218 = vector.broadcast %6 : vector<1x256xf32> to vector<16x256xf32>
    %219 = arith.mulf %217, %218 : vector<16x256xf32>
    %c241_i32_107 = arith.constant 241 : i32
    %220 = tpu.dynamic_rotate %201 by %c241_i32_107 dim 1 : vector<16x256xf32>, i32 -> vector<16x256xf32>
    %221 = vector.broadcast %7 : vector<1x256xf32> to vector<16x256xf32>
    %222 = arith.mulf %220, %221 : vector<16x256xf32>
    %c240_i32_108 = arith.constant 240 : i32
    %223 = tpu.dynamic_rotate %201 by %c240_i32_108 dim 1 : vector<16x256xf32>, i32 -> vector<16x256xf32>
    %224 = vector.broadcast %8 : vector<1x256xf32> to vector<16x256xf32>
    %225 = arith.mulf %223, %224 : vector<16x256xf32>
    %c239_i32_109 = arith.constant 239 : i32
    %226 = tpu.dynamic_rotate %201 by %c239_i32_109 dim 1 : vector<16x256xf32>, i32 -> vector<16x256xf32>
    %227 = vector.broadcast %9 : vector<1x256xf32> to vector<16x256xf32>
    %228 = arith.mulf %226, %227 : vector<16x256xf32>
    %c0_110 = arith.constant 0 : index
    %c0_111 = arith.constant 0 : index
    %c0_112 = arith.constant 0 : index
    %229 = vector.load %arg23[%c0_110, %c0_111, %c0_112] : memref<9x16x16xf32, #tpu.memory_space<vmem>>, vector<1x16x16xf32>
    %230 = vector.shape_cast %229 : vector<1x16x16xf32> to vector<16x16xf32>
    %cst_113 = arith.constant dense<0.000000e+00> : vector<16x256xf32>
    %231 = tpu.matmul %230, %205, %cst_113 {dimension_numbers = #tpu.dot_dimension_numbers<[1], [0], [0], [1], [0, 0, 1, 1], [], []>} : vector<16x16xf32>, vector<16x256xf32>, vector<16x256xf32> -> vector<16x256xf32>
    %232 = arith.addf %202, %231 : vector<16x256xf32>
    %c1_114 = arith.constant 1 : index
    %c0_115 = arith.constant 0 : index
    %c0_116 = arith.constant 0 : index
    %233 = vector.load %arg23[%c1_114, %c0_115, %c0_116] : memref<9x16x16xf32, #tpu.memory_space<vmem>>, vector<1x16x16xf32>
    %234 = vector.shape_cast %233 : vector<1x16x16xf32> to vector<16x16xf32>
    %cst_117 = arith.constant dense<0.000000e+00> : vector<16x256xf32>
    %235 = tpu.matmul %234, %208, %cst_117 {dimension_numbers = #tpu.dot_dimension_numbers<[1], [0], [0], [1], [0, 0, 1, 1], [], []>} : vector<16x16xf32>, vector<16x256xf32>, vector<16x256xf32> -> vector<16x256xf32>
    %236 = arith.addf %232, %235 : vector<16x256xf32>
    %c2_118 = arith.constant 2 : index
    %c0_119 = arith.constant 0 : index
    %c0_120 = arith.constant 0 : index
    %237 = vector.load %arg23[%c2_118, %c0_119, %c0_120] : memref<9x16x16xf32, #tpu.memory_space<vmem>>, vector<1x16x16xf32>
    %238 = vector.shape_cast %237 : vector<1x16x16xf32> to vector<16x16xf32>
    %cst_121 = arith.constant dense<0.000000e+00> : vector<16x256xf32>
    %239 = tpu.matmul %238, %211, %cst_121 {dimension_numbers = #tpu.dot_dimension_numbers<[1], [0], [0], [1], [0, 0, 1, 1], [], []>} : vector<16x16xf32>, vector<16x256xf32>, vector<16x256xf32> -> vector<16x256xf32>
    %240 = arith.addf %236, %239 : vector<16x256xf32>
    %c3_122 = arith.constant 3 : index
    %c0_123 = arith.constant 0 : index
    %c0_124 = arith.constant 0 : index
    %241 = vector.load %arg23[%c3_122, %c0_123, %c0_124] : memref<9x16x16xf32, #tpu.memory_space<vmem>>, vector<1x16x16xf32>
    %242 = vector.shape_cast %241 : vector<1x16x16xf32> to vector<16x16xf32>
    %cst_125 = arith.constant dense<0.000000e+00> : vector<16x256xf32>
    %243 = tpu.matmul %242, %214, %cst_125 {dimension_numbers = #tpu.dot_dimension_numbers<[1], [0], [0], [1], [0, 0, 1, 1], [], []>} : vector<16x16xf32>, vector<16x256xf32>, vector<16x256xf32> -> vector<16x256xf32>
    %244 = arith.addf %240, %243 : vector<16x256xf32>
    %c4_126 = arith.constant 4 : index
    %c0_127 = arith.constant 0 : index
    %c0_128 = arith.constant 0 : index
    %245 = vector.load %arg23[%c4_126, %c0_127, %c0_128] : memref<9x16x16xf32, #tpu.memory_space<vmem>>, vector<1x16x16xf32>
    %246 = vector.shape_cast %245 : vector<1x16x16xf32> to vector<16x16xf32>
    %cst_129 = arith.constant dense<0.000000e+00> : vector<16x256xf32>
    %247 = tpu.matmul %246, %216, %cst_129 {dimension_numbers = #tpu.dot_dimension_numbers<[1], [0], [0], [1], [0, 0, 1, 1], [], []>} : vector<16x16xf32>, vector<16x256xf32>, vector<16x256xf32> -> vector<16x256xf32>
    %248 = arith.addf %244, %247 : vector<16x256xf32>
    %c5_130 = arith.constant 5 : index
    %c0_131 = arith.constant 0 : index
    %c0_132 = arith.constant 0 : index
    %249 = vector.load %arg23[%c5_130, %c0_131, %c0_132] : memref<9x16x16xf32, #tpu.memory_space<vmem>>, vector<1x16x16xf32>
    %250 = vector.shape_cast %249 : vector<1x16x16xf32> to vector<16x16xf32>
    %cst_133 = arith.constant dense<0.000000e+00> : vector<16x256xf32>
    %251 = tpu.matmul %250, %219, %cst_133 {dimension_numbers = #tpu.dot_dimension_numbers<[1], [0], [0], [1], [0, 0, 1, 1], [], []>} : vector<16x16xf32>, vector<16x256xf32>, vector<16x256xf32> -> vector<16x256xf32>
    %252 = arith.addf %248, %251 : vector<16x256xf32>
    %c6_134 = arith.constant 6 : index
    %c0_135 = arith.constant 0 : index
    %c0_136 = arith.constant 0 : index
    %253 = vector.load %arg23[%c6_134, %c0_135, %c0_136] : memref<9x16x16xf32, #tpu.memory_space<vmem>>, vector<1x16x16xf32>
    %254 = vector.shape_cast %253 : vector<1x16x16xf32> to vector<16x16xf32>
    %cst_137 = arith.constant dense<0.000000e+00> : vector<16x256xf32>
    %255 = tpu.matmul %254, %222, %cst_137 {dimension_numbers = #tpu.dot_dimension_numbers<[1], [0], [0], [1], [0, 0, 1, 1], [], []>} : vector<16x16xf32>, vector<16x256xf32>, vector<16x256xf32> -> vector<16x256xf32>
    %256 = arith.addf %252, %255 : vector<16x256xf32>
    %c7_138 = arith.constant 7 : index
    %c0_139 = arith.constant 0 : index
    %c0_140 = arith.constant 0 : index
    %257 = vector.load %arg23[%c7_138, %c0_139, %c0_140] : memref<9x16x16xf32, #tpu.memory_space<vmem>>, vector<1x16x16xf32>
    %258 = vector.shape_cast %257 : vector<1x16x16xf32> to vector<16x16xf32>
    %cst_141 = arith.constant dense<0.000000e+00> : vector<16x256xf32>
    %259 = tpu.matmul %258, %225, %cst_141 {dimension_numbers = #tpu.dot_dimension_numbers<[1], [0], [0], [1], [0, 0, 1, 1], [], []>} : vector<16x16xf32>, vector<16x256xf32>, vector<16x256xf32> -> vector<16x256xf32>
    %260 = arith.addf %256, %259 : vector<16x256xf32>
    %c8_142 = arith.constant 8 : index
    %c0_143 = arith.constant 0 : index
    %c0_144 = arith.constant 0 : index
    %261 = vector.load %arg23[%c8_142, %c0_143, %c0_144] : memref<9x16x16xf32, #tpu.memory_space<vmem>>, vector<1x16x16xf32>
    %262 = vector.shape_cast %261 : vector<1x16x16xf32> to vector<16x16xf32>
    %cst_145 = arith.constant dense<0.000000e+00> : vector<16x256xf32>
    %263 = tpu.matmul %262, %228, %cst_145 {dimension_numbers = #tpu.dot_dimension_numbers<[1], [0], [0], [1], [0, 0, 1, 1], [], []>} : vector<16x16xf32>, vector<16x256xf32>, vector<16x256xf32> -> vector<16x256xf32>
    %264 = arith.addf %260, %263 : vector<16x256xf32>
    %c0_146 = arith.constant 0 : index
    %c0_147 = arith.constant 0 : index
    %265 = vector.load %arg24[%c0_146, %c0_147] : memref<16x1xf32, #tpu.memory_space<vmem>>, vector<16x1xf32>
    %266 = vector.broadcast %265 : vector<16x1xf32> to vector<16x256xf32>
    %267 = arith.addf %264, %266 : vector<16x256xf32>
    %cst_148 = arith.constant 0.000000e+00 : f32
    %268 = vector.broadcast %cst_148 : f32 to vector<16x256xf32>
    %269 = arith.maximumf %267, %268 : vector<16x256xf32>
    %cst_149 = arith.constant 0.000000e+00 : f32
    %270 = vector.broadcast %cst_149 : f32 to vector<2x256xf32>
    %c17_i32_150 = arith.constant 17 : i32
    %271 = tpu.dynamic_rotate %269 by %c17_i32_150 dim 1 : vector<16x256xf32>, i32 -> vector<16x256xf32>
    %272 = vector.broadcast %1 : vector<1x256xf32> to vector<16x256xf32>
    %273 = arith.mulf %271, %272 : vector<16x256xf32>
    %c16_i32_151 = arith.constant 16 : i32
    %274 = tpu.dynamic_rotate %269 by %c16_i32_151 dim 1 : vector<16x256xf32>, i32 -> vector<16x256xf32>
    %275 = vector.broadcast %2 : vector<1x256xf32> to vector<16x256xf32>
    %276 = arith.mulf %274, %275 : vector<16x256xf32>
    %c15_i32_152 = arith.constant 15 : i32
    %277 = tpu.dynamic_rotate %269 by %c15_i32_152 dim 1 : vector<16x256xf32>, i32 -> vector<16x256xf32>
    %278 = vector.broadcast %3 : vector<1x256xf32> to vector<16x256xf32>
    %279 = arith.mulf %277, %278 : vector<16x256xf32>
    %c1_i32_153 = arith.constant 1 : i32
    %280 = tpu.dynamic_rotate %269 by %c1_i32_153 dim 1 : vector<16x256xf32>, i32 -> vector<16x256xf32>
    %281 = vector.broadcast %4 : vector<1x256xf32> to vector<16x256xf32>
    %282 = arith.mulf %280, %281 : vector<16x256xf32>
    %283 = vector.broadcast %5 : vector<1x256xf32> to vector<16x256xf32>
    %284 = arith.mulf %269, %283 : vector<16x256xf32>
    %c255_i32_154 = arith.constant 255 : i32
    %285 = tpu.dynamic_rotate %269 by %c255_i32_154 dim 1 : vector<16x256xf32>, i32 -> vector<16x256xf32>
    %286 = vector.broadcast %6 : vector<1x256xf32> to vector<16x256xf32>
    %287 = arith.mulf %285, %286 : vector<16x256xf32>
    %c241_i32_155 = arith.constant 241 : i32
    %288 = tpu.dynamic_rotate %269 by %c241_i32_155 dim 1 : vector<16x256xf32>, i32 -> vector<16x256xf32>
    %289 = vector.broadcast %7 : vector<1x256xf32> to vector<16x256xf32>
    %290 = arith.mulf %288, %289 : vector<16x256xf32>
    %c240_i32_156 = arith.constant 240 : i32
    %291 = tpu.dynamic_rotate %269 by %c240_i32_156 dim 1 : vector<16x256xf32>, i32 -> vector<16x256xf32>
    %292 = vector.broadcast %8 : vector<1x256xf32> to vector<16x256xf32>
    %293 = arith.mulf %291, %292 : vector<16x256xf32>
    %c239_i32_157 = arith.constant 239 : i32
    %294 = tpu.dynamic_rotate %269 by %c239_i32_157 dim 1 : vector<16x256xf32>, i32 -> vector<16x256xf32>
    %295 = vector.broadcast %9 : vector<1x256xf32> to vector<16x256xf32>
    %296 = arith.mulf %294, %295 : vector<16x256xf32>
    %c0_158 = arith.constant 0 : index
    %c0_159 = arith.constant 0 : index
    %c0_160 = arith.constant 0 : index
    %297 = vector.load %arg25[%c0_158, %c0_159, %c0_160] : memref<9x2x16xf32, #tpu.memory_space<vmem>>, vector<1x2x16xf32>
    %298 = vector.shape_cast %297 : vector<1x2x16xf32> to vector<2x16xf32>
    %cst_161 = arith.constant dense<0.000000e+00> : vector<2x256xf32>
    %299 = tpu.matmul %298, %273, %cst_161 {dimension_numbers = #tpu.dot_dimension_numbers<[1], [0], [0], [1], [0, 0, 1, 1], [], []>} : vector<2x16xf32>, vector<16x256xf32>, vector<2x256xf32> -> vector<2x256xf32>
    %300 = arith.addf %270, %299 : vector<2x256xf32>
    %c1_162 = arith.constant 1 : index
    %c0_163 = arith.constant 0 : index
    %c0_164 = arith.constant 0 : index
    %301 = vector.load %arg25[%c1_162, %c0_163, %c0_164] : memref<9x2x16xf32, #tpu.memory_space<vmem>>, vector<1x2x16xf32>
    %302 = vector.shape_cast %301 : vector<1x2x16xf32> to vector<2x16xf32>
    %cst_165 = arith.constant dense<0.000000e+00> : vector<2x256xf32>
    %303 = tpu.matmul %302, %276, %cst_165 {dimension_numbers = #tpu.dot_dimension_numbers<[1], [0], [0], [1], [0, 0, 1, 1], [], []>} : vector<2x16xf32>, vector<16x256xf32>, vector<2x256xf32> -> vector<2x256xf32>
    %304 = arith.addf %300, %303 : vector<2x256xf32>
    %c2_166 = arith.constant 2 : index
    %c0_167 = arith.constant 0 : index
    %c0_168 = arith.constant 0 : index
    %305 = vector.load %arg25[%c2_166, %c0_167, %c0_168] : memref<9x2x16xf32, #tpu.memory_space<vmem>>, vector<1x2x16xf32>
    %306 = vector.shape_cast %305 : vector<1x2x16xf32> to vector<2x16xf32>
    %cst_169 = arith.constant dense<0.000000e+00> : vector<2x256xf32>
    %307 = tpu.matmul %306, %279, %cst_169 {dimension_numbers = #tpu.dot_dimension_numbers<[1], [0], [0], [1], [0, 0, 1, 1], [], []>} : vector<2x16xf32>, vector<16x256xf32>, vector<2x256xf32> -> vector<2x256xf32>
    %308 = arith.addf %304, %307 : vector<2x256xf32>
    %c3_170 = arith.constant 3 : index
    %c0_171 = arith.constant 0 : index
    %c0_172 = arith.constant 0 : index
    %309 = vector.load %arg25[%c3_170, %c0_171, %c0_172] : memref<9x2x16xf32, #tpu.memory_space<vmem>>, vector<1x2x16xf32>
    %310 = vector.shape_cast %309 : vector<1x2x16xf32> to vector<2x16xf32>
    %cst_173 = arith.constant dense<0.000000e+00> : vector<2x256xf32>
    %311 = tpu.matmul %310, %282, %cst_173 {dimension_numbers = #tpu.dot_dimension_numbers<[1], [0], [0], [1], [0, 0, 1, 1], [], []>} : vector<2x16xf32>, vector<16x256xf32>, vector<2x256xf32> -> vector<2x256xf32>
    %312 = arith.addf %308, %311 : vector<2x256xf32>
    %c4_174 = arith.constant 4 : index
    %c0_175 = arith.constant 0 : index
    %c0_176 = arith.constant 0 : index
    %313 = vector.load %arg25[%c4_174, %c0_175, %c0_176] : memref<9x2x16xf32, #tpu.memory_space<vmem>>, vector<1x2x16xf32>
    %314 = vector.shape_cast %313 : vector<1x2x16xf32> to vector<2x16xf32>
    %cst_177 = arith.constant dense<0.000000e+00> : vector<2x256xf32>
    %315 = tpu.matmul %314, %284, %cst_177 {dimension_numbers = #tpu.dot_dimension_numbers<[1], [0], [0], [1], [0, 0, 1, 1], [], []>} : vector<2x16xf32>, vector<16x256xf32>, vector<2x256xf32> -> vector<2x256xf32>
    %316 = arith.addf %312, %315 : vector<2x256xf32>
    %c5_178 = arith.constant 5 : index
    %c0_179 = arith.constant 0 : index
    %c0_180 = arith.constant 0 : index
    %317 = vector.load %arg25[%c5_178, %c0_179, %c0_180] : memref<9x2x16xf32, #tpu.memory_space<vmem>>, vector<1x2x16xf32>
    %318 = vector.shape_cast %317 : vector<1x2x16xf32> to vector<2x16xf32>
    %cst_181 = arith.constant dense<0.000000e+00> : vector<2x256xf32>
    %319 = tpu.matmul %318, %287, %cst_181 {dimension_numbers = #tpu.dot_dimension_numbers<[1], [0], [0], [1], [0, 0, 1, 1], [], []>} : vector<2x16xf32>, vector<16x256xf32>, vector<2x256xf32> -> vector<2x256xf32>
    %320 = arith.addf %316, %319 : vector<2x256xf32>
    %c6_182 = arith.constant 6 : index
    %c0_183 = arith.constant 0 : index
    %c0_184 = arith.constant 0 : index
    %321 = vector.load %arg25[%c6_182, %c0_183, %c0_184] : memref<9x2x16xf32, #tpu.memory_space<vmem>>, vector<1x2x16xf32>
    %322 = vector.shape_cast %321 : vector<1x2x16xf32> to vector<2x16xf32>
    %cst_185 = arith.constant dense<0.000000e+00> : vector<2x256xf32>
    %323 = tpu.matmul %322, %290, %cst_185 {dimension_numbers = #tpu.dot_dimension_numbers<[1], [0], [0], [1], [0, 0, 1, 1], [], []>} : vector<2x16xf32>, vector<16x256xf32>, vector<2x256xf32> -> vector<2x256xf32>
    %324 = arith.addf %320, %323 : vector<2x256xf32>
    %c7_186 = arith.constant 7 : index
    %c0_187 = arith.constant 0 : index
    %c0_188 = arith.constant 0 : index
    %325 = vector.load %arg25[%c7_186, %c0_187, %c0_188] : memref<9x2x16xf32, #tpu.memory_space<vmem>>, vector<1x2x16xf32>
    %326 = vector.shape_cast %325 : vector<1x2x16xf32> to vector<2x16xf32>
    %cst_189 = arith.constant dense<0.000000e+00> : vector<2x256xf32>
    %327 = tpu.matmul %326, %293, %cst_189 {dimension_numbers = #tpu.dot_dimension_numbers<[1], [0], [0], [1], [0, 0, 1, 1], [], []>} : vector<2x16xf32>, vector<16x256xf32>, vector<2x256xf32> -> vector<2x256xf32>
    %328 = arith.addf %324, %327 : vector<2x256xf32>
    %c8_190 = arith.constant 8 : index
    %c0_191 = arith.constant 0 : index
    %c0_192 = arith.constant 0 : index
    %329 = vector.load %arg25[%c8_190, %c0_191, %c0_192] : memref<9x2x16xf32, #tpu.memory_space<vmem>>, vector<1x2x16xf32>
    %330 = vector.shape_cast %329 : vector<1x2x16xf32> to vector<2x16xf32>
    %cst_193 = arith.constant dense<0.000000e+00> : vector<2x256xf32>
    %331 = tpu.matmul %330, %296, %cst_193 {dimension_numbers = #tpu.dot_dimension_numbers<[1], [0], [0], [1], [0, 0, 1, 1], [], []>} : vector<2x16xf32>, vector<16x256xf32>, vector<2x256xf32> -> vector<2x256xf32>
    %332 = arith.addf %328, %331 : vector<2x256xf32>
    %c0_194 = arith.constant 0 : index
    %c0_195 = arith.constant 0 : index
    %333 = vector.load %arg26[%c0_194, %c0_195] : memref<2x1xf32, #tpu.memory_space<vmem>>, vector<2x1xf32>
    %334 = vector.broadcast %333 : vector<2x1xf32> to vector<2x256xf32>
    %335 = arith.addf %332, %334 : vector<2x256xf32>
    %cst_196 = arith.constant 5.000000e-01 : f32
    %336 = vector.broadcast %cst_196 : f32 to vector<2x256xf32>
    %337 = arith.mulf %336, %335 : vector<2x256xf32>
    %338 = math.tanh %337 : vector<2x256xf32>
    %cst_197 = arith.constant 1.000000e+00 : f32
    %339 = vector.broadcast %cst_197 : f32 to vector<2x256xf32>
    %340 = arith.addf %338, %339 : vector<2x256xf32>
    %cst_198 = arith.constant 5.000000e-01 : f32
    %341 = vector.broadcast %cst_198 : f32 to vector<2x256xf32>
    %342 = arith.mulf %341, %340 : vector<2x256xf32>
    %c0_199 = arith.constant 0 : index
    %c0_200 = arith.constant 0 : index
    %343 = vector.load %arg27[%c0_199, %c0_200] : memref<2x256xf32, #tpu.memory_space<vmem>>, vector<2x256xf32>
    tpu.vector_store %arg27[%c0_199, %c0_200], %342 {strides = array<i32>} : memref<2x256xf32, #tpu.memory_space<vmem>>, vector<2x256xf32>,
    return
  }
}

</mosaic_0001>

<bundles_post_ra>
// kernel: vae_forward.1
= control target key start
LH: loop header
LB: loop body
LE: loop exit
PB: predicated region body
PF: predicated region fallthrough
CT: control target
= control target key end

     0   :  { %vm111_vm0 = vcmask 1041408   ;;  %v7155_v1 = vmov 0.0   ;;  %v4963_v2 = vmov 0   ;;  %vm104_vm1 = vcmask 15360   ;;  %s7167_s30 = smov 112   ;;  %s7115_s0 = inlined_call_operand.vmem [shape: f32[2,256], index: 0, kind: input, shape index: {}]   ;;  %s7116_s3 = inlined_call_operand.vmem [shape: f32[16,2], index: 3, kind: input, shape index: {}]   ;;  %s7117_s7 = inlined_call_operand.vmem [shape: f32[16,9], index: 7, kind: input, shape index: {}]   ;;  %s7118_s8 = inlined_call_operand.vmem [shape: f32[16,1], index: 8, kind: input, shape index: {}]   ;;  %s7119_s2 = inlined_call_operand.vmem [shape: f32[9,256], index: 2, kind: input, shape index: {}]   ;;  %s7120_s10 = inlined_call_operand.vmem [shape: f32[16,1], index: 10, kind: input, shape index: {}]   ;;  %s7121_s9 = inlined_call_operand.vmem [shape: f32[9,16,16], index: 9, kind: input, shape index: {}]   ;;  %s7122_s5 = inlined_call_operand.vmem [shape: f32[256,64], index: 5, kind: input, shape index: {}]   ;;  %s7123_s11 = inlined_call_operand.vmem [shape: f32[64,256], index: 11, kind: input, shape index: {}]   ;;  %s7124_s13 = inlined_call_operand.vmem [shape: f32[256,32], index: 13, kind: input, shape index: {}]   ;;  %s7125_s12 = inlined_call_operand.vmem [shape: f32[16,256], index: 12, kind: input, shape index: {}]   ;;  %s7126_s4 = inlined_call_operand.vmem [shape: f32[2,16], index: 4, kind: input, shape index: {}]   ;;  %s7127_s15 = inlined_call_operand.vmem [shape: f32[32,16], index: 15, kind: input, shape index: {}]   ;;  %s7128_s14 = inlined_call_operand.vmem [shape: f32[1,32], index: 14, kind: input, shape index: {}]   ;;  %s7129_s16 = inlined_call_operand.vmem [shape: f32[1,16], index: 16, kind: input, shape index: {}]   ;;  %s7130_s17 = inlined_call_operand.vmem [shape: f32[8,32], index: 17, kind: input, shape index: {}]   ;;  %s7131_s19 = inlined_call_operand.vmem [shape: f32[32,512], index: 19, kind: input, shape index: {}]   ;;  %s7132_s1 = inlined_call_operand.vmem [shape: f32[2,8], index: 1, kind: input, shape index: {}]   ;;  %s7133_s18 = inlined_call_operand.vmem [shape: f32[1,32], index: 18, kind: input, shape index: {}]   ;;  %s7134_s20 = inlined_call_operand.vmem [shape: f32[1,512], index: 20, kind: input, shape index: {}]   ;;  %s7135_s22 = inlined_call_operand.vmem [shape: f32[512,64], index: 22, kind: input, shape index: {}]   ;;  %s7136_s6 = inlined_call_operand.vmem [shape: f32[64,256], index: 6, kind: input, shape index: {}]   ;;  %s7137_s21 = inlined_call_operand.vmem [shape: f32[16,512], index: 21, kind: input, shape index: {}]   ;;  %s7138_s24 = inlined_call_operand.vmem [shape: f32[16,1], index: 24, kind: input, shape index: {}]   ;;  %s7139_s23 = inlined_call_operand.vmem [shape: f32[9,16,16], index: 23, kind: input, shape index: {}]   ;;  %s7140_s26 = inlined_call_operand.vmem [shape: f32[2,1], index: 26, kind: input, shape index: {}]   ;;  %s7141_s25 = inlined_call_operand.vmem [shape: f32[9,2,16], index: 25, kind: input, shape index: {}]   ;;  %s7142_s28 = inlined_call_operand.vmem [shape: f32[2,24], index: 28, kind: output, shape index: {1}]   ;;  %s7143_s27 = inlined_call_operand.vmem [shape: f32[2,256], index: 27, kind: output, shape index: {0}]  }
   0x1   :  { %7179 = sst [smem:[#allocation10_spill]] %s7115_s0  ;;  %180 = vmatprep.mubr.f32.mxu0 %v7155_v1  ;;  %4939 = vset.pattern.permute.xlu0 %v4963_v2  ;;  %v4964_v8 = vmov 1   ;;  %v4965_v9 = vmov 2   ;;  %v4966_v10 = vmov 3   ;;  %v4967_v11 = vmov 4  }
   0x2   :  { %7180 = sst [smem:[#allocation11_spill]] %s7116_s3  ;;  %4941 = vset.pattern.permute.xlu1 %v4963_v2  ;;  %783 = vmatprep.mubr.f32.mxu1 %v7155_v1  ;;  %v4968_v12 = vmov 5   ;;  %v4969_v13 = vmov 6   ;;  %v4970_v14 = vmov 7   ;;  %v4971_v15 = vmov 8   ;;  %s7175_s3 = smov 15  }
   0x3   :  { %7181 = sst [smem:[#allocation12_spill]] %s7117_s7  ;;  %s7177_s7 = smov 17   ;;  %v203_v54 = vlaneseq  ;;  %vm712_vm10 = vcmask 130048   ;;  %vm1646_vm11 = vcmask 523264   ;;  %vm4980_vm12 = vmmov 0  }
   0x4   :  { %7182 = sst [smem:[#allocation13_spill]] %s7118_s8  ;;  %s7169_s8 = smov 113   ;;  %vm1938_vm13 = vcmask 261120   ;;  %vm2026_vm14 = vcmask 64512   ;;  %vm2028_vm15 = vcmask 189440  }
   0x5   :  { %7183 = sst [smem:[#allocation14_spill]] %s7119_s2  ;;  %v5294_v56 = vshrl.u32 %v203_v54, 7  ;;  %v5298_v58 = vand.u32 127, %v203_v54 }
   0x6   :  { %7184 = sst [smem:[#allocation15_spill]] %s7120_s10  ;;  %s4975_s10 = smov 16  }
   0x7   :  { %7185 = sst [smem:[#allocation16_spill]] %s7121_s9  ;;  %v5301_v59 = vsub.s32 1, %v5294_v56  ;;  %v5306_v61 = vsub.s32 0, %v5294_v56  ;;  %vm230_vm2 = vcmp.lt.s32.totalorder %v5298_v58, 16  ;;  %vm205_vm3 = vcmp.lt.s32.totalorder %v5298_v58, 17 }
   0x8   :  { %7186 = sst [smem:[#allocation17_spill]] %s7122_s5  ;;  %vm255_vm4 = vcmp.lt.s32.totalorder %v5298_v58, 15  ;;  %vm280_vm5 = vcmp.lt.s32.totalorder %v5298_v58, 1  ;;  %vm317_vm6 = vcmp.lt.s32.totalorder %v5298_v58, 127  ;;  %vm342_vm7 = vcmp.lt.s32.totalorder %v5298_v58, 113 }
   0x9   :  { %7187 = sst [smem:[#allocation18_spill]] %s7123_s11  ;;  %s7173_s11 = smov 1   ;;  %7200 = vst [vmem:[#allocation6_spill] sm:$0xff] %v5301_v59  ;;  %7201 = vst [vmem:[#allocation7_spill] sm:$0xff] %v5306_v61  ;;  %vm367_vm8 = vcmp.lt.s32.totalorder %v5298_v58, 112  ;;  %vm392_vm9 = vcmp.lt.s32.totalorder %v5298_v58, 111 }
   0xa   :  { %7188 = sst [smem:[#allocation19_spill]] %s7124_s13 }
   0xb   :  { %7189 = sst [smem:[#allocation20_spill]] %s7125_s12 }
   0xc   :  { %7190 = sst [smem:[#allocation21_spill]] %s7126_s4 }
   0xd   :  { %7191 = sst [smem:[#allocation22_spill]] %s7127_s15 }
   0xe   :  { %s7192_s13 = sld [smem:[#allocation10_spill]] }
   0xf   :  { %s7193_s9 = sld [smem:[#allocation12_spill]] }
  0x10   :  { %s7194_s2 = sld [smem:[#allocation11_spill]] }
  0x11   :  { %s7195_s4 = sld [smem:[#allocation13_spill]] }
  0x12   :  { %s7202_s0 = sld [smem:[#allocation14_spill]] }
  0x13   :  { %s7209_s15 = sld [smem:[#allocation15_spill]] }
  0x14   :  { %v4620_v0 = vld.sshfl [vmem:[%s7192_s13] sm:$0x33 pattern:$0x76325410]  ;;  %s7171_s13 = smov 127  }
  0x15   :  { %v103_v3 = vcombine.high %v4620_v0, %v4620_v0  ;;  %v194_v4 = vld [vmem:[%s7193_s9 + $0x8] sm:$0xff]  ;;  %v5139_v5 = vld [vmem:[%s7193_s9] sm:$0xff]  ;;  %s7165_s9 = smov 111  }
  0x16   :  { %v92_v6 = vld [vmem:[%s7194_s2] sm:$0xff]  ;;  %416 = vperm.xlu0 %4939, %v194_v4   ;;  %411 = vperm.xlu1 %4941, %v5139_v5   ;;  %v93_v7 = vld [vmem:[%s7194_s2 + $0x8] sm:$0xff] }
  0x17   :  { %4621 = vmatprep.subr.msk.mxu0 %vm111_vm0, %v103_v3  ;;  %v556_v20 = vld [vmem:[%s7195_s4 + $0x8] sm:$0xff]  ;;  %v555_v24 = vld [vmem:[%s7195_s4] sm:$0xff]  ;;  %s7216_s4 = sld [smem:[#allocation21_spill]] }
  0x18   :  { %4622 = vmatpush1.msk.msra.mxu0 %vm111_vm0, %v4620_v0  ;;  %v5312_v62 = vld [vmem:[%s7202_s0] sm:$0xff]  ;;  %v5317_v63 = vld [vmem:[%s7202_s0 + $0x8] sm:$0xff] }
  0x19   :  { %4623 = vmatmul.mubr.msk.f32.vlgmr.msra.gmra.mxu0 %vm104_vm1, %v92_v6  ;;  %v5322_v0 = vrot.slane %v5312_v62, %v5301_v59  ;;  %v5328_v3 = vrot.slane %v5317_v63, %v5301_v59  ;;  %v5335_v6 = vsub.s32 2, %v5294_v56 }
  0x1a   :  { %186 = vmatprep.mubr.f32.mxu0 %v7155_v1  ;;  %4940 = vset.pattern.permute.xlu0 %v4964_v8 }
  0x1b   :  { %432 = vperm.xlu0 %4940, %v194_v4   ;;  %4942 = vset.pattern.permute.xlu1 %v4965_v9  ;;  %7203 = vst [vmem:[#allocation8_spill] sm:$0xff] %v5335_v6 }
  0x1c   :  { %448 = vperm.xlu1 %4942, %v194_v4  }
  0x1d   :  { %4624 = vmatmul.mubr.msk.f32.gmra.mxu0 %vm104_vm1, %v93_v7  ;;  %v5339_v7 = vrot.slane %v5312_v62, %v5306_v61 }
  0x1e   :  { %866 = vmatprep.mubr.f32.mxu0 %v7155_v1 }
  0x1f   :  { %428 = vperm.xlu0 %4940, %v5139_v5  }
  0x20   :  { %4944 = vset.pattern.permute.xlu1 %v4966_v10 }
  0x21   :  { %464 = vperm.xlu1 %4944, %v194_v4  }
  0x23   :  { %4943 = vset.pattern.permute.xlu0 %v4965_v9  ;;  %v5345_v9 = vrot.slane %v5317_v63, %v5306_v61 }
  0x24   :  { %444 = vperm.xlu0 %4943, %v5139_v5  }
  0x25   :  { %460 = vperm.xlu1 %4944, %v5139_v5  }
  0x28   :  { %4945 = vset.pattern.permute.xlu0 %v4967_v11 }
  0x29   :  { %480 = vperm.xlu0 %4945, %v194_v4   ;;  %4946 = vset.pattern.permute.xlu1 %v4968_v12 }
  0x2a   :  { %496 = vperm.xlu1 %4946, %v194_v4  }
  0x2d   :  { %476 = vperm.xlu0 %4945, %v5139_v5  }
  0x2e   :  { %4948 = vset.pattern.permute.xlu1 %v4969_v13  ;;  %v5354_v13 = vsub.s32 3, %v5294_v56 }
  0x2f   :  { %512 = vperm.xlu1 %4948, %v194_v4  }
  0x30   :  { %7204 = vst [vmem:[#allocation9_spill] sm:$0xff] %v5354_v13  ;;  %v5384_v1 = vrot.slane %v5317_v63, %v5354_v13 }
  0x31   :  { %4947 = vset.pattern.permute.xlu0 %v4968_v12 }
  0x32   :  { %492 = vperm.xlu0 %4947, %v5139_v5  }
  0x33   :  { %508 = vperm.xlu1 %4948, %v5139_v5  }
  0x36   :  { %4949 = vset.pattern.permute.xlu0 %v4970_v14 }
  0x37   :  { %528 = vperm.xlu0 %4949, %v194_v4   ;;  %4950 = vset.pattern.permute.xlu1 %v4971_v15 }
  0x38   :  { %544 = vperm.xlu1 %4950, %v194_v4  }
  0x3b   :  { %524 = vperm.xlu0 %4949, %v5139_v5  }
  0x3c   :  { %4953 = vset.pattern.permute.xlu1 %v4963_v2 }
  0x3f   :  { %4951 = vset.pattern.permute.xlu0 %v4971_v15 }
  0x91   :  { %v5235_v21 = vpop.permute.xlu1 %411  ;;  %v5243_v23 = vpop.permute.xlu0 %416 }
  0x96   :  { %v5252_v26 = vpop.permute.xlu0 %432 }
  0x97   :  { %v5241_v22 = vpop.permute.xlu1 %448 }
  0x9a   :  { %v5256_v28 = vpop.permute.xlu0 %428 }
  0x9c   :  { %v5250_v25 = vpop.permute.xlu1 %464 }
  0x9f   :  { %v5260_v30 = vpop.permute.xlu0 %444 }
  0xa0   :  { %v5254_v27 = vpop.permute.xlu1 %460 }
  0xa4   :  { %v5264_v32 = vpop.permute.xlu0 %480 }
  0xa5   :  { %v5258_v29 = vpop.permute.xlu1 %496 }
  0xa6   :  { %7196 = vst [vmem:[#allocation2_spill] sm:$0xff] %v5258_v29 }
  0xa8   :  { %v5268_v34 = vpop.permute.xlu0 %476 }
  0xaa   :  { %v5262_v31 = vpop.permute.xlu1 %512 }
  0xab   :  { %7197 = vst [vmem:[#allocation3_spill] sm:$0xff] %v5262_v31 }
  0xad   :  { %v5270_v35 = vpop.permute.xlu0 %492 }
  0xae   :  { %v5266_v33 = vpop.permute.xlu1 %508 }
  0xb2   :  { %v5274_v37 = vpop.permute.xlu0 %528 }
  0xb3   :  { %v5272_v36 = vpop.permute.xlu1 %544  ;;  %7199 = vst [vmem:[#allocation5_spill] sm:$0xff] %v5274_v37 }
  0xb4   :  { %7198 = vst [vmem:[#allocation4_spill] sm:$0xff] %v5272_v36 }
  0xb6   :  { %v5276_v40 = vpop.permute.xlu0 %524 }
  0xd9   :  { %v5164_v16 = vpop.f32.mrf.mxu0 }
  0xda   :  { %247 = vrot.lane.b32.xlu1 %v5164_v16, %s7175_s3  ;;  %195 = vrot.lane.b32.xlu0 %v5164_v16, %s7177_s7 }
  0xdb   :  { %v5178_v17 = vpop.f32.mrf.mxu0 }
  0xdd   :  { %v5188_v18 = vpop.f32.mrf.mxu0 }
  0xde   :  { %272 = vrot.lane.b32.xlu1 %v5164_v16, %s7173_s11  ;;  %222 = vrot.lane.b32.xlu0 %v5164_v16, %s4975_s10 }
  0xdf   :  { %v5206_v19 = vpop.f32.mrf.mxu0 }
  0xe2   :  { %309 = vrot.lane.b32.xlu1 %v5164_v16, %s7171_s13  ;;  %359 = vrot.lane.b32.xlu0 %v5164_v16, %s7167_s30 }
  0xe6   :  { %334 = vrot.lane.b32.xlu1 %v5164_v16, %s7169_s8  ;;  %251 = vrot.lane.b32.xlu0 %v5178_v17, %s7175_s3 }
  0xea   :  { %313 = vrot.lane.b32.xlu0 %v5178_v17, %s7171_s13  ;;  %199 = vrot.lane.b32.xlu1 %v5178_v17, %s7177_s7 }
  0xee   :  { %226 = vrot.lane.b32.xlu1 %v5178_v17, %s4975_s10  ;;  %249 = vrot.lane.b32.xlu0 %v5188_v18, %s7175_s3 }
  0xf2   :  { %276 = vrot.lane.b32.xlu1 %v5178_v17, %s7173_s11  ;;  %311 = vrot.lane.b32.xlu0 %v5188_v18, %s7171_s13 }
  0xf6   :  { %338 = vrot.lane.b32.xlu1 %v5178_v17, %s7169_s8  ;;  %361 = vrot.lane.b32.xlu0 %v5188_v18, %s7167_s30 }
  0xfa   :  { %363 = vrot.lane.b32.xlu1 %v5178_v17, %s7167_s30  ;;  %386 = vrot.lane.b32.xlu0 %v5188_v18, %s7165_s9 }
  0xfe   :  { %197 = vrot.lane.b32.xlu1 %v5188_v18, %s7177_s7  ;;  %228 = vrot.lane.b32.xlu0 %v5206_v19, %s4975_s10 }
 0x102   :  { %224 = vrot.lane.b32.xlu1 %v5188_v18, %s4975_s10  ;;  %278 = vrot.lane.b32.xlu0 %v5206_v19, %s7173_s11 }
 0x106   :  { %274 = vrot.lane.b32.xlu1 %v5188_v18, %s7173_s11  ;;  %340 = vrot.lane.b32.xlu0 %v5206_v19, %s7169_s8 }
 0x10a   :  { %336 = vrot.lane.b32.xlu1 %v5188_v18, %s7169_s8  ;;  %540 = vperm.xlu0 %4951, %v5139_v5  }
 0x10e   :  { %201 = vrot.lane.b32.xlu1 %v5206_v19, %s7177_s7  ;;  %4952 = vset.pattern.permute.xlu0 %v4963_v2 }
 0x10f   :  { %564 = vperm.xlu0 %4952, %v556_v20   ;;  %v5361_v20 = vrot.slane %v5312_v62, %v5335_v6 }
 0x112   :  { %253 = vrot.lane.b32.xlu1 %v5206_v19, %s7175_s3 }
 0x116   :  { %315 = vrot.lane.b32.xlu1 %v5206_v19, %s7171_s13 }
 0x11a   :  { %384 = vrot.lane.b32.xlu1 %v5164_v16, %s7165_s9 }
 0x11e   :  { %388 = vrot.lane.b32.xlu1 %v5178_v17, %s7165_s9 }
 0x122   :  { %365 = vrot.lane.b32.xlu1 %v5206_v19, %s7167_s30 }
 0x126   :  { %390 = vrot.lane.b32.xlu1 %v5206_v19, %s7165_s9 }
 0x12a   :  { %559 = vperm.xlu1 %4953, %v555_v24  }
 0x14c   :  { %v248_v38 = vpop.permute.xlu1 %247  ;;  %v196_v42 = vpop.permute.xlu0 %195 }
 0x150   :  { %v273_v39 = vpop.permute.xlu1 %272  ;;  %v223_v45 = vpop.permute.xlu0 %222 }
 0x154   :  { %v5278_v41 = vpop.permute.xlu1 %309  ;;  %v5282_v47 = vpop.permute.xlu0 %359 }
 0x158   :  { %v5280_v43 = vpop.permute.xlu1 %334  ;;  %v252_v50 = vpop.permute.xlu0 %251 }
 0x159   :  { %v256_v54 = vsel %vm255_vm4, %v248_v38, %v252_v50 }
 0x15c   :  { %v200_v44 = vpop.permute.xlu1 %199  ;;  %v5288_v52 = vpop.permute.xlu0 %313 }
 0x15d   :  { %v208_v10 = vsel %vm205_vm3, %v200_v44, %v196_v42  ;;  %v206_v11 = vsel %vm205_vm3, %v196_v42, %v200_v44  ;;  %v5369_v42 = vrot.slane %v5317_v63, %v5335_v6  ;;  %v258_v44 = vsel %vm255_vm4, %v252_v50, %v248_v38 }
 0x15e   :  { %v218_v24 = vmul.f32 %v5339_v7, %v208_v10  ;;  %v268_v38 = vmul.f32 %v5361_v20, %v258_v44 }
 0x160   :  { %v227_v46 = vpop.permute.xlu1 %226  ;;  %v5296_v57 = vpop.permute.xlu0 %249  ;;  %v419_v50 = vmul.f32 %v5235_v21, %v218_v24 }
 0x161   :  { %v233_v4 = vsel %vm230_vm2, %v227_v46, %v223_v45  ;;  %v231_v8 = vsel %vm230_vm2, %v223_v45, %v227_v46  ;;  %v219_v46 = vmul.f32 %v5345_v9, %v206_v11  ;;  %v299_v11 = vsub.s32 4, %v5294_v56 }
 0x162   :  { %v243_v12 = vmul.f32 %v5322_v0, %v233_v4  ;;  %v244_v14 = vmul.f32 %v5328_v3, %v231_v8  ;;  %v5379_v8 = vrot.slane %v5312_v62, %v5354_v13 }
 0x163   :  { %v5402_v29 = vrot.slane %v5312_v62, %v299_v11  ;;  %v5405_v24 = vrot.slane %v5317_v63, %v299_v11 }
 0x164   :  { %v277_v48 = vpop.permute.xlu1 %276  ;;  %v5324_v2 = vpop.permute.xlu0 %311  ;;  %v435_v4 = vmul.f32 %v5256_v28, %v243_v12  ;;  %v436_v10 = vmul.f32 %v5256_v28, %v244_v14  ;;  %v269_v28 = vmul.f32 %v5369_v42, %v256_v54  ;;  %v420_v14 = vmul.f32 %v5235_v21, %v219_v46 }
 0x165   :  { %v283_v59 = vsel %vm280_vm5, %v277_v48, %v273_v39  ;;  %v281_v12 = vsel %vm280_vm5, %v273_v39, %v277_v48  ;;  %v451_v39 = vmul.f32 %v5260_v30, %v268_v38  ;;  %v324_v48 = vsub.s32 5, %v5294_v56 }
 0x166   :  { %v439_v13 = vadd.f32 %v435_v4, %v419_v50  ;;  %v293_v61 = vmul.f32 %v5379_v8, %v283_v59  ;;  %v440_v37 = vadd.f32 %v436_v10, %v420_v14  ;;  %v294_v31 = vmul.f32 %v5384_v1, %v281_v12 }
 0x167   :  { %v452_v21 = vmul.f32 %v5260_v30, %v269_v28  ;;  %v305_v10 = vmul.f32 %v5402_v29, %v5164_v16  ;;  %v5418_v11 = vrot.slane %v5312_v62, %v324_v48  ;;  %v306_v38 = vmul.f32 %v5405_v24, %v5178_v17 }
 0x168   :  { %v5284_v49 = vpop.permute.xlu1 %338  ;;  %v5365_v45 = vpop.permute.xlu0 %361  ;;  %v455_v59 = vadd.f32 %v451_v39, %v439_v13  ;;  %v467_v46 = vmul.f32 %v5254_v27, %v293_v61  ;;  %v468_v4 = vmul.f32 %v5254_v27, %v294_v31  ;;  %v5423_v30 = vrot.slane %v5317_v63, %v324_v48 }
 0x169   :  { %v456_v54 = vadd.f32 %v452_v21, %v440_v37  ;;  %v318_v37 = vsel %vm317_vm6, %v5278_v41, %v5288_v52  ;;  %v349_v27 = vsub.s32 6, %v5294_v56  ;;  %v320_v16 = vsel %vm317_vm6, %v5288_v52, %v5278_v41 }
 0x16a   :  { %v471_v31 = vadd.f32 %v467_v46, %v455_v59  ;;  %v374_v17 = vsub.s32 7, %v5294_v56  ;;  %v483_v12 = vmul.f32 %v5268_v34, %v305_v10  ;;  %v330_v28 = vmul.f32 %v5418_v11, %v318_v37 }
 0x16b   :  { %v472_v13 = vadd.f32 %v468_v4, %v456_v54  ;;  %v484_v14 = vmul.f32 %v5268_v34, %v306_v38  ;;  %v331_v39 = vmul.f32 %v5423_v30, %v320_v16  ;;  %v5441_v48 = vrot.slane %v5312_v62, %v349_v27 }
 0x16c   :  { %v5286_v51 = vpop.permute.xlu1 %363  ;;  %v5398_v36 = vpop.permute.xlu0 %386  ;;  %v5444_v41 = vrot.slane %v5317_v63, %v349_v27  ;;  %v487_v52 = vadd.f32 %v483_v12, %v471_v31  ;;  %v343_v56 = vsel %vm342_vm7, %v5280_v43, %v5284_v49  ;;  %v345_v34 = vsel %vm342_vm7, %v5284_v49, %v5280_v43 }
 0x16d   :  { %v488_v59 = vadd.f32 %v484_v14, %v472_v13  ;;  %v5456_v46 = vrot.slane %v5312_v62, %v374_v17  ;;  %v499_v54 = vmul.f32 %v5270_v35, %v330_v28  ;;  %v5460_v4 = vrot.slane %v5317_v63, %v374_v17 }
 0x16e   :  { %v368_v10 = vsel %vm367_vm8, %v5282_v47, %v5286_v51  ;;  %v500_v37 = vmul.f32 %v5270_v35, %v331_v39  ;;  %v355_v43 = vmul.f32 %v5441_v48, %v343_v56  ;;  %v356_v49 = vmul.f32 %v5444_v41, %v345_v34 }
 0x16f   :  { %v503_v62 = vadd.f32 %v499_v54, %v487_v52  ;;  %v370_v63 = vsel %vm367_vm8, %v5286_v51, %v5282_v47  ;;  %v380_v31 = vmul.f32 %v5456_v46, %v368_v10 }
 0x170   :  { %v5290_v53 = vpop.permute.xlu1 %197  ;;  %v229_v50 = vpop.permute.xlu0 %228  ;;  %v504_v16 = vadd.f32 %v500_v37, %v488_v59  ;;  %v381_v28 = vmul.f32 %v5460_v4, %v370_v63  ;;  %v515_v14 = vmul.f32 %v5266_v33, %v355_v43  ;;  %v516_v39 = vmul.f32 %v5266_v33, %v356_v49 }
 0x171   :  { %v531_v63 = vmul.f32 %v5276_v40, %v380_v31 }
 0x172   :  { %v520_v37 = vadd.f32 %v516_v39, %v504_v16  ;;  %v532_v33 = vmul.f32 %v5276_v40, %v381_v28 }
 0x174   :  { %v5292_v55 = vpop.permute.xlu1 %224  ;;  %v279_v21 = vpop.permute.xlu0 %278 }
 0x175   :  { %v232_v13 = vsel %vm230_vm2, %v5292_v55, %v229_v50  ;;  %v234_v47 = vsel %vm230_vm2, %v229_v50, %v5292_v55  ;;  %v5505_v55 = vld [vmem:[%s7202_s0 + $0x18] ss:$0 sm:$0xff] }
 0x176   :  { %v245_v52 = vmul.f32 %v5322_v0, %v234_v47  ;;  %v246_v56 = vmul.f32 %v5328_v3, %v232_v13 }
 0x178   :  { %v5303_v60 = vpop.permute.xlu1 %274  ;;  %v341_v51 = vpop.permute.xlu0 %340  ;;  %v437_v13 = vmul.f32 %v5252_v26, %v245_v52  ;;  %v438_v47 = vmul.f32 %v5252_v26, %v246_v56 }
 0x179   :  { %v284_v49 = vsel %vm280_vm5, %v279_v21, %v5303_v60 }
 0x17c   :  { %v5332_v5 = vpop.permute.xlu1 %336 }
 0x180   :  { %v5357_v15 = vpop.permute.xlu1 %201 }
 0x181   :  { %v207_v27 = vsel %vm205_vm3, %v5290_v53, %v5357_v15  ;;  %v209_v35 = vsel %vm205_vm3, %v5357_v15, %v5290_v53  ;;  %v5500_v15 = vld [vmem:[%s7202_s0 + $0x10] ss:$0 sm:$0xff] }
 0x184   :  { %v5388_v6 = vpop.permute.xlu1 %253 }
 0x185   :  { %v257_v17 = vsel %vm255_vm4, %v5296_v57, %v5388_v6  ;;  %v259_v53 = vsel %vm255_vm4, %v5388_v6, %v5296_v57  ;;  %v220_v57 = vmul.f32 %v5339_v7, %v209_v35  ;;  %v221_v6 = vmul.f32 %v5345_v9, %v207_v27  ;;  %v541_v43 = vpop.permute.xlu0 %540 }
 0x186   :  { %v270_v59 = vmul.f32 %v5361_v20, %v259_v53  ;;  %v271_v54 = vmul.f32 %v5369_v42, %v257_v17  ;;  %v295_v53 = vmul.f32 %v5379_v8, %v284_v49  ;;  %v346_v49 = vsel %vm342_vm7, %v341_v51, %v5332_v5 }
 0x187   :  { %v421_v27 = vmul.f32 %v5243_v23, %v220_v57  ;;  %v422_v35 = vmul.f32 %v5243_v23, %v221_v6  ;;  %v536_v6 = vadd.f32 %v532_v33, %v520_v37 }
 0x188   :  { %v5409_v44 = vpop.permute.xlu1 %315  ;;  %v453_v16 = vmul.f32 %v5241_v22, %v270_v59  ;;  %v454_v40 = vmul.f32 %v5241_v22, %v271_v54  ;;  %v307_v22 = vmul.f32 %v5402_v29, %v5188_v18 }
 0x189   :  { %v441_v28 = vadd.f32 %v437_v13, %v421_v27  ;;  %v442_v57 = vadd.f32 %v438_v47, %v422_v35  ;;  %v319_v54 = vsel %vm317_vm6, %v5324_v2, %v5409_v44  ;;  %v7205_v47 = vld [vmem:[#allocation2_spill] sm:$0xff] }
 0x18a   :  { %v332_v33 = vmul.f32 %v5418_v11, %v319_v54 }
 0x18b   :  { %v457_v26 = vadd.f32 %v453_v16, %v441_v28  ;;  %v7206_v28 = vld [vmem:[#allocation3_spill] sm:$0xff] }
 0x18c   :  { %v385_v61 = vpop.permute.xlu1 %384 }
 0x190   :  { %v389_v38 = vpop.permute.xlu1 %388 }
 0x191   :  { %v393_v50 = vsel %vm392_vm9, %v385_v61, %v389_v38  ;;  %v395_v12 = vsel %vm392_vm9, %v389_v38, %v385_v61  ;;  %v519_v38 = vadd.f32 %v515_v14, %v503_v62  ;;  %v282_v62 = vsel %vm280_vm5, %v5303_v60, %v279_v21 }
 0x192   :  { %v405_v61 = vmul.f32 %v5500_v15, %v393_v50  ;;  %v406_v10 = vmul.f32 %v5505_v55, %v395_v12  ;;  %v296_v23 = vmul.f32 %v5384_v1, %v282_v62  ;;  %v458_v14 = vadd.f32 %v454_v40, %v442_v57  ;;  %v7207_v57 = vld [vmem:[#allocation5_spill] sm:$0xff] }
 0x193   :  { %v535_v12 = vadd.f32 %v531_v63, %v519_v38  ;;  %v469_v60 = vmul.f32 %v5250_v25, %v295_v53  ;;  %v308_v21 = vmul.f32 %v5405_v24, %v5206_v19  ;;  %v321_v38 = vsel %vm317_vm6, %v5409_v44, %v5324_v2 }
 0x194   :  { %v366_v34 = vpop.permute.xlu1 %365  ;;  %v547_v31 = vmul.f32 %v541_v43, %v405_v61  ;;  %v548_v17 = vmul.f32 %v541_v43, %v406_v10  ;;  %v470_v59 = vmul.f32 %v5250_v25, %v296_v23  ;;  %v344_v25 = vsel %vm342_vm7, %v5332_v5, %v341_v51 }
 0x195   :  { %v473_v37 = vadd.f32 %v469_v60, %v457_v26  ;;  %v485_v43 = vmul.f32 %v5264_v32, %v307_v22  ;;  %v333_v2 = vmul.f32 %v5423_v30, %v321_v38  ;;  %v486_v44 = vmul.f32 %v5264_v32, %v308_v21 }
 0x196   :  { %v551_v39 = vadd.f32 %v547_v31, %v535_v12  ;;  %v552_v52 = vadd.f32 %v548_v17, %v536_v6  ;;  %v474_v18 = vadd.f32 %v470_v59, %v458_v14  ;;  %v369_v27 = vsel %vm367_vm8, %v5365_v45, %v366_v34  ;;  %v7208_v14 = vld [vmem:[#allocation4_spill] sm:$0xff] }
 0x197   :  { %v371_v35 = vsel %vm367_vm8, %v366_v34, %v5365_v45  ;;  %v357_v5 = vmul.f32 %v5441_v48, %v344_v25  ;;  %v489_v51 = vadd.f32 %v485_v43, %v473_v37  ;;  %v358_v32 = vmul.f32 %v5444_v41, %v346_v49  ;;  %v1541_v25 = vld [vmem:[%s7209_s15] sm:$0xff]  ;;  %v1542_v43 = vld [vmem:[%s7209_s15 + $0x8] sm:$0xff]  ;;  %s7210_s15 = sld [smem:[#allocation16_spill]] }
 0x198   :  { %v391_v50 = vpop.permute.xlu1 %390  ;;  %v490_v13 = vadd.f32 %v486_v44, %v474_v18  ;;  %v501_v62 = vmul.f32 %v7205_v47, %v332_v33  ;;  %v502_v31 = vmul.f32 %v7205_v47, %v333_v2  ;;  %v382_v45 = vmul.f32 %v5456_v46, %v369_v27 }
 0x199   :  { %v394_v16 = vsel %vm392_vm9, %v5398_v36, %v391_v50  ;;  %v396_v40 = vsel %vm392_vm9, %v391_v50, %v5398_v36  ;;  %v383_v34 = vmul.f32 %v5460_v4, %v371_v35  ;;  %v517_v36 = vmul.f32 %v7206_v28, %v357_v5 }
 0x19a   :  { %v505_v17 = vadd.f32 %v501_v62, %v489_v51  ;;  %v506_v53 = vadd.f32 %v502_v31, %v490_v13  ;;  %v407_v12 = vmul.f32 %v5500_v15, %v394_v16  ;;  %v408_v23 = vmul.f32 %v5505_v55, %v396_v40 }
 0x19b   :  { %v518_v50 = vmul.f32 %v7206_v28, %v358_v32  ;;  %v533_v6 = vmul.f32 %v7207_v57, %v382_v45  ;;  %v534_v26 = vmul.f32 %v7207_v57, %v383_v34 }
 0x19c   :  { %v521_v60 = vadd.f32 %v517_v36, %v505_v17 }
 0x19d   :  { %v522_v22 = vadd.f32 %v518_v50, %v506_v53 }
 0x19e   :  { %v537_v21 = vadd.f32 %v533_v6, %v521_v60 }
 0x1a5   :  { %v560_v56 = vpop.permute.xlu1 %559 }
 0x1a6   :  { %v567_v61 = vadd.f32 %v560_v56, %v551_v39  ;;  %v568_v10 = vadd.f32 %v560_v56, %v552_v52  ;;  %v549_v39 = vmul.f32 %v7208_v14, %v407_v12  ;;  %v550_v52 = vmul.f32 %v7208_v14, %v408_v23  ;;  %v4627_v14 = vld [vmem:[%s7210_s15 + $0x10] sm:$0xff] }
 0x1a7   :  { %v538_v56 = vadd.f32 %v534_v26, %v522_v22 }
 0x1a8   :  { %v5552_v63 = vmax.f32 %v567_v61, 0.0  ;;  %v5554_v19 = vmax.f32 %v568_v10, 0.0  ;;  %v553_v59 = vadd.f32 %v549_v39, %v537_v21  ;;  %v565_v61 = vpop.permute.xlu0 %564 }
 0x1a9   :  { %v554_v54 = vadd.f32 %v550_v52, %v538_v56 }
 0x1aa   :  { %595 = vrot.lane.b32.xlu0 %v5554_v19, %s4975_s10  ;;  %591 = vrot.lane.b32.xlu1 %v5552_v63, %s4975_s10  ;;  %v569_v10 = vadd.f32 %v565_v61, %v553_v59 }
 0x1ab   :  { %v570_v38 = vadd.f32 %v565_v61, %v554_v54 }
 0x1ac   :  { %v5616_v37 = vmax.f32 %v569_v10, 0.0  ;;  %v7211_v10 = vmov 0.0  }
 0x1ad   :  { %v5618_v18 = vmax.f32 %v570_v38, 0.0  ;;  %v4628_v38 = vld [vmem:[%s7210_s15 + $0x18] sm:$0xff] }
 0x1ae   :  { %579 = vrot.lane.b32.xlu0 %v5554_v19, %s7177_s7  ;;  %575 = vrot.lane.b32.xlu1 %v5552_v63, %s7177_s7 }
 0x1b2   :  { %611 = vrot.lane.b32.xlu0 %v5554_v19, %s7175_s3  ;;  %607 = vrot.lane.b32.xlu1 %v5552_v63, %s7175_s3 }
 0x1b6   :  { %627 = vrot.lane.b32.xlu0 %v5554_v19, %s7173_s11  ;;  %623 = vrot.lane.b32.xlu1 %v5552_v63, %s7173_s11 }
 0x1ba   :  { %647 = vrot.lane.b32.xlu0 %v5554_v19, %s7171_s13  ;;  %643 = vrot.lane.b32.xlu1 %v5552_v63, %s7171_s13 }
 0x1be   :  { %663 = vrot.lane.b32.xlu0 %v5554_v19, %s7169_s8  ;;  %659 = vrot.lane.b32.xlu1 %v5552_v63, %s7169_s8 }
 0x1c2   :  { %593 = vrot.lane.b32.xlu1 %v5616_v37, %s4975_s10  ;;  %597 = vrot.lane.b32.xlu0 %v5618_v18, %s4975_s10 }
 0x1c6   :  { %577 = vrot.lane.b32.xlu1 %v5616_v37, %s7177_s7  ;;  %581 = vrot.lane.b32.xlu0 %v5618_v18, %s7177_s7 }
 0x1ca   :  { %609 = vrot.lane.b32.xlu1 %v5616_v37, %s7175_s3  ;;  %613 = vrot.lane.b32.xlu0 %v5618_v18, %s7175_s3 }
 0x1ce   :  { %675 = vrot.lane.b32.xlu1 %v5552_v63, %s7167_s30  ;;  %679 = vrot.lane.b32.xlu0 %v5554_v19, %s7167_s30 }
 0x1d2   :  { %625 = vrot.lane.b32.xlu1 %v5616_v37, %s7173_s11  ;;  %629 = vrot.lane.b32.xlu0 %v5618_v18, %s7173_s11 }
 0x1d6   :  { %645 = vrot.lane.b32.xlu1 %v5616_v37, %s7171_s13  ;;  %649 = vrot.lane.b32.xlu0 %v5618_v18, %s7171_s13 }
 0x1da   :  { %661 = vrot.lane.b32.xlu1 %v5616_v37, %s7169_s8  ;;  %665 = vrot.lane.b32.xlu0 %v5618_v18, %s7169_s8  ;;  %s7212_s8 = sld [smem:[#allocation17_spill]] }
 0x1de   :  { %677 = vrot.lane.b32.xlu1 %v5616_v37, %s7167_s30  ;;  %681 = vrot.lane.b32.xlu0 %v5618_v18, %s7167_s30  ;;  %s7215_s30 = sld [smem:[#allocation20_spill]] }
 0x1e2   :  { %693 = vrot.lane.b32.xlu1 %v5616_v37, %s7165_s9  ;;  %697 = vrot.lane.b32.xlu0 %v5618_v18, %s7165_s9 }
 0x1e6   :  { %691 = vrot.lane.b32.xlu1 %v5552_v63, %s7165_s9  ;;  %695 = vrot.lane.b32.xlu0 %v5554_v19, %s7165_s9  ;;  %s7214_s9 = sld [smem:[#allocation19_spill]] }
 0x1ea   :  { %1545 = vperm.xlu1 %4953, %v1541_v25   ;;  %1550 = vperm.xlu0 %4952, %v1542_v43   ;;  %v707_v25 = vld [vmem:[%s7210_s15] sm:$0xff] }
 0x21c   :  { %v596_v33 = vpop.permute.xlu0 %595  ;;  %v592_v49 = vpop.permute.xlu1 %591 }
 0x21d   :  { %v599_v31 = vsel %vm230_vm2, %v592_v49, %v596_v33  ;;  %v601_v17 = vsel %vm230_vm2, %v596_v33, %v592_v49 }
 0x21e   :  { %v604_v36 = vmul.f32 %v599_v31, %v5328_v3  ;;  %v603_v26 = vmul.f32 %v601_v17, %v5322_v0  ;;  %v708_v31 = vld [vmem:[%s7210_s15 + $0x8] sm:$0xff] }
 0x220   :  { %v580_v2 = vpop.permute.xlu0 %579  ;;  %v576_v44 = vpop.permute.xlu1 %575 }
 0x221   :  { %v583_v50 = vsel %vm205_vm3, %v576_v44, %v580_v2  ;;  %v585_v39 = vsel %vm205_vm3, %v580_v2, %v576_v44 }
 0x222   :  { %v588_v56 = vmul.f32 %v583_v50, %v5345_v9  ;;  %v587_v59 = vmul.f32 %v585_v39, %v5339_v7 }
 0x224   :  { %v612_v27 = vpop.permute.xlu0 %611  ;;  %v608_v35 = vpop.permute.xlu1 %607 }
 0x225   :  { %v615_v43 = vsel %vm255_vm4, %v608_v35, %v612_v27  ;;  %v617_v2 = vsel %vm255_vm4, %v612_v27, %v608_v35  ;;  %v4633_v35 = vld [vmem:[%s7210_s15 + $0x20] sm:$0xff] }
 0x226   :  { %v619_v27 = vmul.f32 %v617_v2, %v5361_v20 }
 0x228   :  { %v5666_v5 = vpop.permute.xlu0 %627  ;;  %v5668_v51 = vpop.permute.xlu1 %623 }
 0x22c   :  { %v5670_v13 = vpop.permute.xlu0 %647  ;;  %v5672_v32 = vpop.permute.xlu1 %643 }
 0x230   :  { %v5674_v47 = vpop.permute.xlu0 %663  ;;  %v5676_v62 = vpop.permute.xlu1 %659 }
 0x234   :  { %v594_v16 = vpop.permute.xlu1 %593  ;;  %v598_v40 = vpop.permute.xlu0 %597 }
 0x235   :  { %v602_v45 = vsel %vm230_vm2, %v598_v40, %v594_v16  ;;  %v600_v34 = vsel %vm230_vm2, %v594_v16, %v598_v40  ;;  %v620_v40 = vmul.f32 %v615_v43, %v5369_v42  ;;  %v4638_v43 = vld [vmem:[%s7210_s15 + $0x38] sm:$0xff] }
 0x236   :  { %v606_v53 = vmul.f32 %v600_v34, %v5328_v3  ;;  %v605_v12 = vmul.f32 %v602_v45, %v5322_v0  ;;  %v642_v45 = vmul.f32 %v5618_v18, %v5405_v24  ;;  %v631_v34 = vsel %vm280_vm5, %v5668_v51, %v5666_v5 }
 0x237   :  { %v633_v18 = vsel %vm280_vm5, %v5666_v5, %v5668_v51  ;;  %v4634_v5 = vld [vmem:[%s7210_s15 + $0x28] sm:$0xff] }
 0x238   :  { %v578_v23 = vpop.permute.xlu1 %577  ;;  %747 = vmatprep.subr.mxu1 %v606_v53  ;;  %v582_v28 = vpop.permute.xlu0 %581  ;;  %v635_v51 = vmul.f32 %v633_v18, %v5379_v8 }
 0x239   :  { %v584_v57 = vsel %vm205_vm3, %v578_v23, %v582_v28  ;;  %v586_v6 = vsel %vm205_vm3, %v582_v28, %v578_v23  ;;  %748 = vmatpush1.msra.mxu1 %v605_v12  ;;  %v641_v12 = vmul.f32 %v5616_v37, %v5402_v29  ;;  %v640_v23 = vmul.f32 %v5554_v19, %v5405_v24 }
 0x23a   :  { %v589_v52 = vmul.f32 %v586_v6, %v5339_v7  ;;  %v590_v60 = vmul.f32 %v584_v57, %v5345_v9  ;;  %749 = vmatprep.subr.mxu1 %v604_v36  ;;  %v639_v19 = vmul.f32 %v5552_v63, %v5402_v29  ;;  %v636_v57 = vmul.f32 %v631_v34, %v5384_v1  ;;  %v4645_v34 = vld [vmem:[%s7210_s15 + $0x50] sm:$0xff] }
 0x23b   :  { %750 = vmatpush1.msra.mxu1 %v603_v26  ;;  %v651_v6 = vsel %vm317_vm6, %v5672_v32, %v5670_v13 }
 0x23c   :  { %v610_v22 = vpop.permute.xlu1 %609  ;;  %4629 = vmatmul.mubr.msk.f32.vlgmr.msra.gmra.mxu1 %vm712_vm10, %v4627_v14  ;;  %830 = vmatprep.subr.mxu0 %v590_v60  ;;  %v614_v21 = vpop.permute.xlu0 %613  ;;  %v653_v14 = vsel %vm317_vm6, %v5670_v13, %v5672_v32  ;;  %v4637_v60 = vld [vmem:[%s7210_s15 + $0x30] sm:$0xff]  ;;  %v4641_v13 = vld [vmem:[%s7210_s15 + $0x40] sm:$0xff]  ;;  %v655_v32 = vmul.f32 %v651_v6, %v5418_v11 }
 0x23d   :  { %v616_v54 = vsel %vm255_vm4, %v610_v22, %v614_v21  ;;  %v618_v61 = vsel %vm255_vm4, %v614_v21, %v610_v22  ;;  %831 = vmatpush1.msra.mxu0 %v589_v52  ;;  %789 = vmatprep.mubr.f32.mxu1 %v7211_v10 }
 0x23e   :  { %v621_v33 = vmul.f32 %v618_v61, %v5361_v20  ;;  %v622_v49 = vmul.f32 %v616_v54, %v5369_v42  ;;  %832 = vmatprep.subr.mxu0 %v588_v56  ;;  %v656_v56 = vmul.f32 %v653_v14, %v5423_v30  ;;  %v667_v61 = vsel %vm342_vm7, %v5676_v62, %v5674_v47 }
 0x23f   :  { %833 = vmatpush1.msra.mxu0 %v587_v59 }
 0x240   :  { %v5723_v44 = vpop.permute.xlu1 %675  ;;  %4630 = vmatmul.mubr.msk.f32.gmra.mxu1 %vm712_vm10, %v4628_v38  ;;  %4631 = vmatmul.mubr.msk.f32.vlgmr.msra.gmra.mxu0 %vm712_vm10, %v707_v25  ;;  %v5727_v16 = vpop.permute.xlu0 %679 }
 0x241   :  { %916 = vmatprep.subr.mxu1 %v622_v49  ;;  %872 = vmatprep.mubr.f32.mxu0 %v7211_v10  ;;  %v683_v18 = vsel %vm367_vm8, %v5723_v44, %v5727_v16 }
 0x242   :  { %917 = vmatpush1.msra.mxu1 %v621_v33  ;;  %952 = vmatprep.mubr.f32.mxu1 %v7211_v10  ;;  %v669_v33 = vsel %vm342_vm7, %v5674_v47, %v5676_v62 }
 0x243   :  { %918 = vmatprep.subr.mxu1 %v620_v40  ;;  %v4642_v40 = vld [vmem:[%s7210_s15 + $0x48] sm:$0xff]  ;;  %v672_v62 = vmul.f32 %v669_v33, %v5444_v41  ;;  %v1535_v33 = vld [vmem:[%s7212_s8 + $0xd0] sm:$0xff] }
 0x244   :  { %919 = vmatpush1.msra.mxu1 %v619_v27  ;;  %v626_v17 = vpop.permute.xlu1 %625  ;;  %4632 = vmatmul.mubr.msk.f32.gmra.mxu0 %vm712_vm10, %v708_v31  ;;  %v630_v53 = vpop.permute.xlu0 %629  ;;  %v671_v31 = vmul.f32 %v667_v61, %v5441_v48  ;;  %v1537_v61 = vld [vmem:[%s7212_s8 + $0xe0] sm:$0xff] }
 0x245   :  { %4635 = vmatmul.mubr.msk.f32.vlgmr.msra.gmra.mxu1 %vm712_vm10, %v4633_v35  ;;  %v632_v28 = vsel %vm280_vm5, %v626_v17, %v630_v53  ;;  %v634_v36 = vsel %vm280_vm5, %v630_v53, %v626_v17  ;;  %1096 = vmatprep.subr.mxu1 %v642_v45  ;;  %v685_v17 = vsel %vm367_vm8, %v5727_v16, %v5723_v44 }
 0x246   :  { %v637_v50 = vmul.f32 %v634_v36, %v5379_v8  ;;  %v638_v37 = vmul.f32 %v632_v28, %v5384_v1  ;;  %1097 = vmatpush1.msra.mxu1 %v641_v12  ;;  %958 = vmatprep.mubr.f32.mxu1 %v7211_v10 }
 0x247   :  { %1098 = vmatprep.subr.mxu1 %v640_v23  ;;  %1042 = vmatprep.mubr.f32.mxu0 %v7211_v10  ;;  %v4649_v23 = vld [vmem:[%s7210_s15 + $0x60] sm:$0xff] }
 0x248   :  { %1099 = vmatpush1.msra.mxu1 %v639_v19  ;;  %v646_v26 = vpop.permute.xlu1 %645  ;;  %1006 = vmatprep.subr.mxu0 %v638_v37  ;;  %v650_v63 = vpop.permute.xlu0 %649 }
 0x249   :  { %4636 = vmatmul.mubr.msk.f32.gmra.mxu1 %vm712_vm10, %v4634_v5  ;;  %v652_v39 = vsel %vm317_vm6, %v646_v26, %v650_v63  ;;  %v654_v52 = vsel %vm317_vm6, %v650_v63, %v646_v26  ;;  %1007 = vmatpush1.msra.mxu0 %v637_v50  ;;  %v688_v50 = vmul.f32 %v685_v17, %v5460_v4  ;;  %v1514_v17 = vld [vmem:[%s7212_s8 + $0x28] sm:$0xff] }
 0x24a   :  { %v657_v22 = vmul.f32 %v652_v39, %v5418_v11  ;;  %v658_v21 = vmul.f32 %v654_v52, %v5423_v30  ;;  %1008 = vmatprep.subr.mxu0 %v636_v57  ;;  %1132 = vmatprep.mubr.f32.mxu1 %v7211_v10  ;;  %v687_v5 = vmul.f32 %v683_v18, %v5456_v46  ;;  %v4650_v57 = vld [vmem:[%s7210_s15 + $0x68] sm:$0xff]  ;;  %v1512_v18 = vld [vmem:[%s7212_s8 + $0x18] sm:$0xff] }
 0x24b   :  { %1009 = vmatpush1.msra.mxu0 %v635_v51  ;;  %v4646_v51 = vld [vmem:[%s7210_s15 + $0x58] sm:$0xff] }
 0x24c   :  { %v662_v59 = vpop.permute.xlu1 %661  ;;  %4639 = vmatmul.mubr.msk.f32.vlgmr.msra.gmra.mxu0 %vm712_vm10, %v4637_v60  ;;  %1186 = vmatprep.subr.mxu0 %v658_v21  ;;  %v666_v54 = vpop.permute.xlu0 %665  ;;  %v4653_v60 = vld [vmem:[%s7210_s15 + $0x70] sm:$0xff]  ;;  %v1540_v21 = vld [vmem:[%s7212_s8 + $0xf8] sm:$0xff] }
 0x24d   :  { %v668_v38 = vsel %vm342_vm7, %v662_v59, %v666_v54  ;;  %v670_v25 = vsel %vm342_vm7, %v666_v54, %v662_v59  ;;  %4643 = vmatmul.mubr.msk.f32.vlgmr.msra.gmra.mxu1 %vm712_vm10, %v4641_v13  ;;  %1187 = vmatpush1.msra.mxu0 %v657_v22  ;;  %v4657_v22 = vld [vmem:[%s7210_s15 + $0x80] sm:$0xff]  ;;  %v1524_v13 = vld [vmem:[%s7212_s8 + $0x78] sm:$0xff]  ;;  %v1538_v59 = vld [vmem:[%s7212_s8 + $0xe8] sm:$0xff] }
 0x24e   :  { %v673_v49 = vmul.f32 %v668_v38, %v5441_v48  ;;  %v674_v2 = vmul.f32 %v670_v25, %v5444_v41  ;;  %1188 = vmatprep.subr.mxu0 %v656_v56  ;;  %1048 = vmatprep.mubr.f32.mxu0 %v7211_v10  ;;  %v1523_v56 = vld [vmem:[%s7212_s8 + $0x70] sm:$0xff]  ;;  %v1522_v54 = vld [vmem:[%s7212_s8 + $0x68] sm:$0xff]  ;;  %v1521_v38 = vld [vmem:[%s7212_s8 + $0x60] sm:$0xff] }
 0x24f   :  { %1138 = vmatprep.mubr.f32.mxu1 %v7211_v10  ;;  %1189 = vmatpush1.msra.mxu0 %v655_v32  ;;  %v1539_v32 = vld [vmem:[%s7212_s8 + $0xf0] sm:$0xff]  ;;  %v1536_v25 = vld [vmem:[%s7212_s8 + $0xd8] sm:$0xff] }
 0x250   :  { %v678_v27 = vpop.permute.xlu1 %677  ;;  %4640 = vmatmul.mubr.msk.f32.gmra.mxu0 %vm712_vm10, %v4638_v43  ;;  %v682_v47 = vpop.permute.xlu0 %681  ;;  %1276 = vmatprep.subr.mxu1 %v674_v2  ;;  %v1520_v43 = vld [vmem:[%s7212_s8 + $0x58] sm:$0xff]  ;;  %v1534_v2 = vld [vmem:[%s7212_s8 + $0xc8] sm:$0xff] }
 0x251   :  { %v684_v35 = vsel %vm367_vm8, %v678_v27, %v682_v47  ;;  %v686_v45 = vsel %vm367_vm8, %v682_v47, %v678_v27  ;;  %4644 = vmatmul.mubr.msk.f32.gmra.mxu1 %vm712_vm10, %v4642_v40  ;;  %1222 = vmatprep.mubr.f32.mxu0 %v7211_v10  ;;  %v1518_v40 = vld [vmem:[%s7212_s8 + $0x48] sm:$0xff]  ;;  %v1517_v27 = vld [vmem:[%s7212_s8 + $0x40] sm:$0xff]  ;;  %v1532_v47 = vld [vmem:[%s7212_s8 + $0xb8] sm:$0xff] }
 0x252   :  { %v689_v53 = vmul.f32 %v684_v35, %v5456_v46  ;;  %v690_v12 = vmul.f32 %v686_v45, %v5460_v4  ;;  %1277 = vmatpush1.msra.mxu1 %v673_v49  ;;  %1312 = vmatprep.mubr.f32.mxu1 %v7211_v10  ;;  %v1519_v49 = vld [vmem:[%s7212_s8 + $0x50] sm:$0xff] }
 0x253   :  { %1278 = vmatprep.subr.mxu1 %v672_v62  ;;  %v1516_v62 = vld [vmem:[%s7212_s8 + $0x38] sm:$0xff]  ;;  %v1531_v35 = vld [vmem:[%s7212_s8 + $0xb0] sm:$0xff] }
 0x254   :  { %1279 = vmatpush1.msra.mxu1 %v671_v31  ;;  %v694_v28 = vpop.permute.xlu1 %693  ;;  %4647 = vmatmul.mubr.msk.f32.vlgmr.msra.gmra.mxu0 %vm712_vm10, %v4645_v34  ;;  %v698_v36 = vpop.permute.xlu0 %697  ;;  %v1533_v31 = vld [vmem:[%s7212_s8 + $0xc0] sm:$0xff]  ;;  %v1515_v45 = vld [vmem:[%s7212_s8 + $0x30] sm:$0xff]  ;;  %v1530_v34 = vld [vmem:[%s7212_s8 + $0xa8] sm:$0xff] }
 0x255   :  { %1366 = vmatprep.subr.mxu0 %v690_v12  ;;  %v700_v37 = vsel %vm392_vm9, %v694_v28, %v698_v36  ;;  %v702_v19 = vsel %vm392_vm9, %v698_v36, %v694_v28  ;;  %4651 = vmatmul.mubr.msk.f32.vlgmr.msra.gmra.mxu1 %vm712_vm10, %v4649_v23  ;;  %v1513_v12 = vld [vmem:[%s7212_s8 + $0x20] sm:$0xff]  ;;  %v1528_v23 = vld [vmem:[%s7212_s8 + $0x98] sm:$0xff]  ;;  %v1527_v28 = vld [vmem:[%s7212_s8 + $0x90] sm:$0xff] }
 0x256   :  { %v705_v44 = vmul.f32 %v5500_v15, %v700_v37  ;;  %v706_v16 = vmul.f32 %v5505_v55, %v702_v19  ;;  %1367 = vmatpush1.msra.mxu0 %v689_v53  ;;  %1228 = vmatprep.mubr.f32.mxu0 %v7211_v10  ;;  %v1529_v53 = vld [vmem:[%s7212_s8 + $0xa0] sm:$0xff]  ;;  %v1511_v36 = vld [vmem:[%s7212_s8 + $0x10] sm:$0xff]  ;;  %v1510_v37 = vld [vmem:[%s7212_s8 + $0x8] sm:$0xff] }
 0x257   :  { %1368 = vmatprep.subr.mxu0 %v688_v50  ;;  %1318 = vmatprep.mubr.f32.mxu1 %v7211_v10  ;;  %v1526_v50 = vld [vmem:[%s7212_s8 + $0x88] sm:$0xff]  ;;  %v1525_v19 = vld [vmem:[%s7212_s8 + $0x80] sm:$0xff] }
 0x258   :  { %1369 = vmatpush1.msra.mxu0 %v687_v5  ;;  %v692_v6 = vpop.permute.xlu1 %691  ;;  %v696_v26 = vpop.permute.xlu0 %695  ;;  %1456 = vmatprep.subr.mxu1 %v706_v16  ;;  %v1509_v5 = vld [vmem:[%s7212_s8] sm:$0xff] }
 0x259   :  { %4648 = vmatmul.mubr.msk.f32.gmra.mxu0 %vm712_vm10, %v4646_v51  ;;  %v699_v63 = vsel %vm392_vm9, %v692_v6, %v696_v26  ;;  %v701_v14 = vsel %vm392_vm9, %v696_v26, %v692_v6  ;;  %4652 = vmatmul.mubr.msk.f32.gmra.mxu1 %vm712_vm10, %v4650_v57 }
 0x25a   :  { %v703_v39 = vmul.f32 %v5500_v15, %v699_v63  ;;  %v704_v52 = vmul.f32 %v5505_v55, %v701_v14  ;;  %1457 = vmatpush1.msra.mxu1 %v705_v44  ;;  %1402 = vmatprep.mubr.f32.mxu0 %v7211_v10  ;;  %v4654_v15 = vld [vmem:[%s7210_s15 + $0x78] sm:$0xff]  ;;  %v4658_v55 = vld [vmem:[%s7210_s15 + $0x88] sm:$0xff]  ;;  %s7213_s15 = sld [smem:[#allocation18_spill]] }
 0x25b   :  { %1492 = vmatprep.mubr.f32.mxu1 %v7211_v10  ;;  %4733 = vmatprep.subr.mxu0 %v1540_v21 }
 0x25c   :  { %1458 = vmatprep.subr.mxu1 %v704_v52 }
 0x25d   :  { %4655 = vmatmul.mubr.msk.f32.vlgmr.msra.gmra.mxu0 %vm712_vm10, %v4653_v60  ;;  %1459 = vmatpush1.msra.mxu1 %v703_v39 }
 0x25e   :  { %4659 = vmatmul.mubr.msk.f32.vlgmr.msra.gmra.mxu1 %vm712_vm10, %v4657_v22  ;;  %1408 = vmatprep.mubr.f32.mxu0 %v7211_v10 }
 0x25f   :  { %1498 = vmatprep.mubr.f32.mxu1 %v7211_v10  ;;  %4734 = vmatpush3.msra.mxu0 %v1524_v13 }
 0x260   :  { %4735 = vmatprep.subr.mxu0 %v1539_v32  ;;  %v1645_v44 = vld [vmem:[%s7213_s15 + $0x78] sm:$0xff]  ;;  %v1644_v16 = vld [vmem:[%s7213_s15 + $0x70] sm:$0xff]  ;;  %v1643_v51 = vld [vmem:[%s7213_s15 + $0x68] sm:$0xff] }
 0x261   :  { %4656 = vmatmul.mubr.msk.f32.gmra.mxu0 %vm712_vm10, %v4654_v15  ;;  %1669 = vmatprep.subr.mxu1 %v1645_v44  ;;  %v1642_v57 = vld [vmem:[%s7213_s15 + $0x60] sm:$0xff]  ;;  %v1641_v6 = vld [vmem:[%s7213_s15 + $0x58] sm:$0xff]  ;;  %v1640_v26 = vld [vmem:[%s7213_s15 + $0x50] sm:$0xff] }
 0x262   :  { %4660 = vmatmul.mubr.msk.f32.gmra.mxu1 %vm712_vm10, %v4658_v55  ;;  %4736 = vmatpush3.msra.mxu0 %v1523_v56  ;;  %v1639_v63 = vld [vmem:[%s7213_s15 + $0x48] sm:$0xff] }
 0x263   :  { %1717 = vmatprep.mubr.f32.mxu1 %v7211_v10  ;;  %4737 = vmatprep.subr.mxu0 %v1538_v59 }
 0x264   :  { %4738 = vmatpush3.msra.mxu0 %v1522_v54  ;;  %1670 = vmatpush1.msra.mxu1 %v1644_v16 }
 0x265   :  { %4739 = vmatprep.subr.mxu0 %v1537_v61  ;;  %1671 = vmatprep.subr.mxu1 %v1643_v51 }
 0x266   :  { %4740 = vmatpush3.msra.mxu0 %v1521_v38  ;;  %1672 = vmatpush1.msra.mxu1 %v1642_v57 }
 0x267   :  { %4741 = vmatprep.subr.mxu0 %v1536_v25  ;;  %1673 = vmatprep.subr.mxu1 %v1641_v6 }
 0x268   :  { %4742 = vmatpush3.msra.mxu0 %v1520_v43  ;;  %1674 = vmatpush1.msra.mxu1 %v1640_v26 }
 0x269   :  { %4743 = vmatprep.subr.mxu0 %v1535_v33  ;;  %1675 = vmatprep.subr.mxu1 %v1639_v63 }
 0x26a   :  { %4744 = vmatpush3.msra.mxu0 %v1519_v49 }
 0x26b   :  { %4745 = vmatprep.subr.mxu0 %v1534_v2 }
 0x26c   :  { %4746 = vmatpush3.msra.mxu0 %v1518_v40 }
 0x26d   :  { %4747 = vmatprep.subr.mxu0 %v1533_v31 }
 0x26e   :  { %4748 = vmatpush3.msra.mxu0 %v1517_v27 }
 0x26f   :  { %4749 = vmatprep.subr.mxu0 %v1532_v47 }
 0x270   :  { %4750 = vmatpush3.msra.mxu0 %v1516_v62 }
 0x271   :  { %4751 = vmatprep.subr.mxu0 %v1531_v35 }
 0x272   :  { %4752 = vmatpush3.msra.mxu0 %v1515_v45 }
 0x273   :  { %4753 = vmatprep.subr.mxu0 %v1530_v34 }
 0x274   :  { %4754 = vmatpush3.msra.mxu0 %v1514_v17 }
 0x275   :  { %4755 = vmatprep.subr.mxu0 %v1529_v53 }
 0x276   :  { %4756 = vmatpush3.msra.mxu0 %v1513_v12 }
 0x277   :  { %4757 = vmatprep.subr.mxu0 %v1528_v23 }
 0x278   :  { %4758 = vmatpush3.msra.mxu0 %v1512_v18 }
 0x279   :  { %4759 = vmatprep.subr.mxu0 %v1527_v28 }
 0x27a   :  { %4760 = vmatpush3.msra.mxu0 %v1511_v36 }
 0x27b   :  { %4761 = vmatprep.subr.mxu0 %v1526_v50 }
 0x27c   :  { %4762 = vmatpush3.msra.mxu0 %v1510_v37 }
 0x27d   :  { %4763 = vmatprep.subr.mxu0 %v1525_v19 }
 0x27e   :  { %4764 = vmatpush3.msra.mxu0 %v1509_v5 }
 0x27f   :  { %4895 = vmatprep.subr.mxu0 %v7211_v10 }
 0x2fc   :  { %v785_v14 = vpop.f32.mrf.mxu1 }
 0x2fe   :  { %v787_v39 = vpop.f32.mrf.mxu1 }
 0x300   :  { %v791_v52 = vpop.f32.mrf.mxu1  ;;  %v868_v60 = vpop.f32.mrf.mxu0 }
 0x301   :  { %v869_v25 = vadd.f32 %v868_v60, %v785_v14 }
 0x302   :  { %v793_v22 = vpop.f32.mrf.mxu1  ;;  %v870_v15 = vpop.f32.mrf.mxu0 }
 0x303   :  { %v871_v33 = vadd.f32 %v870_v15, %v787_v39 }
 0x304   :  { %v874_v21 = vpop.f32.mrf.mxu0 }
 0x305   :  { %v954_v55 = vpop.f32.mrf.mxu1  ;;  %v875_v47 = vadd.f32 %v874_v21, %v791_v52 }
 0x306   :  { %v876_v56 = vpop.f32.mrf.mxu0  ;;  %v965_v2 = vadd.f32 %v954_v55, %v869_v25 }
 0x307   :  { %v956_v13 = vpop.f32.mrf.mxu1  ;;  %v877_v45 = vadd.f32 %v876_v56, %v793_v22 }
 0x308   :  { %v966_v31 = vadd.f32 %v956_v13, %v871_v33 }
 0x309   :  { %v960_v32 = vpop.f32.mrf.mxu1 }
 0x30a   :  { %v967_v53 = vadd.f32 %v960_v32, %v875_v47  ;;  %v1637_v47 = vld [vmem:[%s7213_s15 + $0x38] sm:$0xff] }
 0x30b   :  { %v962_v59 = vpop.f32.mrf.mxu1 }
 0x30c   :  { %v1044_v54 = vpop.f32.mrf.mxu0  ;;  %v968_v23 = vadd.f32 %v962_v59, %v877_v45  ;;  %v1634_v45 = vld [vmem:[%s7213_s15 + $0x20] sm:$0xff] }
 0x30d   :  { %v1134_v61 = vpop.f32.mrf.mxu1  ;;  %v1055_v62 = vadd.f32 %v1044_v54, %v965_v2 }
 0x30e   :  { %v1046_v38 = vpop.f32.mrf.mxu0 }
 0x30f   :  { %v1136_v43 = vpop.f32.mrf.mxu1  ;;  %v1056_v34 = vadd.f32 %v1046_v38, %v966_v31  ;;  %v1145_v28 = vadd.f32 %v1134_v61, %v1055_v62  ;;  %v1636_v62 = vld [vmem:[%s7213_s15 + $0x30] sm:$0xff] }
 0x310   :  { %v1050_v49 = vpop.f32.mrf.mxu0 }
 0x311   :  { %v1140_v40 = vpop.f32.mrf.mxu1  ;;  %v1057_v36 = vadd.f32 %v1050_v49, %v967_v53  ;;  %v1146_v37 = vadd.f32 %v1136_v43, %v1056_v34  ;;  %v1633_v34 = vld [vmem:[%s7213_s15 + $0x18] sm:$0xff]  ;;  %v1631_v53 = vld [vmem:[%s7213_s15 + $0x8] sm:$0xff] }
 0x312   :  { %v1052_v27 = vpop.f32.mrf.mxu0 }
 0x313   :  { %v1142_v35 = vpop.f32.mrf.mxu1  ;;  %v1058_v19 = vadd.f32 %v1052_v27, %v968_v23  ;;  %v1147_v57 = vadd.f32 %v1140_v40, %v1057_v36  ;;  %v1638_v27 = vld [vmem:[%s7213_s15 + $0x40] sm:$0xff]  ;;  %v1769_v23 = vld [vmem:[%s7214_s9 + $0xf8] sm:$0xff] }
 0x314   :  { %v1224_v17 = vpop.f32.mrf.mxu0  ;;  %1676 = vmatpush1.msra.mxu1 %v1638_v27  ;;  %v1741_v27 = vld [vmem:[%s7214_s9 + $0x18] sm:$0xff] }
 0x315   :  { %v1314_v12 = vpop.f32.mrf.mxu1  ;;  %v1235_v5 = vadd.f32 %v1224_v17, %v1145_v28  ;;  %v1148_v26 = vadd.f32 %v1142_v35, %v1058_v19  ;;  %1677 = vmatprep.subr.mxu1 %v1637_v47  ;;  %v1635_v35 = vld [vmem:[%s7213_s15 + $0x28] sm:$0xff]  ;;  %v1632_v17 = vld [vmem:[%s7213_s15 + $0x10] sm:$0xff] }
 0x316   :  { %v1226_v18 = vpop.f32.mrf.mxu0  ;;  %1678 = vmatpush1.msra.mxu1 %v1636_v62  ;;  %v1756_v47 = vld [vmem:[%s7214_s9 + $0x90] sm:$0xff] }
 0x317   :  { %v1316_v50 = vpop.f32.mrf.mxu1  ;;  %v1236_v51 = vadd.f32 %v1226_v18, %v1146_v37  ;;  %v1325_v14 = vadd.f32 %v1314_v12, %v1235_v5  ;;  %1679 = vmatprep.subr.mxu1 %v1635_v35  ;;  %v1630_v12 = vld [vmem:[%s7213_s15] sm:$0xff]  ;;  %v1740_v62 = vld [vmem:[%s7214_s9 + $0x10] sm:$0xff]  ;;  %v1755_v35 = vld [vmem:[%s7214_s9 + $0x88] sm:$0xff]  ;;  %s7224_s15 = smov 1  }
 0x318   :  { %1680 = vmatpush1.msra.mxu1 %v1634_v45  ;;  %v1739_v45 = vld [vmem:[%s7214_s9 + $0x8] sm:$0xff] }
 0x319   :  { %v1230_v44 = vpop.f32.mrf.mxu0  ;;  %v1320_v16 = vpop.f32.mrf.mxu1  ;;  %v1326_v60 = vadd.f32 %v1316_v50, %v1236_v51  ;;  %1681 = vmatprep.subr.mxu1 %v1633_v34  ;;  %v1753_v51 = vld [vmem:[%s7214_s9 + $0x78] sm:$0xff]  ;;  %v1754_v34 = vld [vmem:[%s7214_s9 + $0x80] sm:$0xff] }
 0x31a   :  { %v1237_v39 = vadd.f32 %v1230_v44, %v1147_v57  ;;  %1682 = vmatpush1.msra.mxu1 %v1632_v17  ;;  %v1546_v50 = vpop.permute.xlu1 %1545  ;;  %v1551_v57 = vpop.permute.xlu0 %1550  ;;  %v1738_v17 = vld [vmem:[%s7214_s9] sm:$0xff] }
 0x31b   :  { %v1232_v6 = vpop.f32.mrf.mxu0  ;;  %v1322_v63 = vpop.f32.mrf.mxu1  ;;  %1683 = vmatprep.subr.mxu1 %v1631_v53 }
 0x31c   :  { %v1238_v22 = vadd.f32 %v1232_v6, %v1148_v26  ;;  %v1327_v56 = vadd.f32 %v1320_v16, %v1237_v39  ;;  %1684 = vmatpush1.msra.mxu1 %v1630_v12  ;;  %v1768_v6 = vld [vmem:[%s7214_s9 + $0xf0] sm:$0xff]  ;;  %v1731_v12 = vld [vmem:[%s7215_s30 + $0x8] sm:$0xff] }
 0x31d   :  { %v1404_v52 = vpop.f32.mrf.mxu0  ;;  %4771 = vmatprep.subr.mxu1 %v1769_v23  ;;  %v1730_v23 = vld [vmem:[%s7215_s30] sm:$0xff] }
 0x31e   :  { %v1494_v15 = vpop.f32.mrf.mxu1  ;;  %v1415_v55 = vadd.f32 %v1404_v52, %v1325_v14  ;;  %v1328_v54 = vadd.f32 %v1322_v63, %v1238_v22  ;;  %v1752_v63 = vld [vmem:[%s7214_s9 + $0x70] sm:$0xff]  ;;  %v1767_v14 = vld [vmem:[%s7214_s9 + $0xe8] sm:$0xff]  ;;  %v1750_v22 = vld [vmem:[%s7214_s9 + $0x60] sm:$0xff] }
 0x31f   :  { %v1406_v21 = vpop.f32.mrf.mxu0  ;;  %v1751_v52 = vld [vmem:[%s7214_s9 + $0x68] sm:$0xff] }
 0x320   :  { %v1416_v13 = vadd.f32 %v1406_v21, %v1326_v60  ;;  %v1496_v32 = vpop.f32.mrf.mxu1  ;;  %v1505_v25 = vadd.f32 %v1494_v15, %v1415_v55  ;;  %v1766_v60 = vld [vmem:[%s7214_s9 + $0xe0] sm:$0xff]  ;;  %v1765_v15 = vld [vmem:[%s7214_s9 + $0xd8] sm:$0xff]  ;;  %v1764_v21 = vld [vmem:[%s7214_s9 + $0xd0] sm:$0xff] }
 0x321   :  { %v1410_v59 = vpop.f32.mrf.mxu0  ;;  %v1749_v55 = vld [vmem:[%s7214_s9 + $0x58] sm:$0xff] }
 0x322   :  { %v1506_v61 = vadd.f32 %v1496_v32, %v1416_v13  ;;  %v1500_v38 = vpop.f32.mrf.mxu1  ;;  %v1417_v43 = vadd.f32 %v1410_v59, %v1327_v56  ;;  %v1748_v13 = vld [vmem:[%s7214_s9 + $0x50] sm:$0xff]  ;;  %v1763_v32 = vld [vmem:[%s7214_s9 + $0xc8] sm:$0xff]  ;;  %v1762_v59 = vld [vmem:[%s7214_s9 + $0xc0] sm:$0xff] }
 0x323   :  { %v1412_v33 = vpop.f32.mrf.mxu0  ;;  %v1747_v56 = vld [vmem:[%s7214_s9 + $0x48] sm:$0xff] }
 0x324   :  { %v1418_v49 = vadd.f32 %v1412_v33, %v1328_v54  ;;  %1617 = vmatprep.mubr.f32.mxu0 %v1506_v61  ;;  %v1502_v2 = vpop.f32.mrf.mxu1  ;;  %v1507_v31 = vadd.f32 %v1500_v38, %v1417_v43  ;;  %v1746_v54 = vld [vmem:[%s7214_s9 + $0x40] sm:$0xff]  ;;  %v1761_v61 = vld [vmem:[%s7214_s9 + $0xb8] sm:$0xff]  ;;  %v1744_v43 = vld [vmem:[%s7214_s9 + $0x30] sm:$0xff] }
 0x325   :  { %1618 = vmatmul.mubr.f32.vlgmr.msra.gmra.mxu0 %v1505_v25  ;;  %v1745_v38 = vld [vmem:[%s7214_s9 + $0x38] sm:$0xff]  ;;  %v1760_v25 = vld [vmem:[%s7214_s9 + $0xb0] sm:$0xff]  ;;  %v1759_v33 = vld [vmem:[%s7214_s9 + $0xa8] sm:$0xff] }
 0x326   :  { %v1508_v40 = vadd.f32 %v1502_v2, %v1418_v49  ;;  %v1743_v49 = vld [vmem:[%s7214_s9 + $0x28] sm:$0xff]  ;;  %v1758_v2 = vld [vmem:[%s7214_s9 + $0xa0] sm:$0xff] }
 0x328   :  { %1622 = vmatprep.mubr.f32.mxu0 %v1508_v40  ;;  %v1742_v40 = vld [vmem:[%s7214_s9 + $0x20] sm:$0xff] }
 0x329   :  { %1623 = vmatmul.mubr.f32.gmra.mxu0 %v1507_v31  ;;  %v1757_v31 = vld [vmem:[%s7214_s9 + $0x98] sm:$0xff] }
 0x32a   :  { %4899 = vmatprep.mubr.msk.f32.mxu0 %vm4980_vm12, %v7211_v10 }
 0x3e5   :  { %v4765_v18 = vpop.f32.mrf.mxu0 }
 0x3e7   :  { %v4766_v28 = vpop.f32.mrf.mxu0 }
 0x3e8   :  { %v4767_v36 = vadd.f32 %v4766_v28, %v4765_v18 }
 0x3e9   :  { %v4768_v37 = vpop.f32.mrf.mxu0 }
 0x3ea   :  { %v1620_v19 = vadd.f32 %v4767_v36, %v1546_v50 }
 0x3eb   :  { %v4769_v5 = vpop.f32.mrf.mxu0 }
 0x3ec   :  { %v1628_v44 = vmax.f32 %v1620_v19, 0.0  ;;  %v4770_v16 = vadd.f32 %v4769_v5, %v4768_v37  ;;  %v1733_v37 = vld [vmem:[%s7215_s30 + $0x18] sm:$0xff]  ;;  %v1732_v19 = vld [vmem:[%s7215_s30 + $0x10] sm:$0xff]  ;;  %s7217_s30 = sld [smem:[#allocation22_spill]] }
 0x3ee   :  { %v1625_v26 = vadd.f32 %v4770_v16, %v1551_v57  ;;  %4661 = vmatmul.mubr.msk.f32.vlgmr.msra.gmra.mxu1 %vm1646_vm11, %v1628_v44 }
 0x3ef   :  { %1723 = vmatprep.mubr.f32.mxu1 %v7211_v10  ;;  %4772 = vmatpush3.msra.mxu1 %v1753_v51 }
 0x3f0   :  { %v1629_v39 = vmax.f32 %v1625_v26, 0.0  ;;  %4773 = vmatprep.subr.mxu1 %v1768_v6 }
 0x3f1   :  { %4774 = vmatpush3.msra.mxu1 %v1752_v63 }
 0x3f2   :  { %4662 = vmatmul.mubr.msk.f32.gmra.mxu1 %vm1646_vm11, %v1629_v39  ;;  %4775 = vmatprep.subr.mxu1 %v1767_v14  ;;  %v1845_v39 = vld [vmem:[%s7216_s4] sm:$0x3] }
 0x3f3   :  { %4776 = vmatpush3.msra.mxu1 %v1751_v52  ;;  %v1930_v52 = vld [vmem:[%s7217_s30 + $0x18] sm:$0xff] }
 0x3f4   :  { %4777 = vmatprep.subr.mxu1 %v1766_v60  ;;  %v1929_v60 = vld [vmem:[%s7217_s30 + $0x10] sm:$0xff] }
 0x3f5   :  { %4778 = vmatpush3.msra.mxu1 %v1750_v22  ;;  %v1928_v22 = vld [vmem:[%s7217_s30 + $0x8] sm:$0xff] }
 0x3f6   :  { %4779 = vmatprep.subr.mxu1 %v1765_v15  ;;  %v1927_v15 = vld [vmem:[%s7217_s30] sm:$0xff] }
 0x3f7   :  { %4780 = vmatpush3.msra.mxu1 %v1749_v55  ;;  %v4663_v55 = vld [vmem:[%s7128_s14] ss:$0 sm:$0xff] }
 0x3f8   :  { %4781 = vmatprep.subr.mxu1 %v1764_v21 }
 0x3f9   :  { %4782 = vmatpush3.msra.mxu1 %v1748_v13 }
 0x3fa   :  { %4783 = vmatprep.subr.mxu1 %v1763_v32 }
 0x3fb   :  { %4784 = vmatpush3.msra.mxu1 %v1747_v56 }
 0x3fc   :  { %4785 = vmatprep.subr.mxu1 %v1762_v59  ;;  %v4665_v59 = vld [vmem:[%s7129_s16] ss:$0 sm:$0xff]  ;;  %s7223_s16 = smov 15  }
 0x3fd   :  { %4786 = vmatpush3.msra.mxu1 %v1746_v54 }
 0x3fe   :  { %4787 = vmatprep.subr.mxu1 %v1761_v61 }
 0x3ff   :  { %4788 = vmatpush3.msra.mxu1 %v1745_v38 }
 0x400   :  { %4789 = vmatprep.subr.mxu1 %v1760_v25 }
 0x401   :  { %4790 = vmatpush3.msra.mxu1 %v1744_v43 }
 0x402   :  { %4791 = vmatprep.subr.mxu1 %v1759_v33  ;;  %v2030_v33 = vld [vmem:[%s7130_s17] sm:$0xff]  ;;  %s4981_s17 = smov 120  }
 0x403   :  { %4792 = vmatpush3.msra.mxu1 %v1743_v49  ;;  %v2125_v49 = vld [vmem:[%s7131_s19 + $0x68] sm:$0xff] }
 0x404   :  { %4793 = vmatprep.subr.mxu1 %v1758_v2  ;;  %v2127_v2 = vld [vmem:[%s7131_s19 + $0x78] sm:$0xff] }
 0x405   :  { %4794 = vmatpush3.msra.mxu1 %v1742_v40  ;;  %v2124_v40 = vld [vmem:[%s7131_s19 + $0x60] sm:$0xff] }
 0x406   :  { %4795 = vmatprep.subr.mxu1 %v1757_v31  ;;  %v2121_v31 = vld [vmem:[%s7131_s19 + $0x48] sm:$0xff] }
 0x407   :  { %4796 = vmatpush3.msra.mxu1 %v1741_v27 }
 0x408   :  { %4797 = vmatprep.subr.mxu1 %v1756_v47  ;;  %v2012_v47 = vld [vmem:[%s7132_s1] sm:$0x3] }
 0x409   :  { %4798 = vmatpush3.msra.mxu1 %v1740_v62 }
 0x40a   :  { %4799 = vmatprep.subr.mxu1 %v1755_v35 }
 0x40b   :  { %4800 = vmatpush3.msra.mxu1 %v1739_v45 }
 0x40c   :  { %4801 = vmatprep.subr.mxu1 %v1754_v34  ;;  %v2126_v34 = vld [vmem:[%s7131_s19 + $0x70] sm:$0xff] }
 0x40d   :  { %4802 = vmatpush3.msra.mxu1 %v1738_v17  ;;  %v2123_v17 = vld [vmem:[%s7131_s19 + $0x58] sm:$0xff] }
 0x40e   :  { %2177 = vmatprep.subr.mxu1 %v2125_v49 }
 0x4ae   :  { %v1719_v53 = vpop.f32.mrf.mxu1 }
 0x4af   :  { %v1734_v36 = vmul.f32 %v1730_v23, %v1719_v53  ;;  %v2120_v53 = vld [vmem:[%s7131_s19 + $0x40] sm:$0xff]  ;;  %v2117_v23 = vld [vmem:[%s7131_s19 + $0x28] sm:$0xff] }
 0x4b0   :  { %v1721_v18 = vpop.f32.mrf.mxu1 }
 0x4b1   :  { %v1735_v28 = vmul.f32 %v1731_v12, %v1721_v18  ;;  %v2122_v12 = vld [vmem:[%s7131_s19 + $0x50] sm:$0xff]  ;;  %v2119_v18 = vld [vmem:[%s7131_s19 + $0x38] sm:$0xff] }
 0x4b2   :  { %v1725_v50 = vpop.f32.mrf.mxu1 }
 0x4b3   :  { %1834 = vmatprep.mubr.f32.mxu1 %v1735_v28  ;;  %v1736_v16 = vmul.f32 %v1732_v19, %v1725_v50  ;;  %v2116_v28 = vld [vmem:[%s7131_s19 + $0x20] sm:$0xff]  ;;  %v2113_v50 = vld [vmem:[%s7131_s19 + $0x8] sm:$0xff] }
 0x4b4   :  { %v1727_v5 = vpop.f32.mrf.mxu1  ;;  %1835 = vmatmul.mubr.f32.vlgmr.msra.gmra.mxu1 %v1734_v36  ;;  %v2118_v36 = vld [vmem:[%s7131_s19 + $0x30] sm:$0xff]  ;;  %v2112_v19 = vld [vmem:[%s7131_s19] sm:$0xff] }
 0x4b5   :  { %v1737_v44 = vmul.f32 %v1733_v37, %v1727_v5  ;;  %2178 = vmatpush1.msra.mxu1 %v2124_v40  ;;  %v2115_v37 = vld [vmem:[%s7131_s19 + $0x18] sm:$0xff]  ;;  %v2114_v5 = vld [vmem:[%s7131_s19 + $0x10] sm:$0xff]  ;;  %v2299_v40 = vld [vmem:[%s7194_s2] sm:$0xff]  ;;  %s7225_s19 = smov 127  }
 0x4b6   :  { %2179 = vmatprep.subr.mxu1 %v2121_v31  ;;  %v2520_v31 = vld [vmem:[%s7135_s22 + $0xf8] sm:$0xff] }
 0x4b7   :  { %1839 = vmatprep.mubr.f32.mxu1 %v1737_v44  ;;  %2180 = vmatpush1.msra.mxu1 %v2120_v53  ;;  %v4667_v44 = vld [vmem:[%s7133_s18] ss:$0 sm:$0xff]  ;;  %v2503_v53 = vld [vmem:[%s7135_s22 + $0x70] sm:$0xff]  ;;  %s7227_s18 = smov 112  }
 0x4b8   :  { %1840 = vmatmul.mubr.f32.gmra.mxu1 %v1736_v16  ;;  %2181 = vmatprep.subr.mxu1 %v2117_v23  ;;  %v2518_v23 = vld [vmem:[%s7135_s22 + $0xe8] sm:$0xff] }
 0x4b9   :  { %2217 = vmatprep.mubr.f32.mxu1 %v7211_v10  ;;  %2182 = vmatpush1.msra.mxu1 %v2116_v28  ;;  %v2502_v28 = vld [vmem:[%s7135_s22 + $0x68] sm:$0xff] }
 0x4ba   :  { %2183 = vmatprep.subr.mxu1 %v2113_v50  ;;  %v2517_v50 = vld [vmem:[%s7135_s22 + $0xe0] sm:$0xff] }
 0x4bb   :  { %2184 = vmatpush1.msra.mxu1 %v2112_v19  ;;  %v2501_v19 = vld [vmem:[%s7135_s22 + $0x60] sm:$0xff] }
 0x574   :  { %v4803_v51 = vpop.f32.mrf.mxu1 }
 0x576   :  { %v4804_v57 = vpop.f32.mrf.mxu1 }
 0x577   :  { %v4805_v14 = vadd.f32 %v4804_v57, %v4803_v51 }
 0x578   :  { %v4806_v6 = vpop.f32.mrf.mxu1 }
 0x57a   :  { %v4807_v26 = vpop.f32.mrf.mxu1 }
 0x57b   :  { %v4808_v63 = vadd.f32 %v4807_v26, %v4806_v6  ;;  %v2128_v26 = vld [vmem:[%s7134_s20] sm:$0xf] }
 0x57d   :  { %4896 = vmatpush3.msra.mxu0 %v4808_v63  ;;  %v7218_v63 = vld [vmem:[#allocation7_spill] sm:$0xff] }
 0x57e   :  { %4897 = vmatprep.subr.mxu0 %v7211_v10 }
 0x57f   :  { %4898 = vmatpush3.msra.mxu0 %v4805_v14  ;;  %v2133_v14 = vrot.slane %v2128_v26, %v7218_v63  ;;  %v2499_v63 = vld [vmem:[%s7135_s22 + $0x50] sm:$0xff] }
 0x580   :  { %4900 = vmatmul.mubr.msk.f32.vlgmr.msra.gmra.mxu0 %vm712_vm10, %v1845_v39  ;;  %4902 = vmatprep.subr.mxu0 %v7211_v10  ;;  %v7219_v39 = vld [vmem:[#allocation8_spill] sm:$0xff] }
 0x581   :  { %4903 = vmatpush3.msra.mxu0 %v1930_v52  ;;  %4910 = vmatprep.mubr.msk.f32.mxu0 %vm4980_vm12, %v7211_v10  ;;  %v2141_v52 = vrot.slane %v2128_v26, %v7219_v39  ;;  %v2514_v39 = vld [vmem:[%s7135_s22 + $0xc8] sm:$0xff] }
 0x582   :  { %4904 = vmatprep.subr.mxu0 %v7211_v10 }
 0x583   :  { %4905 = vmatpush3.msra.mxu0 %v1929_v60  ;;  %v7220_v60 = vld [vmem:[#allocation6_spill] sm:$0xff] }
 0x584   :  { %4906 = vmatprep.subr.mxu0 %v7211_v10 }
 0x585   :  { %4907 = vmatpush3.msra.mxu0 %v1928_v22  ;;  %v2137_v22 = vrot.slane %v2128_v26, %v7220_v60  ;;  %v2498_v60 = vld [vmem:[%s7135_s22 + $0x48] sm:$0xff] }
 0x586   :  { %4908 = vmatprep.subr.mxu0 %v7211_v10 }
 0x587   :  { %4909 = vmatpush3.msra.mxu0 %v1927_v15  ;;  %v7221_v15 = vld [vmem:[#allocation9_spill] sm:$0xff] }
 0x588   :  { %4913 = vmatprep.subr.mxu0 %v7211_v10 }
 0x640   :  { %v1922_v21 = vpop.f32.mrf.mxu0 }
 0x641   :  { %v1923_v13 = vadd.f32 %v4663_v55, %v1922_v21  ;;  %v2145_v55 = vrot.slane %v2128_v26, %v7221_v15  ;;  %v2547_v26 = vld [vmem:[%s7135_s22 + $0x1d0] sm:$0xff]  ;;  %v2513_v15 = vld [vmem:[%s7135_s22 + $0xc0] sm:$0xff] }
 0x642   :  { %v4901_v32 = vpop.f32.mrf.mxu0 }
 0x643   :  { %v1926_v56 = vmax.f32 %v1923_v13, 0.0 }
 0x645   :  { %4911 = vmatmul.mubr.msk.f32.vlgmr.msra.gmra.mxu0 %vm1938_vm13, %v1926_v56 }
 0x646   :  { %4915 = vmatprep.mubr.msk.f32.mxu0 %vm4980_vm12, %v7211_v10  ;;  %4914 = vmatpush3.msra.mxu0 %v2030_v33 }
 0x647   :  { %2248 = vmatprep.subr.mxu0 %v2127_v2 }
 0x705   :  { %v2008_v54 = vpop.f32.mrf.mxu0 }
 0x706   :  { %v6183_v61 = vadd.f32 %v4665_v59, %v2008_v54 }
 0x707   :  { %v4912_v38 = vpop.f32.mrf.mxu0 }
 0x708   :  { %v2013_v25 = vmul.f32 0.5, %v6183_v61 }
 0x70a   :  { %v2014_v43 = vmul.f32 1.442695, %v2013_v25 }
 0x70c   :  { %4954 = vpow2.f32 %v2014_v43 }
 0x719   :  { %v4955_v27 = vpop.eup %4954 }
 0x71a   :  { %2017 = vrot.lane.b32.xlu1 %v4955_v27, %s4981_s17  ;;  %v2552_v27 = vld [vmem:[%s7135_s22 + $0x1f8] sm:$0xff] }
 0x78c   :  { %v2018_v62 = vpop.permute.xlu1 %2017 }
 0x78d   :  { %v2020_v35 = vmul.f32 %v2018_v62, %v2012_v47  ;;  %v2504_v47 = vld [vmem:[%s7135_s22 + $0x78] sm:$0xff] }
 0x78e   :  { %v2536_v62 = vld [vmem:[%s7135_s22 + $0x178] sm:$0xff] }
 0x78f   :  { %v6205_v45 = vadd.f32 %v2020_v35, %v6183_v61  ;;  %v2300_v35 = vld [vmem:[%s7194_s2 + $0x8] sm:$0xff]  ;;  %s7228_s2 = smov 111  }
 0x791   :  { %4916 = vmatmul.mubr.msk.f32.vlgmr.msra.gmra.mxu0 %vm2026_vm14, %v6205_v45 }
 0x792   :  { %2249 = vmatpush1.msra.mxu0 %v2126_v34  ;;  %2288 = vmatprep.mubr.f32.mxu0 %v7211_v10  ;;  %v2519_v34 = vld [vmem:[%s7135_s22 + $0xf0] sm:$0xff] }
 0x793   :  { %2250 = vmatprep.subr.mxu0 %v2123_v17  ;;  %v2551_v17 = vld [vmem:[%s7135_s22 + $0x1f0] sm:$0xff] }
 0x794   :  { %2251 = vmatpush1.msra.mxu0 %v2122_v12  ;;  %v2535_v12 = vld [vmem:[%s7135_s22 + $0x170] sm:$0xff] }
 0x795   :  { %2252 = vmatprep.subr.mxu0 %v2119_v18  ;;  %v2550_v18 = vld [vmem:[%s7135_s22 + $0x1e8] sm:$0xff] }
 0x796   :  { %2253 = vmatpush1.msra.mxu0 %v2118_v36  ;;  %v2534_v36 = vld [vmem:[%s7135_s22 + $0x168] sm:$0xff] }
 0x797   :  { %2254 = vmatprep.subr.mxu0 %v2115_v37  ;;  %v2549_v37 = vld [vmem:[%s7135_s22 + $0x1e0] sm:$0xff] }
 0x798   :  { %2255 = vmatpush1.msra.mxu0 %v2114_v5  ;;  %v2533_v5 = vld [vmem:[%s7135_s22 + $0x160] sm:$0xff] }
 0x851   :  { %v2107_v16 = vpop.f32.mrf.mxu0 }
 0x852   :  { %v2108_v51 = vadd.f32 %v4667_v44, %v2107_v16  ;;  %v2516_v44 = vld [vmem:[%s7135_s22 + $0xd8] sm:$0xff] }
 0x853   :  { %v4917_v57 = vpop.f32.mrf.mxu0  ;;  %v2548_v16 = vld [vmem:[%s7135_s22 + $0x1d8] sm:$0xff] }
 0x854   :  { %v2111_v6 = vmax.f32 %v2108_v51, 0.0  ;;  %v2500_v51 = vld [vmem:[%s7135_s22 + $0x58] sm:$0xff] }
 0x855   :  { %v2532_v57 = vld [vmem:[%s7135_s22 + $0x158] sm:$0xff] }
 0x856   :  { %4669 = vmatmul.mubr.msk.f32.vlgmr.msra.gmra.mxu1 %vm1938_vm13, %v2111_v6  ;;  %4670 = vmatmul.mubr.msk.f32.vlgmr.msra.gmra.mxu0 %vm1938_vm13, %v2111_v6  ;;  %v2515_v6 = vld [vmem:[%s7135_s22 + $0xd0] sm:$0xff] }
 0x857   :  { %2383 = vmatprep.mubr.f32.mxu1 %v7211_v10  ;;  %2460 = vmatprep.mubr.f32.mxu0 %v7211_v10 }
 0x916   :  { %v2219_v21 = vpop.f32.mrf.mxu1  ;;  %v2290_v13 = vpop.f32.mrf.mxu0 }
 0x917   :  { %v2220_v32 = vadd.f32 %v2219_v21, %v2133_v14  ;;  %v2291_v56 = vadd.f32 %v2290_v13, %v2141_v52  ;;  %v2531_v14 = vld [vmem:[%s7135_s22 + $0x150] sm:$0xff]  ;;  %v2546_v52 = vld [vmem:[%s7135_s22 + $0x1c8] sm:$0xff]  ;;  %v2497_v21 = vld [vmem:[%s7135_s22 + $0x40] sm:$0xff] }
 0x918   :  { %v2221_v59 = vpop.f32.mrf.mxu1  ;;  %v2292_v54 = vpop.f32.mrf.mxu0  ;;  %v2529_v13 = vld [vmem:[%s7135_s22 + $0x140] sm:$0xff] }
 0x919   :  { %v2222_v38 = vadd.f32 %v2221_v59, %v2137_v22  ;;  %v2293_v25 = vadd.f32 %v2292_v54, %v2145_v55  ;;  %v2295_v49 = vmax.f32 %v2220_v32, 0.0  ;;  %v2297_v2 = vmax.f32 %v2291_v56, 0.0  ;;  %v2530_v22 = vld [vmem:[%s7135_s22 + $0x148] sm:$0xff]  ;;  %v2545_v55 = vld [vmem:[%s7135_s22 + $0x1c0] sm:$0xff]  ;;  %v2512_v32 = vld [vmem:[%s7135_s22 + $0xb8] sm:$0xff] }
 0x91a   :  { %v2544_v56 = vld [vmem:[%s7135_s22 + $0x1b8] sm:$0xff] }
 0x91b   :  { %v2296_v43 = vmax.f32 %v2222_v38, 0.0  ;;  %v2298_v33 = vmax.f32 %v2293_v25, 0.0  ;;  %v2496_v59 = vld [vmem:[%s7135_s22 + $0x38] sm:$0xff]  ;;  %v2511_v38 = vld [vmem:[%s7135_s22 + $0xb0] sm:$0xff] }
 0x91c   :  { %v2528_v54 = vld [vmem:[%s7135_s22 + $0x138] sm:$0xff]  ;;  %v2543_v25 = vld [vmem:[%s7135_s22 + $0x1b0] sm:$0xff] }
 0x91d   :  { %4671 = vmatprep.subr.msk.mxu1 %vm111_vm0, %v2296_v43  ;;  %4675 = vmatprep.subr.msk.mxu0 %vm111_vm0, %v2298_v33  ;;  %v2495_v43 = vld [vmem:[%s7135_s22 + $0x30] sm:$0xff] }
 0x91e   :  { %4672 = vmatpush1.msk.msra.mxu1 %vm111_vm0, %v2295_v49  ;;  %4676 = vmatpush1.msk.msra.mxu0 %vm111_vm0, %v2297_v2  ;;  %v2527_v33 = vld [vmem:[%s7135_s22 + $0x130] sm:$0xff]  ;;  %v2510_v49 = vld [vmem:[%s7135_s22 + $0xa8] sm:$0xff] }
 0x91f   :  { %4673 = vmatmul.mubr.msk.f32.vlgmr.msra.gmra.mxu1 %vm104_vm1, %v2299_v40  ;;  %4677 = vmatmul.mubr.msk.f32.vlgmr.msra.gmra.mxu0 %vm104_vm1, %v2299_v40  ;;  %v2542_v2 = vld [vmem:[%s7135_s22 + $0x1a8] sm:$0xff] }
 0x920   :  { %2389 = vmatprep.mubr.f32.mxu1 %v7211_v10  ;;  %2466 = vmatprep.mubr.f32.mxu0 %v7211_v10  ;;  %v2494_v40 = vld [vmem:[%s7135_s22 + $0x28] sm:$0xff] }
 0x921   :  { %4819 = vmatprep.subr.mxu1 %v2520_v31  ;;  %4857 = vmatprep.subr.mxu0 %v2552_v27  ;;  %v2526_v31 = vld [vmem:[%s7135_s22 + $0x128] sm:$0xff]  ;;  %v2509_v27 = vld [vmem:[%s7135_s22 + $0xa0] sm:$0xff] }
 0x922   :  { %4820 = vmatpush3.msra.mxu1 %v2504_v47  ;;  %4858 = vmatpush3.msra.mxu0 %v2536_v62  ;;  %v2541_v47 = vld [vmem:[%s7135_s22 + $0x1a0] sm:$0xff] }
 0x923   :  { %4674 = vmatmul.mubr.msk.f32.gmra.mxu1 %vm104_vm1, %v2300_v35  ;;  %4678 = vmatmul.mubr.msk.f32.gmra.mxu0 %vm104_vm1, %v2300_v35  ;;  %v2493_v62 = vld [vmem:[%s7135_s22 + $0x20] sm:$0xff] }
 0x924   :  { %4821 = vmatprep.subr.mxu1 %v2519_v34  ;;  %4859 = vmatprep.subr.mxu0 %v2551_v17  ;;  %v2525_v35 = vld [vmem:[%s7135_s22 + $0x120] sm:$0xff]  ;;  %v2508_v34 = vld [vmem:[%s7135_s22 + $0x98] sm:$0xff] }
 0x925   :  { %4822 = vmatpush3.msra.mxu1 %v2503_v53  ;;  %4860 = vmatpush3.msra.mxu0 %v2535_v12  ;;  %v2540_v17 = vld [vmem:[%s7135_s22 + $0x198] sm:$0xff] }
 0x926   :  { %4823 = vmatprep.subr.mxu1 %v2518_v23  ;;  %4861 = vmatprep.subr.mxu0 %v2550_v18  ;;  %v2492_v53 = vld [vmem:[%s7135_s22 + $0x18] sm:$0xff]  ;;  %v2507_v23 = vld [vmem:[%s7135_s22 + $0x90] sm:$0xff] }
 0x927   :  { %4824 = vmatpush3.msra.mxu1 %v2502_v28  ;;  %4862 = vmatpush3.msra.mxu0 %v2534_v36  ;;  %v2524_v12 = vld [vmem:[%s7135_s22 + $0x118] sm:$0xff]  ;;  %v2539_v18 = vld [vmem:[%s7135_s22 + $0x190] sm:$0xff] }
 0x928   :  { %4825 = vmatprep.subr.mxu1 %v2517_v50  ;;  %4863 = vmatprep.subr.mxu0 %v2549_v37  ;;  %v2491_v28 = vld [vmem:[%s7135_s22 + $0x10] sm:$0xff]  ;;  %v2506_v50 = vld [vmem:[%s7135_s22 + $0x88] sm:$0xff] }
 0x929   :  { %4826 = vmatpush3.msra.mxu1 %v2501_v19  ;;  %4864 = vmatpush3.msra.mxu0 %v2533_v5  ;;  %v2523_v36 = vld [vmem:[%s7135_s22 + $0x110] sm:$0xff]  ;;  %v2538_v37 = vld [vmem:[%s7135_s22 + $0x188] sm:$0xff] }
 0x92a   :  { %4827 = vmatprep.subr.mxu1 %v2516_v44  ;;  %4865 = vmatprep.subr.mxu0 %v2548_v16  ;;  %v2490_v19 = vld [vmem:[%s7135_s22 + $0x8] sm:$0xff]  ;;  %v2505_v44 = vld [vmem:[%s7135_s22 + $0x80] sm:$0xff] }
 0x92b   :  { %4828 = vmatpush3.msra.mxu1 %v2500_v51  ;;  %4866 = vmatpush3.msra.mxu0 %v2532_v57  ;;  %v2522_v5 = vld [vmem:[%s7135_s22 + $0x108] sm:$0xff]  ;;  %v2537_v16 = vld [vmem:[%s7135_s22 + $0x180] sm:$0xff] }
 0x92c   :  { %4829 = vmatprep.subr.mxu1 %v2515_v6  ;;  %4867 = vmatprep.subr.mxu0 %v2547_v26  ;;  %v2489_v51 = vld [vmem:[%s7135_s22] sm:$0xff]  ;;  %v2718_v6 = vld [vmem:[%s7136_s6 + $0x78] sm:$0xff] }
 0x92d   :  { %4830 = vmatpush3.msra.mxu1 %v2499_v63  ;;  %4868 = vmatpush3.msra.mxu0 %v2531_v14  ;;  %v2521_v57 = vld [vmem:[%s7135_s22 + $0x100] sm:$0xff]  ;;  %v2474_v14 = vld [vmem:[%s7137_s21 + $0x8] sm:$0xff]  ;;  %s7226_s22 = smov 113  }
 0x92e   :  { %4831 = vmatprep.subr.mxu1 %v2514_v39  ;;  %4869 = vmatprep.subr.mxu0 %v2546_v52  ;;  %v2476_v39 = vld [vmem:[%s7137_s21 + $0x18] sm:$0xff]  ;;  %v2473_v52 = vld [vmem:[%s7137_s21] sm:$0xff] }
 0x92f   :  { %4832 = vmatpush3.msra.mxu1 %v2498_v60  ;;  %4870 = vmatpush3.msra.mxu0 %v2530_v22  ;;  %v2475_v60 = vld [vmem:[%s7137_s21 + $0x10] sm:$0xff] }
 0x930   :  { %4833 = vmatprep.subr.mxu1 %v2513_v15  ;;  %4871 = vmatprep.subr.mxu0 %v2545_v55 }
 0x931   :  { %4834 = vmatpush3.msra.mxu1 %v2497_v21  ;;  %4872 = vmatpush3.msra.mxu0 %v2529_v13  ;;  %v2477_v13 = vld [vmem:[%s7137_s21 + $0x20] sm:$0xff] }
 0x932   :  { %4835 = vmatprep.subr.mxu1 %v2512_v32  ;;  %4873 = vmatprep.subr.mxu0 %v2544_v56  ;;  %v2479_v32 = vld [vmem:[%s7137_s21 + $0x30] sm:$0xff] }
 0x933   :  { %4836 = vmatpush3.msra.mxu1 %v2496_v59  ;;  %4874 = vmatpush3.msra.mxu0 %v2528_v54 }
 0x934   :  { %4837 = vmatprep.subr.mxu1 %v2511_v38  ;;  %4875 = vmatprep.subr.mxu0 %v2543_v25  ;;  %v2478_v25 = vld [vmem:[%s7137_s21 + $0x28] sm:$0xff] }
 0x935   :  { %4838 = vmatpush3.msra.mxu1 %v2495_v43  ;;  %4876 = vmatpush3.msra.mxu0 %v2527_v33  ;;  %v2480_v43 = vld [vmem:[%s7137_s21 + $0x38] sm:$0xff]  ;;  %v2717_v33 = vld [vmem:[%s7136_s6 + $0x70] sm:$0xff] }
 0x936   :  { %4839 = vmatprep.subr.mxu1 %v2510_v49  ;;  %4877 = vmatprep.subr.mxu0 %v2542_v2  ;;  %v2716_v49 = vld [vmem:[%s7136_s6 + $0x68] sm:$0xff] }
 0x937   :  { %4840 = vmatpush3.msra.mxu1 %v2494_v40  ;;  %4878 = vmatpush3.msra.mxu0 %v2526_v31 }
 0x938   :  { %4841 = vmatprep.subr.mxu1 %v2509_v27  ;;  %4879 = vmatprep.subr.mxu0 %v2541_v47 }
 0x939   :  { %4842 = vmatpush3.msra.mxu1 %v2493_v62  ;;  %4880 = vmatpush3.msra.mxu0 %v2525_v35  ;;  %v2715_v35 = vld [vmem:[%s7136_s6 + $0x60] sm:$0xff] }
 0x93a   :  { %4843 = vmatprep.subr.mxu1 %v2508_v34  ;;  %4881 = vmatprep.subr.mxu0 %v2540_v17  ;;  %v2714_v34 = vld [vmem:[%s7136_s6 + $0x58] sm:$0xff]  ;;  %v2713_v17 = vld [vmem:[%s7136_s6 + $0x50] sm:$0xff] }
 0x93b   :  { %4844 = vmatpush3.msra.mxu1 %v2492_v53  ;;  %4882 = vmatpush3.msra.mxu0 %v2524_v12  ;;  %v2712_v53 = vld [vmem:[%s7136_s6 + $0x48] sm:$0xff]  ;;  %v2711_v12 = vld [vmem:[%s7136_s6 + $0x40] sm:$0xff] }
 0x93c   :  { %4845 = vmatprep.subr.mxu1 %v2507_v23  ;;  %4883 = vmatprep.subr.mxu0 %v2539_v18  ;;  %v2710_v23 = vld [vmem:[%s7136_s6 + $0x38] sm:$0xff]  ;;  %v2709_v18 = vld [vmem:[%s7136_s6 + $0x30] sm:$0xff] }
 0x93d   :  { %4846 = vmatpush3.msra.mxu1 %v2491_v28  ;;  %4884 = vmatpush3.msra.mxu0 %v2523_v36  ;;  %v2708_v28 = vld [vmem:[%s7136_s6 + $0x28] sm:$0xff]  ;;  %v2707_v36 = vld [vmem:[%s7136_s6 + $0x20] sm:$0xff] }
 0x93e   :  { %4847 = vmatprep.subr.mxu1 %v2506_v50  ;;  %4885 = vmatprep.subr.mxu0 %v2538_v37  ;;  %v2706_v50 = vld [vmem:[%s7136_s6 + $0x18] sm:$0xff]  ;;  %v2705_v37 = vld [vmem:[%s7136_s6 + $0x10] sm:$0xff] }
 0x93f   :  { %4848 = vmatpush3.msra.mxu1 %v2490_v19  ;;  %4886 = vmatpush3.msra.mxu0 %v2522_v5  ;;  %v2704_v19 = vld [vmem:[%s7136_s6 + $0x8] sm:$0xff]  ;;  %v2703_v5 = vld [vmem:[%s7136_s6] sm:$0xff]  ;;  %s7222_s6 = smov 17  }
 0x940   :  { %4849 = vmatprep.subr.mxu1 %v2505_v44  ;;  %4887 = vmatprep.subr.mxu0 %v2537_v16 }
 0x941   :  { %4850 = vmatpush3.msra.mxu1 %v2489_v51  ;;  %4888 = vmatpush3.msra.mxu0 %v2521_v57 }
 0x942   :  { %2741 = vmatprep.subr.mxu1 %v2718_v6 }
 0x9df   :  { %v2385_v26 = vpop.f32.mrf.mxu1  ;;  %v2462_v63 = vpop.f32.mrf.mxu0 }
 0x9e0   :  { %v2481_v56 = vmul.f32 %v2473_v52, %v2385_v26  ;;  %v2483_v59 = vmul.f32 %v2475_v60, %v2462_v63 }
 0x9e1   :  { %v2387_v22 = vpop.f32.mrf.mxu1  ;;  %v2464_v15 = vpop.f32.mrf.mxu0 }
 0x9e2   :  { %v2482_v55 = vmul.f32 %v2474_v14, %v2387_v22  ;;  %v2484_v21 = vmul.f32 %v2476_v39, %v2464_v15 }
 0x9e3   :  { %v2391_v54 = vpop.f32.mrf.mxu1  ;;  %v2468_v38 = vpop.f32.mrf.mxu0 }
 0x9e4   :  { %2617 = vmatprep.mubr.f32.mxu1 %v2482_v55  ;;  %2692 = vmatprep.mubr.f32.mxu0 %v2484_v21  ;;  %v2485_v2 = vmul.f32 %v2477_v13, %v2391_v54  ;;  %v2487_v40 = vmul.f32 %v2479_v32, %v2468_v38  ;;  %v3735_v54 = vld [vmem:[%s7138_s24] sm:$0xff] }
 0x9e5   :  { %2618 = vmatmul.mubr.f32.vlgmr.msra.gmra.mxu1 %v2481_v56  ;;  %2693 = vmatmul.mubr.f32.vlgmr.msra.gmra.mxu0 %v2483_v59  ;;  %v2393_v31 = vpop.f32.mrf.mxu1  ;;  %v2470_v27 = vpop.f32.mrf.mxu0  ;;  %v3736_v59 = vld [vmem:[%s7138_s24 + $0x8] sm:$0xff] }
 0x9e6   :  { %v2486_v47 = vmul.f32 %v2478_v25, %v2393_v31  ;;  %v2488_v62 = vmul.f32 %v2480_v43, %v2470_v27  ;;  %2742 = vmatpush1.msra.mxu1 %v2717_v33 }
 0x9e7   :  { %2743 = vmatprep.subr.mxu1 %v2716_v49 }
 0x9e8   :  { %2622 = vmatprep.mubr.f32.mxu1 %v2486_v47  ;;  %2697 = vmatprep.mubr.f32.mxu0 %v2488_v62 }
 0x9e9   :  { %2623 = vmatmul.mubr.f32.gmra.mxu1 %v2485_v2  ;;  %2698 = vmatmul.mubr.f32.gmra.mxu0 %v2487_v40 }
 0x9ea   :  { %2744 = vmatpush1.msra.mxu1 %v2715_v35  ;;  %2789 = vmatprep.mubr.f32.mxu1 %v7211_v10 }
 0x9eb   :  { %2745 = vmatprep.subr.mxu1 %v2714_v34  ;;  %3009 = vmatprep.mubr.f32.mxu0 %v7211_v10 }
 0x9ec   :  { %2746 = vmatpush1.msra.mxu1 %v2713_v17 }
 0x9ed   :  { %2747 = vmatprep.subr.mxu1 %v2712_v53 }
 0x9ee   :  { %2748 = vmatpush1.msra.mxu1 %v2711_v12 }
 0x9ef   :  { %2749 = vmatprep.subr.mxu1 %v2710_v23 }
 0x9f0   :  { %2750 = vmatpush1.msra.mxu1 %v2709_v18 }
 0x9f1   :  { %2751 = vmatprep.subr.mxu1 %v2708_v28 }
 0x9f2   :  { %2752 = vmatpush1.msra.mxu1 %v2707_v36 }
 0x9f3   :  { %2753 = vmatprep.subr.mxu1 %v2706_v50 }
 0x9f4   :  { %2754 = vmatpush1.msra.mxu1 %v2705_v37 }
 0x9f5   :  { %2755 = vmatprep.subr.mxu1 %v2704_v19 }
 0x9f6   :  { %2756 = vmatpush1.msra.mxu1 %v2703_v5 }
 0xaa5   :  { %v4851_v44 = vpop.f32.mrf.mxu1  ;;  %v4889_v16 = vpop.f32.mrf.mxu0 }
 0xaa7   :  { %v4852_v51 = vpop.f32.mrf.mxu1  ;;  %v4890_v57 = vpop.f32.mrf.mxu0 }
 0xaa8   :  { %v4853_v6 = vadd.f32 %v4852_v51, %v4851_v44  ;;  %v4891_v26 = vadd.f32 %v4890_v57, %v4889_v16 }
 0xaa9   :  { %v4854_v63 = vpop.f32.mrf.mxu1  ;;  %v4892_v14 = vpop.f32.mrf.mxu0 }
 0xaaa   :  { %v2695_v39 = vadd.f32 %v4891_v26, %v4853_v6  ;;  %v4681_v6 = vld [vmem:[%s7139_s23 + $0x10] sm:$0xff] }
 0xaab   :  { %v4855_v52 = vpop.f32.mrf.mxu1  ;;  %v4893_v60 = vpop.f32.mrf.mxu0 }
 0xaac   :  { %4679 = vmatmul.mubr.msk.f32.vlgmr.msra.gmra.mxu1 %vm1646_vm11, %v2695_v39  ;;  %v4856_v22 = vadd.f32 %v4855_v52, %v4854_v63  ;;  %v4894_v15 = vadd.f32 %v4893_v60, %v4892_v14 }
 0xaad   :  { %2795 = vmatprep.mubr.f32.mxu1 %v7211_v10 }
 0xaae   :  { %v2700_v55 = vadd.f32 %v4894_v15, %v4856_v22 }
 0xab0   :  { %4680 = vmatmul.mubr.msk.f32.gmra.mxu1 %vm1646_vm11, %v2700_v55 }
 0xab1   :  { %3178 = vmatprep.mubr.f32.mxu1 %v7211_v10 }
 0xb6c   :  { %v6546_v21 = vpop.f32.mrf.mxu1 }
 0xb6d   :  { %2818 = vrot.lane.b32.xlu0 %v6546_v21, %s4975_s10 }
 0xb6e   :  { %v6550_v13 = vpop.f32.mrf.mxu1 }
 0xb6f   :  { %2822 = vrot.lane.b32.xlu1 %v6550_v13, %s4975_s10 }
 0xb70   :  { %v6572_v32 = vpop.f32.mrf.mxu1 }
 0xb71   :  { %2802 = vrot.lane.b32.xlu0 %v6546_v21, %s7222_s6 }
 0xb72   :  { %v6578_v56 = vpop.f32.mrf.mxu1 }
 0xb73   :  { %2806 = vrot.lane.b32.xlu1 %v6550_v13, %s7222_s6 }
 0xb75   :  { %2834 = vrot.lane.b32.xlu0 %v6546_v21, %s7223_s16 }
 0xb77   :  { %2838 = vrot.lane.b32.xlu1 %v6550_v13, %s7223_s16 }
 0xb79   :  { %2850 = vrot.lane.b32.xlu0 %v6546_v21, %s7224_s15 }
 0xb7b   :  { %2854 = vrot.lane.b32.xlu1 %v6550_v13, %s7224_s15 }
 0xb7d   :  { %2870 = vrot.lane.b32.xlu0 %v6546_v21, %s7225_s19 }
 0xb7f   :  { %2874 = vrot.lane.b32.xlu1 %v6550_v13, %s7225_s19 }
 0xb81   :  { %2886 = vrot.lane.b32.xlu0 %v6546_v21, %s7226_s22 }
 0xb83   :  { %2890 = vrot.lane.b32.xlu1 %v6550_v13, %s7226_s22 }
 0xb85   :  { %2820 = vrot.lane.b32.xlu0 %v6572_v32, %s4975_s10 }
 0xb87   :  { %2824 = vrot.lane.b32.xlu1 %v6578_v56, %s4975_s10 }
 0xb89   :  { %2804 = vrot.lane.b32.xlu0 %v6572_v32, %s7222_s6 }
 0xb8b   :  { %2808 = vrot.lane.b32.xlu1 %v6578_v56, %s7222_s6 }
 0xb8d   :  { %2836 = vrot.lane.b32.xlu0 %v6572_v32, %s7223_s16 }
 0xb8f   :  { %2840 = vrot.lane.b32.xlu1 %v6578_v56, %s7223_s16 }
 0xb91   :  { %2902 = vrot.lane.b32.xlu0 %v6546_v21, %s7227_s18 }
 0xb93   :  { %2906 = vrot.lane.b32.xlu1 %v6550_v13, %s7227_s18 }
 0xb95   :  { %2852 = vrot.lane.b32.xlu0 %v6572_v32, %s7224_s15 }
 0xb97   :  { %2856 = vrot.lane.b32.xlu1 %v6578_v56, %s7224_s15 }
 0xb99   :  { %2872 = vrot.lane.b32.xlu0 %v6572_v32, %s7225_s19 }
 0xb9b   :  { %2876 = vrot.lane.b32.xlu1 %v6578_v56, %s7225_s19 }
 0xb9d   :  { %2888 = vrot.lane.b32.xlu0 %v6572_v32, %s7226_s22 }
 0xb9f   :  { %2892 = vrot.lane.b32.xlu1 %v6578_v56, %s7226_s22 }
 0xba1   :  { %2904 = vrot.lane.b32.xlu0 %v6572_v32, %s7227_s18 }
 0xba3   :  { %2908 = vrot.lane.b32.xlu1 %v6578_v56, %s7227_s18 }
 0xba5   :  { %2920 = vrot.lane.b32.xlu0 %v6572_v32, %s7228_s2 }
 0xba7   :  { %2924 = vrot.lane.b32.xlu1 %v6578_v56, %s7228_s2 }
 0xba9   :  { %2918 = vrot.lane.b32.xlu0 %v6546_v21, %s7228_s2 }
 0xbab   :  { %2922 = vrot.lane.b32.xlu1 %v6550_v13, %s7228_s2 }
 0xbad   :  { %3744 = vperm.xlu0 %4952, %v3736_v59   ;;  %v4682_v59 = vld [vmem:[%s7139_s23 + $0x18] sm:$0xff] }
 0xbaf   :  { %3739 = vperm.xlu1 %4953, %v3735_v54  }
 0xbdf   :  { %v2819_v38 = vpop.permute.xlu0 %2818 }
 0xbe1   :  { %v2823_v25 = vpop.permute.xlu1 %2822 }
 0xbe2   :  { %v2826_v53 = vsel %vm230_vm2, %v2819_v38, %v2823_v25  ;;  %v2828_v12 = vsel %vm230_vm2, %v2823_v25, %v2819_v38 }
 0xbe3   :  { %v2803_v43 = vpop.permute.xlu0 %2802  ;;  %v2830_v37 = vmul.f32 %v2828_v12, %v5322_v0  ;;  %v2831_v19 = vmul.f32 %v2826_v53, %v5328_v3  ;;  %v2869_v53 = vmul.f32 %v6578_v56, %v5405_v24  ;;  %v4687_v12 = vld [vmem:[%s7139_s23 + $0x20] sm:$0xff] }
 0xbe5   :  { %v2807_v33 = vpop.permute.xlu1 %2806 }
 0xbe6   :  { %v2810_v44 = vsel %vm205_vm3, %v2803_v43, %v2807_v33  ;;  %v2812_v16 = vsel %vm205_vm3, %v2807_v33, %v2803_v43 }
 0xbe7   :  { %v2835_v49 = vpop.permute.xlu0 %2834  ;;  %v2814_v39 = vmul.f32 %v2812_v16, %v5339_v7  ;;  %v2815_v52 = vmul.f32 %v2810_v44, %v5345_v9  ;;  %v4688_v44 = vld [vmem:[%s7139_s23 + $0x28] sm:$0xff] }
 0xbe9   :  { %v2839_v2 = vpop.permute.xlu1 %2838 }
 0xbea   :  { %v2842_v22 = vsel %vm255_vm4, %v2835_v49, %v2839_v2  ;;  %v2844_v54 = vsel %vm255_vm4, %v2839_v2, %v2835_v49  ;;  %v2934_v49 = vld [vmem:[%s7139_s23] sm:$0xff] }
 0xbeb   :  { %v6624_v40 = vpop.permute.xlu0 %2850  ;;  %v2847_v33 = vmul.f32 %v2842_v22, %v5369_v42 }
 0xbed   :  { %v6626_v31 = vpop.permute.xlu1 %2854 }
 0xbee   :  { %v2858_v56 = vsel %vm280_vm5, %v6624_v40, %v6626_v31  ;;  %v2860_v16 = vsel %vm280_vm5, %v6626_v31, %v6624_v40 }
 0xbef   :  { %v6628_v27 = vpop.permute.xlu0 %2870 }
 0xbf1   :  { %v6630_v47 = vpop.permute.xlu1 %2874 }
 0xbf3   :  { %v6632_v62 = vpop.permute.xlu0 %2886 }
 0xbf5   :  { %v6634_v35 = vpop.permute.xlu1 %2890 }
 0xbf7   :  { %v2821_v34 = vpop.permute.xlu0 %2820 }
 0xbf9   :  { %v2825_v17 = vpop.permute.xlu1 %2824 }
 0xbfa   :  { %v2827_v23 = vsel %vm230_vm2, %v2821_v34, %v2825_v17  ;;  %v2829_v18 = vsel %vm230_vm2, %v2825_v17, %v2821_v34  ;;  %v2846_v17 = vmul.f32 %v2844_v54, %v5361_v20  ;;  %v2896_v54 = vsel %vm342_vm7, %v6634_v35, %v6632_v62 }
 0xbfb   :  { %v2832_v28 = vmul.f32 %v2829_v18, %v5322_v0  ;;  %v2833_v36 = vmul.f32 %v2827_v23, %v5328_v3  ;;  %v2805_v50 = vpop.permute.xlu0 %2804  ;;  %v2868_v18 = vmul.f32 %v6572_v32, %v5402_v29  ;;  %v2935_v32 = vld [vmem:[%s7139_s23 + $0x8] sm:$0xff] }
 0xbfd   :  { %2973 = vmatprep.subr.mxu0 %v2833_v36  ;;  %v2809_v5 = vpop.permute.xlu1 %2808 }
 0xbfe   :  { %v2811_v51 = vsel %vm205_vm3, %v2805_v50, %v2809_v5  ;;  %v2813_v57 = vsel %vm205_vm3, %v2809_v5, %v2805_v50  ;;  %2974 = vmatpush1.msra.mxu0 %v2832_v28  ;;  %v2867_v28 = vmul.f32 %v6550_v13, %v5405_v24  ;;  %v2866_v5 = vmul.f32 %v6546_v21, %v5402_v29 }
 0xbff   :  { %v2816_v26 = vmul.f32 %v2813_v57, %v5339_v7  ;;  %v2817_v63 = vmul.f32 %v2811_v51, %v5345_v9  ;;  %v2837_v14 = vpop.permute.xlu0 %2836  ;;  %2975 = vmatprep.subr.mxu0 %v2831_v19  ;;  %v2863_v51 = vmul.f32 %v2858_v56, %v5384_v1  ;;  %v2878_v57 = vsel %vm317_vm6, %v6628_v27, %v6630_v47 }
 0xc00   :  { %2976 = vmatpush1.msra.mxu0 %v2830_v37 }
 0xc01   :  { %4683 = vmatmul.mubr.msk.f32.vlgmr.msra.gmra.mxu0 %vm712_vm10, %v4681_v6  ;;  %3056 = vmatprep.subr.mxu0 %v2817_v63  ;;  %v2841_v60 = vpop.permute.xlu1 %2840  ;;  %v2880_v6 = vsel %vm317_vm6, %v6630_v47, %v6628_v27  ;;  %v4691_v27 = vld [vmem:[%s7139_s23 + $0x30] sm:$0xff]  ;;  %v4695_v47 = vld [vmem:[%s7139_s23 + $0x40] sm:$0xff] }
 0xc02   :  { %v2843_v15 = vsel %vm255_vm4, %v2837_v14, %v2841_v60  ;;  %v2845_v55 = vsel %vm255_vm4, %v2841_v60, %v2837_v14  ;;  %3057 = vmatpush1.msra.mxu0 %v2816_v26  ;;  %3015 = vmatprep.mubr.f32.mxu0 %v7211_v10  ;;  %v2862_v26 = vmul.f32 %v2860_v16, %v5379_v8  ;;  %v6818_v16 = vld [vmem:[%s7202_s0 + $0x18] ss:$0 sm:$0xff] }
 0xc03   :  { %v2848_v38 = vmul.f32 %v2845_v55, %v5361_v20  ;;  %v2849_v25 = vmul.f32 %v2843_v15, %v5369_v42  ;;  %v6678_v43 = vpop.permute.xlu0 %2902  ;;  %3058 = vmatprep.subr.mxu0 %v2815_v52  ;;  %v2882_v52 = vmul.f32 %v2878_v57, %v5418_v11  ;;  %v2883_v60 = vmul.f32 %v2880_v6, %v5423_v30  ;;  %v4700_v57 = vld [vmem:[%s7139_s23 + $0x58] sm:$0xff] }
 0xc04   :  { %3059 = vmatpush1.msra.mxu0 %v2814_v39  ;;  %v2894_v15 = vsel %vm342_vm7, %v6632_v62, %v6634_v35  ;;  %v4696_v62 = vld [vmem:[%s7139_s23 + $0x48] sm:$0xff]  ;;  %v2899_v35 = vmul.f32 %v2896_v54, %v5444_v41 }
 0xc05   :  { %4684 = vmatmul.mubr.msk.f32.gmra.mxu0 %vm712_vm10, %v4682_v59  ;;  %3142 = vmatprep.subr.mxu1 %v2849_v25  ;;  %v6682_v34 = vpop.permute.xlu1 %2906 }
 0xc06   :  { %3143 = vmatpush1.msra.mxu1 %v2848_v38  ;;  %3092 = vmatprep.mubr.f32.mxu0 %v7211_v10 }
 0xc07   :  { %v2853_v2 = vpop.permute.xlu0 %2852  ;;  %3144 = vmatprep.subr.mxu1 %v2847_v33 }
 0xc08   :  { %3145 = vmatpush1.msra.mxu1 %v2846_v17  ;;  %v4692_v17 = vld [vmem:[%s7139_s23 + $0x38] sm:$0xff] }
 0xc09   :  { %4685 = vmatmul.mubr.msk.f32.vlgmr.msra.gmra.mxu0 %vm712_vm10, %v2934_v49  ;;  %v2857_v23 = vpop.permute.xlu1 %2856  ;;  %3322 = vmatprep.subr.mxu1 %v2869_v53  ;;  %v2898_v49 = vmul.f32 %v2894_v15, %v5441_v48 }
 0xc0a   :  { %v2859_v36 = vsel %vm280_vm5, %v2853_v2, %v2857_v23  ;;  %v2861_v50 = vsel %vm280_vm5, %v2857_v23, %v2853_v2  ;;  %4689 = vmatmul.mubr.msk.f32.vlgmr.msra.gmra.mxu1 %vm712_vm10, %v4687_v12  ;;  %3098 = vmatprep.mubr.f32.mxu0 %v7211_v10  ;;  %v2912_v23 = vsel %vm367_vm8, %v6682_v34, %v6678_v43 }
 0xc0b   :  { %v2864_v13 = vmul.f32 %v2861_v50, %v5379_v8  ;;  %v2865_v37 = vmul.f32 %v2859_v36, %v5384_v1  ;;  %3323 = vmatpush1.msra.mxu1 %v2868_v18  ;;  %v2873_v19 = vpop.permute.xlu0 %2872  ;;  %3184 = vmatprep.mubr.f32.mxu1 %v7211_v10  ;;  %v4699_v36 = vld [vmem:[%s7139_s23 + $0x50] sm:$0xff]  ;;  %v2910_v50 = vsel %vm367_vm8, %v6678_v43, %v6682_v34 }
 0xc0c   :  { %3324 = vmatprep.subr.mxu1 %v2867_v28  ;;  %v2914_v34 = vmul.f32 %v2910_v50, %v5456_v46 }
 0xc0d   :  { %3325 = vmatpush1.msra.mxu1 %v2866_v5  ;;  %4686 = vmatmul.mubr.msk.f32.gmra.mxu0 %vm712_vm10, %v2935_v32  ;;  %v2877_v21 = vpop.permute.xlu1 %2876  ;;  %v6812_v5 = vld [vmem:[%s7202_s0 + $0x10] ss:$0 sm:$0xff] }
 0xc0e   :  { %3232 = vmatprep.subr.mxu0 %v2865_v37  ;;  %v2879_v40 = vsel %vm317_vm6, %v2873_v19, %v2877_v21  ;;  %v2881_v31 = vsel %vm317_vm6, %v2877_v21, %v2873_v19  ;;  %4690 = vmatmul.mubr.msk.f32.gmra.mxu1 %vm712_vm10, %v4688_v44  ;;  %v2915_v37 = vmul.f32 %v2912_v23, %v5460_v4 }
 0xc0f   :  { %v2884_v63 = vmul.f32 %v2879_v40, %v5418_v11  ;;  %v2885_v14 = vmul.f32 %v2881_v31, %v5423_v30  ;;  %3233 = vmatpush1.msra.mxu0 %v2864_v13  ;;  %v2889_v39 = vpop.permute.xlu0 %2888  ;;  %3268 = vmatprep.mubr.f32.mxu0 %v7211_v10  ;;  %v4703_v13 = vld [vmem:[%s7139_s23 + $0x60] sm:$0xff]  ;;  %v4704_v40 = vld [vmem:[%s7139_s23 + $0x68] sm:$0xff] }
 0xc10   :  { %3234 = vmatprep.subr.mxu0 %v2863_v51  ;;  %3358 = vmatprep.mubr.f32.mxu1 %v7211_v10 }
 0xc11   :  { %3235 = vmatpush1.msra.mxu0 %v2862_v26  ;;  %v2893_v22 = vpop.permute.xlu1 %2892 }
 0xc12   :  { %4693 = vmatmul.mubr.msk.f32.vlgmr.msra.gmra.mxu0 %vm712_vm10, %v4691_v27  ;;  %3412 = vmatprep.subr.mxu0 %v2885_v14  ;;  %v2895_v55 = vsel %vm342_vm7, %v2889_v39, %v2893_v22  ;;  %v2897_v59 = vsel %vm342_vm7, %v2893_v22, %v2889_v39  ;;  %v4707_v39 = vld [vmem:[%s7139_s23 + $0x70] sm:$0xff]  ;;  %v4711_v27 = vld [vmem:[%s7139_s23 + $0x80] sm:$0xff] }
 0xc13   :  { %v2900_v38 = vmul.f32 %v2895_v55, %v5441_v48  ;;  %v2901_v25 = vmul.f32 %v2897_v59, %v5444_v41  ;;  %3413 = vmatpush1.msra.mxu0 %v2884_v63  ;;  %v2905_v33 = vpop.permute.xlu0 %2904  ;;  %4697 = vmatmul.mubr.msk.f32.vlgmr.msra.gmra.mxu1 %vm712_vm10, %v4695_v47  ;;  %v4708_v47 = vld [vmem:[%s7139_s23 + $0x78] sm:$0xff] }
 0xc14   :  { %3414 = vmatprep.subr.mxu0 %v2883_v60  ;;  %3274 = vmatprep.mubr.f32.mxu0 %v7211_v10 }
 0xc15   :  { %3415 = vmatpush1.msra.mxu0 %v2882_v52  ;;  %v2909_v2 = vpop.permute.xlu1 %2908  ;;  %3502 = vmatprep.subr.mxu1 %v2901_v25  ;;  %v4712_v52 = vld [vmem:[%s7139_s23 + $0x88] sm:$0xff] }
 0xc16   :  { %4694 = vmatmul.mubr.msk.f32.gmra.mxu0 %vm712_vm10, %v4692_v17  ;;  %v2911_v53 = vsel %vm367_vm8, %v2905_v33, %v2909_v2  ;;  %v2913_v12 = vsel %vm367_vm8, %v2909_v2, %v2905_v33  ;;  %3364 = vmatprep.mubr.f32.mxu1 %v7211_v10 }
 0xc17   :  { %v2916_v18 = vmul.f32 %v2911_v53, %v5456_v46  ;;  %v2917_v28 = vmul.f32 %v2913_v12, %v5460_v4  ;;  %3503 = vmatpush1.msra.mxu1 %v2900_v38  ;;  %v2921_v56 = vpop.permute.xlu0 %2920  ;;  %3448 = vmatprep.mubr.f32.mxu0 %v7211_v10 }
 0xc18   :  { %4698 = vmatmul.mubr.msk.f32.gmra.mxu1 %vm712_vm10, %v4696_v62  ;;  %3504 = vmatprep.subr.mxu1 %v2899_v35 }
 0xc19   :  { %3505 = vmatpush1.msra.mxu1 %v2898_v49  ;;  %3592 = vmatprep.subr.mxu0 %v2917_v28  ;;  %v2925_v32 = vpop.permute.xlu1 %2924 }
 0xc1a   :  { %4701 = vmatmul.mubr.msk.f32.vlgmr.msra.gmra.mxu0 %vm712_vm10, %v4699_v36  ;;  %v2927_v19 = vsel %vm392_vm9, %v2921_v56, %v2925_v32  ;;  %v2929_v43 = vsel %vm392_vm9, %v2925_v32, %v2921_v56  ;;  %3538 = vmatprep.mubr.f32.mxu1 %v7211_v10 }
 0xc1b   :  { %v2932_v44 = vmul.f32 %v6812_v5, %v2927_v19  ;;  %v2933_v51 = vmul.f32 %v6818_v16, %v2929_v43  ;;  %3593 = vmatpush1.msra.mxu0 %v2916_v18  ;;  %3454 = vmatprep.mubr.f32.mxu0 %v7211_v10  ;;  %v2919_v21 = vpop.permute.xlu0 %2918 }
 0xc1c   :  { %4705 = vmatmul.mubr.msk.f32.vlgmr.msra.gmra.mxu1 %vm712_vm10, %v4703_v13  ;;  %3594 = vmatprep.subr.mxu0 %v2915_v37 }
 0xc1d   :  { %3595 = vmatpush1.msra.mxu0 %v2914_v34  ;;  %v2923_v6 = vpop.permute.xlu1 %2922  ;;  %3682 = vmatprep.subr.mxu1 %v2933_v51 }
 0xc1e   :  { %4702 = vmatmul.mubr.msk.f32.gmra.mxu0 %vm712_vm10, %v4700_v57  ;;  %v2926_v31 = vsel %vm392_vm9, %v2919_v21, %v2923_v6  ;;  %v2928_v26 = vsel %vm392_vm9, %v2923_v6, %v2919_v21  ;;  %3544 = vmatprep.mubr.f32.mxu1 %v7211_v10 }
 0xc1f   :  { %v2930_v63 = vmul.f32 %v6812_v5, %v2926_v31  ;;  %v2931_v14 = vmul.f32 %v6818_v16, %v2928_v26  ;;  %3683 = vmatpush1.msra.mxu1 %v2932_v44  ;;  %3628 = vmatprep.mubr.f32.mxu0 %v7211_v10 }
 0xc20   :  { %4706 = vmatmul.mubr.msk.f32.gmra.mxu1 %vm712_vm10, %v4704_v40 }
 0xc21   :  { %3684 = vmatprep.subr.mxu1 %v2931_v14  ;;  %3718 = vmatprep.mubr.f32.mxu1 %v7211_v10 }
 0xc22   :  { %4709 = vmatmul.mubr.msk.f32.vlgmr.msra.gmra.mxu0 %vm712_vm10, %v4707_v39  ;;  %3685 = vmatpush1.msra.mxu1 %v2930_v63 }
 0xc23   :  { %3634 = vmatprep.mubr.f32.mxu0 %v7211_v10 }
 0xc24   :  { %4713 = vmatmul.mubr.msk.f32.vlgmr.msra.gmra.mxu1 %vm712_vm10, %v4711_v27 }
 0xc25   :  { %3724 = vmatprep.mubr.f32.mxu1 %v7211_v10 }
 0xc26   :  { %4710 = vmatmul.mubr.msk.f32.gmra.mxu0 %vm712_vm10, %v4708_v47 }
 0xc27   :  { %3957 = vmatprep.mubr.f32.mxu0 %v7211_v10 }
 0xc28   :  { %4714 = vmatmul.mubr.msk.f32.gmra.mxu1 %vm712_vm10, %v4712_v52 }
 0xc29   :  { %4107 = vmatprep.mubr.f32.mxu1 %v7211_v10 }
 0xcc1   :  { %v3011_v60 = vpop.f32.mrf.mxu0 }
 0xcc3   :  { %v3013_v22 = vpop.f32.mrf.mxu0 }
 0xcc5   :  { %v3017_v15 = vpop.f32.mrf.mxu0 }
 0xcc7   :  { %v3019_v55 = vpop.f32.mrf.mxu0 }
 0xcc9   :  { %v3094_v59 = vpop.f32.mrf.mxu0 }
 0xcca   :  { %v3180_v54 = vpop.f32.mrf.mxu1  ;;  %v3095_v62 = vadd.f32 %v3094_v59, %v3011_v60 }
 0xccb   :  { %v3096_v38 = vpop.f32.mrf.mxu0 }
 0xccc   :  { %v3182_v25 = vpop.f32.mrf.mxu1  ;;  %v3097_v53 = vadd.f32 %v3096_v38, %v3013_v22  ;;  %v3191_v18 = vadd.f32 %v3180_v54, %v3095_v62  ;;  %v3740_v38 = vpop.permute.xlu1 %3739 }
 0xccd   :  { %v3100_v33 = vpop.f32.mrf.mxu0 }
 0xcce   :  { %v3186_v17 = vpop.f32.mrf.mxu1  ;;  %v3192_v36 = vadd.f32 %v3182_v25, %v3097_v53  ;;  %v3101_v62 = vadd.f32 %v3100_v33, %v3017_v15 }
 0xccf   :  { %v3102_v49 = vpop.f32.mrf.mxu0 }
 0xcd0   :  { %v3188_v2 = vpop.f32.mrf.mxu1 }
 0xcd2   :  { %v3270_v35 = vpop.f32.mrf.mxu0 }
 0xcd3   :  { %v3360_v12 = vpop.f32.mrf.mxu1  ;;  %v3281_v50 = vadd.f32 %v3270_v35, %v3191_v18 }
 0xcd4   :  { %v3272_v23 = vpop.f32.mrf.mxu0 }
 0xcd5   :  { %v3362_v28 = vpop.f32.mrf.mxu1  ;;  %v3282_v37 = vadd.f32 %v3272_v23, %v3192_v36  ;;  %v3371_v34 = vadd.f32 %v3360_v12, %v3281_v50  ;;  %v3103_v12 = vadd.f32 %v3102_v49, %v3019_v55 }
 0xcd6   :  { %v3276_v56 = vpop.f32.mrf.mxu0 }
 0xcd7   :  { %v3372_v57 = vadd.f32 %v3362_v28, %v3282_v37  ;;  %v3193_v28 = vadd.f32 %v3186_v17, %v3101_v62  ;;  %v3194_v50 = vadd.f32 %v3188_v2, %v3103_v12 }
 0xcd8   :  { %v3278_v32 = vpop.f32.mrf.mxu0  ;;  %v3366_v13 = vpop.f32.mrf.mxu1 }
 0xcd9   :  { %v3283_v37 = vadd.f32 %v3276_v56, %v3193_v28 }
 0xcda   :  { %v3368_v19 = vpop.f32.mrf.mxu1  ;;  %v3450_v43 = vpop.f32.mrf.mxu0 }
 0xcdb   :  { %v3461_v21 = vadd.f32 %v3450_v43, %v3371_v34  ;;  %v3284_v43 = vadd.f32 %v3278_v32, %v3194_v50  ;;  %v3373_v15 = vadd.f32 %v3366_v13, %v3283_v37 }
 0xcdc   :  { %v3452_v44 = vpop.f32.mrf.mxu0  ;;  %v3540_v51 = vpop.f32.mrf.mxu1 }
 0xcdd   :  { %v3462_v31 = vadd.f32 %v3452_v44, %v3372_v57  ;;  %v3551_v14 = vadd.f32 %v3540_v51, %v3461_v21  ;;  %v3374_v55 = vadd.f32 %v3368_v19, %v3284_v43  ;;  %v3745_v21 = vpop.permute.xlu0 %3744 }
 0xcde   :  { %v3456_v6 = vpop.f32.mrf.mxu0  ;;  %v3542_v40 = vpop.f32.mrf.mxu1 }
 0xcdf   :  { %v3552_v47 = vadd.f32 %v3542_v40, %v3462_v31  ;;  %v3463_v33 = vadd.f32 %v3456_v6, %v3373_v15 }
 0xce0   :  { %v3458_v26 = vpop.f32.mrf.mxu0  ;;  %v3546_v63 = vpop.f32.mrf.mxu1 }
 0xce1   :  { %v3464_v49 = vadd.f32 %v3458_v26, %v3374_v55  ;;  %v3553_v2 = vadd.f32 %v3546_v63, %v3463_v33  ;;  %v4584_v63 = vld [vmem:[%s7140_s26] sm:$0x3] }
 0xce2   :  { %v3548_v39 = vpop.f32.mrf.mxu1  ;;  %v3630_v27 = vpop.f32.mrf.mxu0 }
 0xce3   :  { %v3641_v52 = vadd.f32 %v3630_v27, %v3551_v14  ;;  %v3554_v13 = vadd.f32 %v3548_v39, %v3464_v49 }
 0xce4   :  { %v3632_v60 = vpop.f32.mrf.mxu0  ;;  %v3720_v22 = vpop.f32.mrf.mxu1 }
 0xce5   :  { %v3642_v59 = vadd.f32 %v3632_v60, %v3552_v47  ;;  %v3731_v54 = vadd.f32 %v3720_v22, %v3641_v52 }
 0xce6   :  { %v3722_v25 = vpop.f32.mrf.mxu1  ;;  %v3636_v17 = vpop.f32.mrf.mxu0 }
 0xce7   :  { %v3747_v35 = vadd.f32 %v3740_v38, %v3731_v54  ;;  %v3732_v53 = vadd.f32 %v3722_v25, %v3642_v59  ;;  %v3643_v34 = vadd.f32 %v3636_v17, %v3553_v2 }
 0xce8   :  { %v3638_v56 = vpop.f32.mrf.mxu0  ;;  %v3726_v32 = vpop.f32.mrf.mxu1 }
 0xce9   :  { %v6860_v23 = vmax.f32 %v3747_v35, 0.0  ;;  %v3748_v18 = vadd.f32 %v3740_v38, %v3732_v53  ;;  %v3644_v19 = vadd.f32 %v3638_v56, %v3554_v13  ;;  %v3733_v51 = vadd.f32 %v3726_v32, %v3643_v34 }
 0xcea   :  { %v3728_v44 = vpop.f32.mrf.mxu1 }
 0xceb   :  { %v6862_v36 = vmax.f32 %v3748_v18, 0.0  ;;  %3771 = vrot.lane.b32.xlu0 %v6860_v23, %s4975_s10  ;;  %v3734_v57 = vadd.f32 %v3728_v44, %v3644_v19  ;;  %v3749_v6 = vadd.f32 %v3745_v21, %v3733_v51 }
 0xced   :  { %3775 = vrot.lane.b32.xlu1 %v6862_v36, %s4975_s10  ;;  %v3750_v40 = vadd.f32 %v3745_v21, %v3734_v57  ;;  %v6890_v31 = vmax.f32 %v3749_v6, 0.0 }
 0xcef   :  { %3755 = vrot.lane.b32.xlu0 %v6860_v23, %s7222_s6  ;;  %v6894_v26 = vmax.f32 %v3750_v40, 0.0 }
 0xcf1   :  { %3759 = vrot.lane.b32.xlu1 %v6862_v36, %s7222_s6 }
 0xcf3   :  { %3787 = vrot.lane.b32.xlu0 %v6860_v23, %s7223_s16 }
 0xcf5   :  { %3791 = vrot.lane.b32.xlu1 %v6862_v36, %s7223_s16 }
 0xcf7   :  { %3803 = vrot.lane.b32.xlu0 %v6860_v23, %s7224_s15 }
 0xcf9   :  { %3807 = vrot.lane.b32.xlu1 %v6862_v36, %s7224_s15 }
 0xcfb   :  { %3823 = vrot.lane.b32.xlu0 %v6860_v23, %s7225_s19 }
 0xcfd   :  { %3827 = vrot.lane.b32.xlu1 %v6862_v36, %s7225_s19 }
 0xcff   :  { %3839 = vrot.lane.b32.xlu0 %v6860_v23, %s7226_s22 }
 0xd01   :  { %3843 = vrot.lane.b32.xlu1 %v6862_v36, %s7226_s22 }
 0xd03   :  { %3855 = vrot.lane.b32.xlu0 %v6860_v23, %s7227_s18 }
 0xd05   :  { %3859 = vrot.lane.b32.xlu1 %v6862_v36, %s7227_s18 }
 0xd07   :  { %3773 = vrot.lane.b32.xlu0 %v6890_v31, %s4975_s10 }
 0xd09   :  { %3777 = vrot.lane.b32.xlu1 %v6894_v26, %s4975_s10 }
 0xd0b   :  { %3757 = vrot.lane.b32.xlu0 %v6890_v31, %s7222_s6 }
 0xd0d   :  { %3761 = vrot.lane.b32.xlu1 %v6894_v26, %s7222_s6  ;;  %s4982_s6 = smov 8  }
 0xd0f   :  { %3789 = vrot.lane.b32.xlu0 %v6890_v31, %s7223_s16 }
 0xd11   :  { %3793 = vrot.lane.b32.xlu1 %v6894_v26, %s7223_s16 }
 0xd13   :  { %3805 = vrot.lane.b32.xlu0 %v6890_v31, %s7224_s15 }
 0xd15   :  { %3809 = vrot.lane.b32.xlu1 %v6894_v26, %s7224_s15 }
 0xd17   :  { %3825 = vrot.lane.b32.xlu0 %v6890_v31, %s7225_s19 }
 0xd19   :  { %3829 = vrot.lane.b32.xlu1 %v6894_v26, %s7225_s19 }
 0xd1b   :  { %3841 = vrot.lane.b32.xlu0 %v6890_v31, %s7226_s22 }
 0xd1d   :  { %3845 = vrot.lane.b32.xlu1 %v6894_v26, %s7226_s22 }
 0xd1f   :  { %3857 = vrot.lane.b32.xlu0 %v6890_v31, %s7227_s18 }
 0xd21   :  { %3861 = vrot.lane.b32.xlu1 %v6894_v26, %s7227_s18 }
 0xd23   :  { %3873 = vrot.lane.b32.xlu0 %v6890_v31, %s7228_s2 }
 0xd25   :  { %3877 = vrot.lane.b32.xlu1 %v6894_v26, %s7228_s2 }
 0xd27   :  { %3871 = vrot.lane.b32.xlu0 %v6860_v23, %s7228_s2 }
 0xd29   :  { %3875 = vrot.lane.b32.xlu1 %v6862_v36, %s7228_s2 }
 0xd2b   :  { %4587 = vperm.xlu0 %4952, %v4584_v63  }
 0xd2d   :  { %2023 = vrot.lane.b32.xlu1 %v6183_v61, %s4982_s6 }
 0xd5d   :  { %v3772_v14 = vpop.permute.xlu0 %3771 }
 0xd5f   :  { %v3776_v39 = vpop.permute.xlu1 %3775 }
 0xd60   :  { %v3779_v18 = vsel %vm230_vm2, %v3772_v14, %v3776_v39  ;;  %v3781_v28 = vsel %vm230_vm2, %v3776_v39, %v3772_v14 }
 0xd61   :  { %v3756_v27 = vpop.permute.xlu0 %3755  ;;  %v3783_v33 = vmul.f32 %v3781_v28, %v5322_v0  ;;  %v3784_v17 = vmul.f32 %v3779_v18, %v5328_v3 }
 0xd63   :  { %v3760_v47 = vpop.permute.xlu1 %3759 }
 0xd64   :  { %v3763_v2 = vsel %vm205_vm3, %v3756_v27, %v3760_v47  ;;  %v3765_v56 = vsel %vm205_vm3, %v3760_v47, %v3756_v27 }
 0xd65   :  { %v3788_v52 = vpop.permute.xlu0 %3787  ;;  %v3767_v44 = vmul.f32 %v3765_v56, %v5339_v7  ;;  %v3768_v51 = vmul.f32 %v3763_v2, %v5345_v9  ;;  %v4722_v2 = vld [vmem:[%s7141_s25 + $0x8] sm:$0x3] }
 0xd67   :  { %v3792_v60 = vpop.permute.xlu1 %3791 }
 0xd68   :  { %v3795_v57 = vsel %vm255_vm4, %v3788_v52, %v3792_v60  ;;  %v3797_v6 = vsel %vm255_vm4, %v3792_v60, %v3788_v52 }
 0xd69   :  { %v3804_v22 = vpop.permute.xlu0 %3803  ;;  %v3799_v27 = vmul.f32 %v3797_v6, %v5361_v20  ;;  %v3800_v47 = vmul.f32 %v3795_v57, %v5369_v42 }
 0xd6b   :  { %v3808_v59 = vpop.permute.xlu1 %3807 }
 0xd6c   :  { %v3811_v52 = vsel %vm280_vm5, %v3804_v22, %v3808_v59 }
 0xd6d   :  { %v6936_v54 = vpop.permute.xlu0 %3823 }
 0xd6f   :  { %v6938_v38 = vpop.permute.xlu1 %3827 }
 0xd71   :  { %v6940_v25 = vpop.permute.xlu0 %3839 }
 0xd73   :  { %v6942_v62 = vpop.permute.xlu1 %3843 }
 0xd75   :  { %v6944_v35 = vpop.permute.xlu0 %3855 }
 0xd77   :  { %v6946_v53 = vpop.permute.xlu1 %3859 }
 0xd79   :  { %v3774_v61 = vpop.permute.xlu0 %3773 }
 0xd7b   :  { %v3778_v12 = vpop.permute.xlu1 %3777 }
 0xd7c   :  { %v3780_v50 = vsel %vm230_vm2, %v3774_v61, %v3778_v12  ;;  %v3782_v37 = vsel %vm230_vm2, %v3778_v12, %v3774_v61  ;;  %v3813_v61 = vsel %vm280_vm5, %v3808_v59, %v3804_v22  ;;  %v4718_v22 = vld [vmem:[%s7141_s25 + $0x4] sm:$0x3]  ;;  %v3820_v59 = vmul.f32 %v6862_v36, %v5405_v24 }
 0xd7d   :  { %v3785_v43 = vmul.f32 %v3782_v37, %v5322_v0  ;;  %v3786_v15 = vmul.f32 %v3780_v50, %v5328_v3  ;;  %v3758_v55 = vpop.permute.xlu0 %3757  ;;  %v4715_v0 = vld [vmem:[%s7141_s25 + $0x2] sm:$0x3]  ;;  %v3822_v50 = vmul.f32 %v6894_v26, %v5405_v24  ;;  %v3815_v37 = vmul.f32 %v3813_v61, %v5379_v8 }
 0xd7e   :  { %v3833_v26 = vsel %vm317_vm6, %v6938_v38, %v6936_v54 }
 0xd7f   :  { %3921 = vmatprep.subr.mxu0 %v3786_v15  ;;  %v3762_v49 = vpop.permute.xlu1 %3761  ;;  %v3836_v56 = vmul.f32 %v3833_v26, %v5423_v30 }
 0xd80   :  { %v3764_v32 = vsel %vm205_vm3, %v3758_v55, %v3762_v49  ;;  %v3766_v13 = vsel %vm205_vm3, %v3762_v49, %v3758_v55  ;;  %3922 = vmatpush1.msra.mxu0 %v3785_v43  ;;  %v3816_v43 = vmul.f32 %v3811_v52, %v5384_v1  ;;  %v3821_v55 = vmul.f32 %v6890_v31, %v5402_v29 }
 0xd81   :  { %v3769_v3 = vmul.f32 %v3766_v13, %v5339_v7  ;;  %v3770_v34 = vmul.f32 %v3764_v32, %v5345_v9  ;;  %v3790_v19 = vpop.permute.xlu0 %3789  ;;  %3923 = vmatprep.subr.mxu0 %v3784_v17  ;;  %v3887_v7 = vld [vmem:[%s7141_s25] sm:$0x3]  ;;  %v3819_v31 = vmul.f32 %v6860_v23, %v5402_v29  ;;  %v4720_v17 = vld [vmem:[%s7141_s25 + $0x6] sm:$0x3]  ;;  %v3831_v49 = vsel %vm317_vm6, %v6936_v54, %v6938_v38 }
 0xd82   :  { %3924 = vmatpush1.msra.mxu0 %v3783_v33  ;;  %v3847_v29 = vsel %vm342_vm7, %v6940_v25, %v6942_v62  ;;  %v3849_v54 = vsel %vm342_vm7, %v6942_v62, %v6940_v25  ;;  %v4724_v25 = vld [vmem:[%s7141_s25 + $0xa] sm:$0x3] }
 0xd83   :  { %3995 = vmatprep.subr.mxu0 %v3770_v34  ;;  %v3794_v21 = vpop.permute.xlu1 %3793  ;;  %4716 = vmatmul.mubr.msk.f32.vlgmr.msra.gmra.mxu0 %vm712_vm10, %v4715_v0  ;;  %v3851_v62 = vmul.f32 %v3847_v29, %v5441_v48  ;;  %v3852_v34 = vmul.f32 %v3849_v54, %v5444_v41 }
 0xd84   :  { %v3796_v40 = vsel %vm255_vm4, %v3790_v19, %v3794_v21  ;;  %v3798_v63 = vsel %vm255_vm4, %v3794_v21, %v3790_v19  ;;  %3996 = vmatpush1.msra.mxu0 %v3769_v3  ;;  %4031 = vmatprep.mubr.f32.mxu0 %v7211_v10  ;;  %v3865_v19 = vsel %vm367_vm8, %v6946_v53, %v6944_v35 }
 0xd85   :  { %v3801_v9 = vmul.f32 %v3798_v63, %v5361_v20  ;;  %v3802_v14 = vmul.f32 %v3796_v40, %v5369_v42  ;;  %v3806_v39 = vpop.permute.xlu0 %3805  ;;  %3997 = vmatprep.subr.mxu0 %v3768_v51  ;;  %v3868_v40 = vmul.f32 %v3865_v19, %v5460_v4 }
 0xd86   :  { %3998 = vmatpush1.msra.mxu0 %v3767_v44 }
 0xd87   :  { %4071 = vmatprep.subr.mxu1 %v3802_v14  ;;  %v3810_v60 = vpop.permute.xlu1 %3809  ;;  %4717 = vmatmul.mubr.msk.f32.vlgmr.msra.gmra.mxu0 %vm712_vm10, %v3887_v7 }
 0xd88   :  { %v3812_v12 = vsel %vm280_vm5, %v3806_v39, %v3810_v60  ;;  %v3814_v18 = vsel %vm280_vm5, %v3810_v60, %v3806_v39  ;;  %4072 = vmatpush1.msra.mxu1 %v3801_v9  ;;  %4185 = vmatprep.mubr.f32.mxu0 %v7211_v10  ;;  %v4728_v9 = vld [vmem:[%s7141_s25 + $0xe] sm:$0x3]  ;;  %v4730_v60 = vld [vmem:[%s7141_s25 + $0x10] sm:$0x3] }
 0xd89   :  { %v3817_v20 = vmul.f32 %v3814_v18, %v5379_v8  ;;  %v3818_v42 = vmul.f32 %v3812_v12, %v5384_v1  ;;  %v3826_v28 = vpop.permute.xlu0 %3825  ;;  %4073 = vmatprep.subr.mxu1 %v3800_v47 }
 0xd8a   :  { %4074 = vmatpush1.msra.mxu1 %v3799_v27 }
 0xd8b   :  { %4149 = vmatprep.subr.mxu0 %v3818_v42  ;;  %v3830_v15 = vpop.permute.xlu1 %3829  ;;  %4227 = vmatprep.subr.mxu1 %v3822_v50 }
 0xd8c   :  { %v3832_v33 = vsel %vm317_vm6, %v3826_v28, %v3830_v15  ;;  %v3834_v24 = vsel %vm317_vm6, %v3830_v15, %v3826_v28  ;;  %4719 = vmatmul.mubr.msk.f32.vlgmr.msra.gmra.mxu1 %vm712_vm10, %v4718_v22  ;;  %4150 = vmatpush1.msra.mxu0 %v3817_v20 }
 0xd8d   :  { %v3837_v1 = vmul.f32 %v3832_v33, %v5418_v11  ;;  %v3838_v8 = vmul.f32 %v3834_v24, %v5423_v30  ;;  %4228 = vmatpush1.msra.mxu1 %v3821_v55  ;;  %v3842_v36 = vpop.permute.xlu0 %3841  ;;  %4151 = vmatprep.subr.mxu0 %v3816_v43  ;;  %v3835_v30 = vmul.f32 %v3831_v49, %v5418_v11 }
 0xd8e   :  { %4229 = vmatprep.subr.mxu1 %v3820_v59  ;;  %4152 = vmatpush1.msra.mxu0 %v3815_v37 }
 0xd8f   :  { %4230 = vmatpush1.msra.mxu1 %v3819_v31  ;;  %4305 = vmatprep.subr.mxu0 %v3838_v8  ;;  %v3846_v23 = vpop.permute.xlu1 %3845 }
 0xd90   :  { %v3848_v38 = vsel %vm342_vm7, %v3842_v36, %v3846_v23  ;;  %v3850_v32 = vsel %vm342_vm7, %v3846_v23, %v3842_v36  ;;  %4721 = vmatmul.mubr.msk.f32.vlgmr.msra.gmra.mxu0 %vm712_vm10, %v4720_v17  ;;  %4263 = vmatprep.mubr.f32.mxu1 %v7211_v10 }
 0xd91   :  { %v3853_v13 = vmul.f32 %v3848_v38, %v5441_v48  ;;  %v3854_v0 = vmul.f32 %v3850_v32, %v5444_v41  ;;  %4306 = vmatpush1.msra.mxu0 %v3837_v1  ;;  %v3858_v3 = vpop.permute.xlu0 %3857  ;;  %4723 = vmatmul.mubr.msk.f32.vlgmr.msra.gmra.mxu1 %vm712_vm10, %v4722_v2  ;;  %v4726_v48 = vld [vmem:[%s7141_s25 + $0xc] sm:$0x3]  ;;  %v3863_v41 = vsel %vm367_vm8, %v6944_v35, %v6946_v53 }
 0xd92   :  { %4307 = vmatprep.subr.mxu0 %v3836_v56  ;;  %4341 = vmatprep.mubr.f32.mxu0 %v7211_v10  ;;  %v3867_v7 = vmul.f32 %v3863_v41, %v5456_v46 }
 0xd93   :  { %4308 = vmatpush1.msra.mxu0 %v3835_v30  ;;  %v3862_v11 = vpop.permute.xlu1 %3861  ;;  %4383 = vmatprep.subr.mxu1 %v3854_v0 }
 0xd94   :  { %v3864_v44 = vsel %vm367_vm8, %v3858_v3, %v3862_v11  ;;  %v3866_v51 = vsel %vm367_vm8, %v3862_v11, %v3858_v3  ;;  %4384 = vmatpush1.msra.mxu1 %v3853_v13  ;;  %4725 = vmatmul.mubr.msk.f32.vlgmr.msra.gmra.mxu0 %vm712_vm10, %v4724_v25 }
 0xd95   :  { %v3869_v57 = vmul.f32 %v3864_v44, %v5456_v46  ;;  %v3870_v21 = vmul.f32 %v3866_v51, %v5460_v4  ;;  %v3874_v6 = vpop.permute.xlu0 %3873  ;;  %4385 = vmatprep.subr.mxu1 %v3852_v34  ;;  %4419 = vmatprep.mubr.f32.mxu1 %v7211_v10 }
 0xd96   :  { %4386 = vmatpush1.msra.mxu1 %v3851_v62  ;;  %4497 = vmatprep.mubr.f32.mxu0 %v7211_v10 }
 0xd97   :  { %4461 = vmatprep.subr.mxu0 %v3870_v21  ;;  %v3878_v63 = vpop.permute.xlu1 %3877  ;;  %4727 = vmatmul.mubr.msk.f32.vlgmr.msra.gmra.mxu1 %vm712_vm10, %v4726_v48 }
 0xd98   :  { %v3880_v35 = vsel %vm392_vm9, %v3874_v6, %v3878_v63  ;;  %v3882_v53 = vsel %vm392_vm9, %v3878_v63, %v3874_v6  ;;  %4462 = vmatpush1.msra.mxu0 %v3869_v57  ;;  %4575 = vmatprep.mubr.f32.mxu1 %v7211_v10 }
 0xd99   :  { %v3885_v4 = vmul.f32 %v6812_v5, %v3880_v35  ;;  %v3886_v14 = vmul.f32 %v6818_v16, %v3882_v53  ;;  %4463 = vmatprep.subr.mxu0 %v3868_v40  ;;  %v3872_v46 = vpop.permute.xlu0 %3871 }
 0xd9a   :  { %4464 = vmatpush1.msra.mxu0 %v3867_v7 }
 0xd9b   :  { %v3876_v39 = vpop.permute.xlu1 %3875  ;;  %4539 = vmatprep.subr.mxu1 %v3886_v14  ;;  %4729 = vmatmul.mubr.msk.f32.vlgmr.msra.gmra.mxu0 %vm712_vm10, %v4728_v9 }
 0xd9c   :  { %v3879_v27 = vsel %vm392_vm9, %v3872_v46, %v3876_v39  ;;  %v3881_v47 = vsel %vm392_vm9, %v3876_v39, %v3872_v46  ;;  %4540 = vmatpush1.msra.mxu1 %v3885_v4 }
 0xd9d   :  { %v3883_v10 = vmul.f32 %v6812_v5, %v3879_v27  ;;  %v3884_v52 = vmul.f32 %v6818_v16, %v3881_v47 }
 0xd9f   :  { %v2024_v61 = vpop.permute.xlu1 %2023  ;;  %4541 = vmatprep.subr.mxu1 %v3884_v52 }
 0xda0   :  { %v2027_v12 = vsel %vm2026_vm14, %v6205_v45, %v2024_v61  ;;  %4542 = vmatpush1.msra.mxu1 %v3883_v10 }
 0xda1   :  { %2029 = vst.msk [vmem:[%s7142_s28] sm:$0x3] %vm2028_vm15, %v2027_v12  ;;  %4731 = vmatmul.mubr.msk.f32.vlgmr.msra.gmra.mxu1 %vm712_vm10, %v4730_v60 }
 0xda6   :  { %v4588_v13 = vpop.permute.xlu0 %4587 }
 0xe43   :  { %v3959_v58 = vpop.f32.mrf.mxu0 }
 0xe45   :  { %v3961_v5 = vpop.f32.mrf.mxu0 }
 0xe47   :  { %v4033_v16 = vpop.f32.mrf.mxu0 }
 0xe48   :  { %v4034_v18 = vadd.f32 %v4033_v16, %v3959_v58 }
 0xe49   :  { %v4035_v20 = vpop.f32.mrf.mxu0 }
 0xe4a   :  { %v4036_v42 = vadd.f32 %v4035_v20, %v3961_v5 }
 0xe4c   :  { %v4109_v28 = vpop.f32.mrf.mxu1 }
 0xe4d   :  { %v4114_v50 = vadd.f32 %v4109_v28, %v4034_v18 }
 0xe4e   :  { %v4111_v22 = vpop.f32.mrf.mxu1 }
 0xe4f   :  { %v4115_v59 = vadd.f32 %v4111_v22, %v4036_v42 }
 0xe50   :  { %v4187_v37 = vpop.f32.mrf.mxu0 }
 0xe51   :  { %v4192_v43 = vadd.f32 %v4187_v37, %v4114_v50  ;;  %v4265_v45 = vpop.f32.mrf.mxu1 }
 0xe52   :  { %v4189_v15 = vpop.f32.mrf.mxu0 }
 0xe53   :  { %v4193_v55 = vadd.f32 %v4189_v15, %v4115_v59  ;;  %v4270_v26 = vadd.f32 %v4265_v45, %v4192_v43  ;;  %v4267_v33 = vpop.f32.mrf.mxu1 }
 0xe54   :  { %v4343_v24 = vpop.f32.mrf.mxu0 }
 0xe55   :  { %v4271_v1 = vadd.f32 %v4267_v33, %v4193_v55  ;;  %v4348_v8 = vadd.f32 %v4343_v24, %v4270_v26 }
 0xe56   :  { %v4345_v36 = vpop.f32.mrf.mxu0 }
 0xe57   :  { %v4421_v31 = vpop.f32.mrf.mxu1  ;;  %v4349_v49 = vadd.f32 %v4345_v36, %v4271_v1 }
 0xe58   :  { %v4426_v2 = vadd.f32 %v4421_v31, %v4348_v8 }
 0xe59   :  { %v4423_v56 = vpop.f32.mrf.mxu1 }
 0xe5a   :  { %v4427_v23 = vadd.f32 %v4423_v56, %v4349_v49 }
 0xe5b   :  { %v4499_v17 = vpop.f32.mrf.mxu0 }
 0xe5c   :  { %v4504_v54 = vadd.f32 %v4499_v17, %v4426_v2 }
 0xe5d   :  { %v4501_v29 = vpop.f32.mrf.mxu0 }
 0xe5e   :  { %v4505_v32 = vadd.f32 %v4501_v29, %v4427_v23 }
 0xe61   :  { %v4577_v38 = vpop.f32.mrf.mxu1 }
 0xe62   :  { %v4582_v30 = vadd.f32 %v4577_v38, %v4504_v54 }
 0xe63   :  { %v4579_v0 = vpop.f32.mrf.mxu1 }
 0xe64   :  { %v4590_v3 = vadd.f32 %v4588_v13, %v4582_v30  ;;  %v4583_v25 = vadd.f32 %v4579_v0, %v4505_v32 }
 0xe66   :  { %v4592_v62 = vmul.f32 0.5, %v4590_v3  ;;  %v4591_v34 = vadd.f32 %v4588_v13, %v4583_v25 }
 0xe68   :  { %4956 = vtanh.f32 %v4592_v62  ;;  %v4593_v11 = vmul.f32 0.5, %v4591_v34 }
 0xe6a   :  { %4958 = vtanh.f32 %v4593_v11 }
 0xe75   :  { %v4957_v19 = vpop.eup %4956 }
 0xe76   :  { %v4596_v44 = vadd.f32 1.0, %v4957_v19 }
 0xe77   :  { %v4959_v51 = vpop.eup %4958 }
 0xe78   :  { %v4597_v48 = vadd.f32 1.0, %v4959_v51  ;;  %v4598_v41 = vmul.f32 0.5, %v4596_v44 }
 0xe7a   :  { %v4599_v57 = vmul.f32 0.5, %v4597_v48 }
 0xe7c   :  { %v4602_v21 = vcombine.low %v4598_v41, %v4599_v57 }
 0xe7e   :  { %4732 = vst.sshfl [vmem:[%s7143_s27] sm:$0x33 pattern:$0x76325410] %v4602_v21 }

</bundles_post_ra>
